<compile_context>
chip_gen: v7x
topology: tpu7x:2x2x1
jax: 0.10.0
libtpu: 0.0.40
codegen_flags: <defaults>
</compile_context>

<pallas_src>
from functools import partial

import numpy as np
import jax
import jax.numpy as jnp
from jax import lax
from jax.experimental import pallas as pl
from jax.experimental.pallas import tpu as pltpu


# ----------------------------------------------------------------------------
# Fused kernel: head LIF -> q/k/v RepConv -> q/k/v LIF -> attention ->
#               attn LIF -> proj RepConv, per (batch-block, t) grid step.
# ----------------------------------------------------------------------------
def _msattn_kernel(x_ref, w1qkv_ref, w2qkv_ref, tapqkv_ref, bqkv_ref,
                   w1p_ref, w2p_ref, tapp_ref, bp_ref,
                   mask_ref, hmask_ref,
                   o_ref,
                   v_head, v_q, v_k, v_v, v_attn, attn_buf,
                   *, C, N, Bb, W, tau):
    inv_tau = 1.0 / tau
    BN = Bb * N

    # Reset all membrane potentials at t == 0 (T is the innermost grid axis).
    @pl.when(pl.program_id(1) == 0)
    def _():
        v_head[...] = jnp.zeros_like(v_head)
        v_q[...] = jnp.zeros_like(v_q)
        v_k[...] = jnp.zeros_like(v_k)
        v_v[...] = jnp.zeros_like(v_v)
        v_attn[...] = jnp.zeros_like(v_attn)

    def lif(v_ref, x, v_th):
        v = v_ref[...]
        h = v + (x - v) * inv_tau
        s = (h >= v_th).astype(jnp.float32)     # Heaviside forward
        v_ref[...] = h * (1.0 - s)              # hard reset to 0
        return s

    def depthwise(y, tap_ref):
        # Depthwise 3x3 on the flat (R, Bb*N) slab: each tap is a circular
        # lane roll (XLU) gated by a precomputed in-bounds mask (also zeroes
        # the cross-image wrap) and scaled per channel (VPU).  The pad-value /
        # BN-shift contribution is folded into the per-channel output bias.
        z = tap_ref[4] * y                      # center tap: always in-bounds
        for k in range(9):
            if k == 4:
                continue
            d = (k // 3 - 1) * W + (k % 3 - 1)
            rolled = pltpu.roll(y, (-d) % BN, axis=1)
            z = z + tap_ref[k] * (mask_ref[k] * rolled)
        return z

    x = x_ref[0]                                                   # (C, BN)

    # head LIF
    s_head = lif(v_head, x, 1.0).astype(jnp.bfloat16)

    # q/k/v branch: stacked first 1x1 conv (+folded BN1) shares the head
    # spikes; depthwise runs on the stacked (3C, BN) slab; second 1x1 conv
    # (+folded BN2, BN3) is done per branch (no zero-padded block-diag).
    # TODO(synk): for realistic C (>=256) chunk the 3C rows of y/z with
    # lax.fori_loop(unroll=True) to bound the f32 live range (vreg pressure).
    y = jnp.dot(w1qkv_ref[...], s_head, preferred_element_type=jnp.float32)
    z = depthwise(y, tapqkv_ref)                                   # (3C, BN)

    spikes = []
    for i, v_ref in enumerate((v_q, v_k, v_v)):
        zi = z[i * C:(i + 1) * C].astype(jnp.bfloat16)
        pre = jnp.dot(w2qkv_ref[i], zi,
                      preferred_element_type=jnp.float32) + bqkv_ref[i]
        spikes.append(lif(v_ref, pre, 1.0).astype(jnp.bfloat16))
    q16, k16, v16 = spikes                                         # (C, BN)

    # Spiking linear attention, per image (attention must not mix batches):
    #   O_b = (scale * head_mask o (V_b K_b^T)) @ Q_b
    hm = hmask_ref[...]                                            # (C, C)
    for b in range(Bb):
        lo, hi = b * N, (b + 1) * N
        kv = lax.dot_general(v16[:, lo:hi], k16[:, lo:hi],
                             (((1,), (1,)), ((), ())),
                             preferred_element_type=jnp.float32)   # V K^T
        kvm = (kv * hm).astype(jnp.bfloat16)
        attn_buf[:, lo:hi] = jnp.dot(kvm, q16[:, lo:hi],
                                     preferred_element_type=jnp.float32)

    # attention LIF (v_threshold = 0.5)
    s_attn = lif(v_attn, attn_buf[...], 0.5).astype(jnp.bfloat16)

    # projection RepConv branch
    y_p = jnp.dot(w1p_ref[...], s_attn, preferred_element_type=jnp.float32)
    z_p = depthwise(y_p, tapp_ref)
    out = jnp.dot(w2p_ref[...], z_p.astype(jnp.bfloat16),
                  preferred_element_type=jnp.float32) + bp_ref[...]
    o_ref[0] = out


# ----------------------------------------------------------------------------
# Wrapper
# ----------------------------------------------------------------------------
def _choose_batch_fold(B, N):
    """Largest divisor of B with Bb*N <= 1024 lanes (wide, unmasked stores)."""
    bb = 1
    for d in range(1, B + 1):
        if B % d == 0 and d * N <= 1024:
            bb = d
    return bb


def _border_masks(H, W, Bb):
    """mask[k, 0, b*N + h*W + w] = 1 iff the k-th 3x3 neighbor is in-bounds."""
    N = H * W
    m = np.zeros((9, 1, Bb * N), np.float32)
    for k in range(9):
        dh, dw = k // 3 - 1, k % 3 - 1
        for b in range(Bb):
            for h in range(H):
                for w in range(W):
                    if 0 <= h + dh < H and 0 <= w + dw < W:
                        m[k, 0, b * N + h * W + w] = 1.0
    return jnp.asarray(m)


def ms_attention_forward(x, kin, num_heads, scale=0.125, tau=2.0):
    T, B, C, H, W = x.shape
    N = H * W
    Bb = _choose_batch_fold(B, N)
    BN = Bb * N

    # Channel-major with the batch folded into the lane axis: (T, C, B*N),
    # lane index = b*N + h*W + w.
    xr = jnp.transpose(x.reshape(T, B, C, N).astype(jnp.float32),
                       (0, 2, 1, 3)).reshape(T, C, B * N)

    masks = _border_masks(H, W, Bb)                                # (9, 1, BN)
    hd = C // num_heads
    head = np.arange(C) // hd
    hmask = jnp.asarray((head[:, None] == head[None, :]).astype(np.float32)
                        * scale)                                   # (C, C)

    kernel = partial(_msattn_kernel, C=C, N=N, Bb=Bb, W=W, tau=tau)

    io_spec = pl.BlockSpec((1, C, BN), lambda bi, t: (t, 0, bi))

    def cspec(a):
        zeros = (0,) * a.ndim
        return pl.BlockSpec(a.shape, lambda bi, t: zeros)

    consts = (kin["w1qkv"], kin["w2qkv"], kin["tap_qkv"], kin["b_qkv"],
              kin["w1p"], kin["w2p"], kin["tap_p"], kin["b_p"], masks, hmask)

    out = pl.pallas_call(
        kernel,
        out_shape=jax.ShapeDtypeStruct((T, C, B * N), jnp.float32),
        grid_spec=pltpu.PrefetchScalarGridSpec(
            num_scalar_prefetch=0,
            # T must be the innermost, "arbitrary" axis: the LIF membrane
            # scratch carries across it and resets at t == 0.
            grid=(B // Bb, T),
            in_specs=[io_spec] + [cspec(a) for a in consts],
            out_specs=io_spec,
            scratch_shapes=[
                pltpu.VMEM((C, BN), jnp.float32),    # head LIF membrane
                pltpu.VMEM((C, BN), jnp.float32),    # q LIF membrane
                pltpu.VMEM((C, BN), jnp.float32),    # k LIF membrane
                pltpu.VMEM((C, BN), jnp.float32),    # v LIF membrane
                pltpu.VMEM((C, BN), jnp.float32),    # attn LIF membrane
                pltpu.VMEM((C, BN), jnp.float32),    # attn assembly buffer
            ],
        ),
        compiler_params=pltpu.CompilerParams(
            dimension_semantics=("parallel", "arbitrary"),
            vmem_limit_bytes=32 * 1024 * 1024),
    )(xr, *consts)

    return out.reshape(T, C, B, N).transpose(0, 2, 1, 3).reshape(T, B, C, H, W)


# ----------------------------------------------------------------------------
# Host-side precomputation: BN folding, stacked weights, per-channel taps,
# and the analytically folded pad/BN-shift bias (all compact, no N broadcast).
# ----------------------------------------------------------------------------
def prepare_kernel_inputs(params, C):
    def pack(p):
        w1f, sh1, wd, w2f, b2f = p
        wd9 = wd.reshape(C, 9)                    # k = 3*(dh+1) + (dw+1)
        tap = jnp.transpose(wd9)                  # (9, C) per-channel taps
        # BN1 shift sh1 (== BNAndPad pad value) contributes through every tap
        # with total weight sum_k wd[c, k]; fold it + b2f into one bias.
        bias = w2f @ (sh1 * jnp.sum(wd9, axis=1)) + b2f
        return w1f, tap, w2f, bias

    w1q, tq, w2q, bq = pack(params["q"])
    w1k, tk, w2k, bk = pack(params["k"])
    w1v, tv, w2v, bv = pack(params["v"])
    w1p, tp, w2p, bp = pack(params["proj"])

    return {
        "w1qkv": jnp.concatenate([w1q, w1k, w1v], 0).astype(jnp.bfloat16),  # (3C, C)
        "w2qkv": jnp.stack([w2q, w2k, w2v], 0).astype(jnp.bfloat16),        # (3, C, C)
        "tap_qkv": jnp.concatenate([tq, tk, tv], 1)[..., None]
                      .astype(jnp.float32),                                 # (9, 3C, 1)
        "b_qkv": jnp.stack([bq, bk, bv], 0)[..., None].astype(jnp.float32), # (3, C, 1)
        "w1p": w1p.astype(jnp.bfloat16),                                    # (C, C)
        "w2p": w2p.astype(jnp.bfloat16),                                    # (C, C)
        "tap_p": tp[..., None].astype(jnp.float32),                         # (9, C, 1)
        "b_p": bp[:, None].astype(jnp.float32),                             # (C, 1)
    }


# ----------------------------------------------------------------------------
# Deterministic parameter construction (RepConv + BNs), then BN folding.
# ----------------------------------------------------------------------------
def make_branch_params(key, C):
    ks = jax.random.split(key, 14)
    p = {}
    p["w1"] = jax.random.normal(ks[0], (C, C), jnp.float32) / jnp.sqrt(C)
    p["g1"] = 1.0 + 0.1 * jax.random.normal(ks[1], (C,), jnp.float32)
    p["b1"] = 0.1 * jax.random.normal(ks[2], (C,), jnp.float32)
    p["m1"] = 0.1 * jax.random.normal(ks[3], (C,), jnp.float32)
    p["v1"] = 0.9 + 0.2 * jax.random.uniform(ks[4], (C,), jnp.float32)
    p["wd"] = jax.random.normal(ks[5], (C, 3, 3), jnp.float32) / 3.0
    p["w2"] = jax.random.normal(ks[6], (C, C), jnp.float32) / jnp.sqrt(C)
    p["g2"] = 1.0 + 0.1 * jax.random.normal(ks[7], (C,), jnp.float32)
    p["b2"] = 0.1 * jax.random.normal(ks[8], (C,), jnp.float32)
    p["m2"] = 0.1 * jax.random.normal(ks[9], (C,), jnp.float32)
    p["v2"] = 0.9 + 0.2 * jax.random.uniform(ks[10], (C,), jnp.float32)
    p["g3"] = 1.0 + 0.1 * jax.random.normal(ks[11], (C,), jnp.float32)
    p["b3"] = 0.1 * jax.random.normal(ks[12], (C,), jnp.float32)
    p["m3"] = 0.05 * jax.random.normal(ks[13], (C,), jnp.float32)
    p["v3"] = jnp.ones((C,), jnp.float32)
    return p


def fold_branch(p, eps=1e-5):
    s1 = p["g1"] / jnp.sqrt(p["v1"] + eps)
    sh1 = p["b1"] - p["m1"] * s1               # also the BNAndPad pad value
    w1f = p["w1"] * s1[:, None]
    s2 = p["g2"] / jnp.sqrt(p["v2"] + eps)
    sh2 = p["b2"] - p["m2"] * s2
    s3 = p["g3"] / jnp.sqrt(p["v3"] + eps)
    sh3 = p["b3"] - p["m3"] * s3
    w2f = p["w2"] * (s2 * s3)[:, None]
    b2f = sh2 * s3 + sh3
    return (w1f, sh1, p["wd"], w2f, b2f)


if __name__ == "__main__":
    T, B, C, H, W = 2, 2, 32, 8, 8
    num_heads = 8                                # dim % num_heads == 0

    key = jax.random.PRNGKey(0)
    kx, kq, kk, kv, kp = jax.random.split(key, 5)

    # input scaled so LIF neurons actually emit some spikes
    x = jax.random.uniform(kx, (T, B, C, H, W), jnp.float32, 0.0, 4.0)

    params = {
        "q": fold_branch(make_branch_params(kq, C)),
        "k": fold_branch(make_branch_params(kk, C)),
        "v": fold_branch(make_branch_params(kv, C)),
        "proj": fold_branch(make_branch_params(kp, C)),
    }
    kin = prepare_kernel_inputs(params, C)

    out = ms_attention_forward(x, kin, num_heads)
    out = jax.block_until_ready(out)
    assert out.shape == (T, B, C, H, W)
    assert bool(jnp.all(jnp.isfinite(out)))
    print("KERNEL_OK")
</pallas_src>

<mosaic_0001>
module attributes {stable_mosaic.version = 11 : i64} {
  func.func @_msattn_kernel(%arg0: i32, %arg1: i32, %arg2: memref<1x32x128xf32, #tpu.memory_space<vmem>>, %arg3: memref<96x32xbf16, #tpu.memory_space<vmem>>, %arg4: memref<3x32x32xbf16, #tpu.memory_space<vmem>>, %arg5: memref<9x96x1xf32, #tpu.memory_space<vmem>>, %arg6: memref<3x32x1xf32, #tpu.memory_space<vmem>>, %arg7: memref<32x32xbf16, #tpu.memory_space<vmem>>, %arg8: memref<32x32xbf16, #tpu.memory_space<vmem>>, %arg9: memref<9x32x1xf32, #tpu.memory_space<vmem>>, %arg10: memref<32x1xf32, #tpu.memory_space<vmem>>, %arg11: memref<9x1x128xf32, #tpu.memory_space<vmem>>, %arg12: memref<32x32xf32, #tpu.memory_space<vmem>>, %arg13: memref<1x32x128xf32, #tpu.memory_space<vmem>>, %arg14: memref<32x128xf32, #tpu.memory_space<vmem>>, %arg15: memref<32x128xf32, #tpu.memory_space<vmem>>, %arg16: memref<32x128xf32, #tpu.memory_space<vmem>>, %arg17: memref<32x128xf32, #tpu.memory_space<vmem>>, %arg18: memref<32x128xf32, #tpu.memory_space<vmem>>, %arg19: memref<32x128xf32, #tpu.memory_space<vmem>>) attributes {dimension_semantics = [#tpu.dimension_semantics<parallel>, #tpu.dimension_semantics<arbitrary>], iteration_bounds = array<i64: 1, 2>, scalar_prefetch = 0 : i64, scratch_operands = 6 : i64, tpu.core_type = #tpu.core_type<tc>, window_params = [{transform_indices = @transform_0, window_bounds = array<i64: 1, 32, 128>}, {pipeline_mode = #tpu.pipeline_mode<synchronous>, transform_indices = @transform_1, window_bounds = array<i64: 96, 32>}, {pipeline_mode = #tpu.pipeline_mode<synchronous>, transform_indices = @transform_2, window_bounds = array<i64: 3, 32, 32>}, {pipeline_mode = #tpu.pipeline_mode<synchronous>, transform_indices = @transform_3, window_bounds = array<i64: 9, 96, 1>}, {pipeline_mode = #tpu.pipeline_mode<synchronous>, transform_indices = @transform_4, window_bounds = array<i64: 3, 32, 1>}, {pipeline_mode = #tpu.pipeline_mode<synchronous>, transform_indices = @transform_5, window_bounds = array<i64: 32, 32>}, {pipeline_mode = #tpu.pipeline_mode<synchronous>, transform_indices = @transform_6, window_bounds = array<i64: 32, 32>}, {pipeline_mode = #tpu.pipeline_mode<synchronous>, transform_indices = @transform_7, window_bounds = array<i64: 9, 32, 1>}, {pipeline_mode = #tpu.pipeline_mode<synchronous>, transform_indices = @transform_8, window_bounds = array<i64: 32, 1>}, {pipeline_mode = #tpu.pipeline_mode<synchronous>, transform_indices = @transform_9, window_bounds = array<i64: 9, 1, 128>}, {pipeline_mode = #tpu.pipeline_mode<synchronous>, transform_indices = @transform_10, window_bounds = array<i64: 32, 32>}, {transform_indices = @transform_11, window_bounds = array<i64: 1, 32, 128>}]} {
    %c0_i32 = arith.constant 0 : i32
    %0 = arith.cmpi eq, %arg1, %c0_i32 : i32
    %1 = arith.extui %0 : i1 to i32
    %c0_i32_0 = arith.constant 0 : i32
    %2 = arith.cmpi ne, %1, %c0_i32_0 : i32
    scf.if %2 {
      %cst_185 = arith.constant 0.000000e+00 : f32
      %301 = vector.broadcast %cst_185 : f32 to vector<32x128xf32>
      %c0_186 = arith.constant 0 : index
      %c0_187 = arith.constant 0 : index
      %302 = vector.load %arg14[%c0_186, %c0_187] : memref<32x128xf32, #tpu.memory_space<vmem>>, vector<32x128xf32>
      tpu.vector_store %arg14[%c0_186, %c0_187], %301 {strides = array<i32>} : memref<32x128xf32, #tpu.memory_space<vmem>>, vector<32x128xf32>,
      %cst_188 = arith.constant 0.000000e+00 : f32
      %303 = vector.broadcast %cst_188 : f32 to vector<32x128xf32>
      %c0_189 = arith.constant 0 : index
      %c0_190 = arith.constant 0 : index
      %304 = vector.load %arg15[%c0_189, %c0_190] : memref<32x128xf32, #tpu.memory_space<vmem>>, vector<32x128xf32>
      tpu.vector_store %arg15[%c0_189, %c0_190], %303 {strides = array<i32>} : memref<32x128xf32, #tpu.memory_space<vmem>>, vector<32x128xf32>,
      %cst_191 = arith.constant 0.000000e+00 : f32
      %305 = vector.broadcast %cst_191 : f32 to vector<32x128xf32>
      %c0_192 = arith.constant 0 : index
      %c0_193 = arith.constant 0 : index
      %306 = vector.load %arg16[%c0_192, %c0_193] : memref<32x128xf32, #tpu.memory_space<vmem>>, vector<32x128xf32>
      tpu.vector_store %arg16[%c0_192, %c0_193], %305 {strides = array<i32>} : memref<32x128xf32, #tpu.memory_space<vmem>>, vector<32x128xf32>,
      %cst_194 = arith.constant 0.000000e+00 : f32
      %307 = vector.broadcast %cst_194 : f32 to vector<32x128xf32>
      %c0_195 = arith.constant 0 : index
      %c0_196 = arith.constant 0 : index
      %308 = vector.load %arg17[%c0_195, %c0_196] : memref<32x128xf32, #tpu.memory_space<vmem>>, vector<32x128xf32>
      tpu.vector_store %arg17[%c0_195, %c0_196], %307 {strides = array<i32>} : memref<32x128xf32, #tpu.memory_space<vmem>>, vector<32x128xf32>,
      %cst_197 = arith.constant 0.000000e+00 : f32
      %309 = vector.broadcast %cst_197 : f32 to vector<32x128xf32>
      %c0_198 = arith.constant 0 : index
      %c0_199 = arith.constant 0 : index
      %310 = vector.load %arg18[%c0_198, %c0_199] : memref<32x128xf32, #tpu.memory_space<vmem>>, vector<32x128xf32>
      tpu.vector_store %arg18[%c0_198, %c0_199], %309 {strides = array<i32>} : memref<32x128xf32, #tpu.memory_space<vmem>>, vector<32x128xf32>,
    } else {
    }
    %c0 = arith.constant 0 : index
    %c0_1 = arith.constant 0 : index
    %c0_2 = arith.constant 0 : index
    %3 = vector.load %arg2[%c0, %c0_1, %c0_2] : memref<1x32x128xf32, #tpu.memory_space<vmem>>, vector<1x32x128xf32>
    %4 = vector.shape_cast %3 : vector<1x32x128xf32> to vector<32x128xf32>
    %c0_3 = arith.constant 0 : index
    %c0_4 = arith.constant 0 : index
    %5 = vector.load %arg14[%c0_3, %c0_4] : memref<32x128xf32, #tpu.memory_space<vmem>>, vector<32x128xf32>
    %6 = arith.subf %4, %5 : vector<32x128xf32>
    %cst = arith.constant 5.000000e-01 : f32
    %7 = vector.broadcast %cst : f32 to vector<32x128xf32>
    %8 = arith.mulf %6, %7 : vector<32x128xf32>
    %9 = arith.addf %5, %8 : vector<32x128xf32>
    %cst_5 = arith.constant 1.000000e+00 : f32
    %10 = vector.broadcast %cst_5 : f32 to vector<32x128xf32>
    %11 = arith.cmpf oge, %9, %10 : vector<32x128xf32>
    %12 = arith.extui %11 : vector<32x128xi1> to vector<32x128xi32>
    %13 = arith.sitofp %12 : vector<32x128xi32> to vector<32x128xf32>
    %cst_6 = arith.constant 1.000000e+00 : f32
    %14 = vector.broadcast %cst_6 : f32 to vector<32x128xf32>
    %15 = arith.subf %14, %13 : vector<32x128xf32>
    %16 = arith.mulf %9, %15 : vector<32x128xf32>
    %c0_7 = arith.constant 0 : index
    %c0_8 = arith.constant 0 : index
    %17 = vector.load %arg14[%c0_7, %c0_8] : memref<32x128xf32, #tpu.memory_space<vmem>>, vector<32x128xf32>
    tpu.vector_store %arg14[%c0_7, %c0_8], %16 {strides = array<i32>} : memref<32x128xf32, #tpu.memory_space<vmem>>, vector<32x128xf32>,
    %18 = arith.truncf %13 : vector<32x128xf32> to vector<32x128xbf16>
    %c0_9 = arith.constant 0 : index
    %c0_10 = arith.constant 0 : index
    %19 = vector.load %arg3[%c0_9, %c0_10] : memref<96x32xbf16, #tpu.memory_space<vmem>>, vector<96x32xbf16>
    %cst_11 = arith.constant dense<0.000000e+00> : vector<96x128xf32>
    %20 = tpu.matmul %19, %18, %cst_11 {dimension_numbers = #tpu.dot_dimension_numbers<[1], [0], [0], [1], [0, 0, 1, 1], [], []>} : vector<96x32xbf16>, vector<32x128xbf16>, vector<96x128xf32> -> vector<96x128xf32>
    %c4 = arith.constant 4 : index
    %c0_12 = arith.constant 0 : index
    %c0_13 = arith.constant 0 : index
    %21 = vector.load %arg5[%c4, %c0_12, %c0_13] : memref<9x96x1xf32, #tpu.memory_space<vmem>>, vector<1x96x1xf32>
    %22 = vector.shape_cast %21 : vector<1x96x1xf32> to vector<96x1xf32>
    %23 = vector.broadcast %22 : vector<96x1xf32> to vector<96x128xf32>
    %24 = arith.mulf %23, %20 : vector<96x128xf32>
    %c9_i32 = arith.constant 9 : i32
    %25 = tpu.dynamic_rotate %20 by %c9_i32 dim 1 : vector<96x128xf32>, i32 -> vector<96x128xf32>
    %c0_14 = arith.constant 0 : index
    %c0_15 = arith.constant 0 : index
    %c0_16 = arith.constant 0 : index
    %26 = vector.load %arg5[%c0_14, %c0_15, %c0_16] : memref<9x96x1xf32, #tpu.memory_space<vmem>>, vector<1x96x1xf32>
    %27 = vector.shape_cast %26 : vector<1x96x1xf32> to vector<96x1xf32>
    %c0_17 = arith.constant 0 : index
    %c0_18 = arith.constant 0 : index
    %c0_19 = arith.constant 0 : index
    %28 = vector.load %arg11[%c0_17, %c0_18, %c0_19] : memref<9x1x128xf32, #tpu.memory_space<vmem>>, vector<1x1x128xf32>
    %29 = vector.shape_cast %28 : vector<1x1x128xf32> to vector<1x128xf32>
    %30 = vector.broadcast %29 : vector<1x128xf32> to vector<96x128xf32>
    %31 = arith.mulf %30, %25 : vector<96x128xf32>
    %32 = vector.broadcast %27 : vector<96x1xf32> to vector<96x128xf32>
    %33 = arith.mulf %32, %31 : vector<96x128xf32>
    %34 = arith.addf %24, %33 : vector<96x128xf32>
    %c8_i32 = arith.constant 8 : i32
    %35 = tpu.dynamic_rotate %20 by %c8_i32 dim 1 : vector<96x128xf32>, i32 -> vector<96x128xf32>
    %c1 = arith.constant 1 : index
    %c0_20 = arith.constant 0 : index
    %c0_21 = arith.constant 0 : index
    %36 = vector.load %arg5[%c1, %c0_20, %c0_21] : memref<9x96x1xf32, #tpu.memory_space<vmem>>, vector<1x96x1xf32>
    %37 = vector.shape_cast %36 : vector<1x96x1xf32> to vector<96x1xf32>
    %c1_22 = arith.constant 1 : index
    %c0_23 = arith.constant 0 : index
    %c0_24 = arith.constant 0 : index
    %38 = vector.load %arg11[%c1_22, %c0_23, %c0_24] : memref<9x1x128xf32, #tpu.memory_space<vmem>>, vector<1x1x128xf32>
    %39 = vector.shape_cast %38 : vector<1x1x128xf32> to vector<1x128xf32>
    %40 = vector.broadcast %39 : vector<1x128xf32> to vector<96x128xf32>
    %41 = arith.mulf %40, %35 : vector<96x128xf32>
    %42 = vector.broadcast %37 : vector<96x1xf32> to vector<96x128xf32>
    %43 = arith.mulf %42, %41 : vector<96x128xf32>
    %44 = arith.addf %34, %43 : vector<96x128xf32>
    %c7_i32 = arith.constant 7 : i32
    %45 = tpu.dynamic_rotate %20 by %c7_i32 dim 1 : vector<96x128xf32>, i32 -> vector<96x128xf32>
    %c2 = arith.constant 2 : index
    %c0_25 = arith.constant 0 : index
    %c0_26 = arith.constant 0 : index
    %46 = vector.load %arg5[%c2, %c0_25, %c0_26] : memref<9x96x1xf32, #tpu.memory_space<vmem>>, vector<1x96x1xf32>
    %47 = vector.shape_cast %46 : vector<1x96x1xf32> to vector<96x1xf32>
    %c2_27 = arith.constant 2 : index
    %c0_28 = arith.constant 0 : index
    %c0_29 = arith.constant 0 : index
    %48 = vector.load %arg11[%c2_27, %c0_28, %c0_29] : memref<9x1x128xf32, #tpu.memory_space<vmem>>, vector<1x1x128xf32>
    %49 = vector.shape_cast %48 : vector<1x1x128xf32> to vector<1x128xf32>
    %50 = vector.broadcast %49 : vector<1x128xf32> to vector<96x128xf32>
    %51 = arith.mulf %50, %45 : vector<96x128xf32>
    %52 = vector.broadcast %47 : vector<96x1xf32> to vector<96x128xf32>
    %53 = arith.mulf %52, %51 : vector<96x128xf32>
    %54 = arith.addf %44, %53 : vector<96x128xf32>
    %c1_i32 = arith.constant 1 : i32
    %55 = tpu.dynamic_rotate %20 by %c1_i32 dim 1 : vector<96x128xf32>, i32 -> vector<96x128xf32>
    %c3 = arith.constant 3 : index
    %c0_30 = arith.constant 0 : index
    %c0_31 = arith.constant 0 : index
    %56 = vector.load %arg5[%c3, %c0_30, %c0_31] : memref<9x96x1xf32, #tpu.memory_space<vmem>>, vector<1x96x1xf32>
    %57 = vector.shape_cast %56 : vector<1x96x1xf32> to vector<96x1xf32>
    %c3_32 = arith.constant 3 : index
    %c0_33 = arith.constant 0 : index
    %c0_34 = arith.constant 0 : index
    %58 = vector.load %arg11[%c3_32, %c0_33, %c0_34] : memref<9x1x128xf32, #tpu.memory_space<vmem>>, vector<1x1x128xf32>
    %59 = vector.shape_cast %58 : vector<1x1x128xf32> to vector<1x128xf32>
    %60 = vector.broadcast %59 : vector<1x128xf32> to vector<96x128xf32>
    %61 = arith.mulf %60, %55 : vector<96x128xf32>
    %62 = vector.broadcast %57 : vector<96x1xf32> to vector<96x128xf32>
    %63 = arith.mulf %62, %61 : vector<96x128xf32>
    %64 = arith.addf %54, %63 : vector<96x128xf32>
    %c127_i32 = arith.constant 127 : i32
    %65 = tpu.dynamic_rotate %20 by %c127_i32 dim 1 : vector<96x128xf32>, i32 -> vector<96x128xf32>
    %c5 = arith.constant 5 : index
    %c0_35 = arith.constant 0 : index
    %c0_36 = arith.constant 0 : index
    %66 = vector.load %arg5[%c5, %c0_35, %c0_36] : memref<9x96x1xf32, #tpu.memory_space<vmem>>, vector<1x96x1xf32>
    %67 = vector.shape_cast %66 : vector<1x96x1xf32> to vector<96x1xf32>
    %c5_37 = arith.constant 5 : index
    %c0_38 = arith.constant 0 : index
    %c0_39 = arith.constant 0 : index
    %68 = vector.load %arg11[%c5_37, %c0_38, %c0_39] : memref<9x1x128xf32, #tpu.memory_space<vmem>>, vector<1x1x128xf32>
    %69 = vector.shape_cast %68 : vector<1x1x128xf32> to vector<1x128xf32>
    %70 = vector.broadcast %69 : vector<1x128xf32> to vector<96x128xf32>
    %71 = arith.mulf %70, %65 : vector<96x128xf32>
    %72 = vector.broadcast %67 : vector<96x1xf32> to vector<96x128xf32>
    %73 = arith.mulf %72, %71 : vector<96x128xf32>
    %74 = arith.addf %64, %73 : vector<96x128xf32>
    %c121_i32 = arith.constant 121 : i32
    %75 = tpu.dynamic_rotate %20 by %c121_i32 dim 1 : vector<96x128xf32>, i32 -> vector<96x128xf32>
    %c6 = arith.constant 6 : index
    %c0_40 = arith.constant 0 : index
    %c0_41 = arith.constant 0 : index
    %76 = vector.load %arg5[%c6, %c0_40, %c0_41] : memref<9x96x1xf32, #tpu.memory_space<vmem>>, vector<1x96x1xf32>
    %77 = vector.shape_cast %76 : vector<1x96x1xf32> to vector<96x1xf32>
    %c6_42 = arith.constant 6 : index
    %c0_43 = arith.constant 0 : index
    %c0_44 = arith.constant 0 : index
    %78 = vector.load %arg11[%c6_42, %c0_43, %c0_44] : memref<9x1x128xf32, #tpu.memory_space<vmem>>, vector<1x1x128xf32>
    %79 = vector.shape_cast %78 : vector<1x1x128xf32> to vector<1x128xf32>
    %80 = vector.broadcast %79 : vector<1x128xf32> to vector<96x128xf32>
    %81 = arith.mulf %80, %75 : vector<96x128xf32>
    %82 = vector.broadcast %77 : vector<96x1xf32> to vector<96x128xf32>
    %83 = arith.mulf %82, %81 : vector<96x128xf32>
    %84 = arith.addf %74, %83 : vector<96x128xf32>
    %c120_i32 = arith.constant 120 : i32
    %85 = tpu.dynamic_rotate %20 by %c120_i32 dim 1 : vector<96x128xf32>, i32 -> vector<96x128xf32>
    %c7 = arith.constant 7 : index
    %c0_45 = arith.constant 0 : index
    %c0_46 = arith.constant 0 : index
    %86 = vector.load %arg5[%c7, %c0_45, %c0_46] : memref<9x96x1xf32, #tpu.memory_space<vmem>>, vector<1x96x1xf32>
    %87 = vector.shape_cast %86 : vector<1x96x1xf32> to vector<96x1xf32>
    %c7_47 = arith.constant 7 : index
    %c0_48 = arith.constant 0 : index
    %c0_49 = arith.constant 0 : index
    %88 = vector.load %arg11[%c7_47, %c0_48, %c0_49] : memref<9x1x128xf32, #tpu.memory_space<vmem>>, vector<1x1x128xf32>
    %89 = vector.shape_cast %88 : vector<1x1x128xf32> to vector<1x128xf32>
    %90 = vector.broadcast %89 : vector<1x128xf32> to vector<96x128xf32>
    %91 = arith.mulf %90, %85 : vector<96x128xf32>
    %92 = vector.broadcast %87 : vector<96x1xf32> to vector<96x128xf32>
    %93 = arith.mulf %92, %91 : vector<96x128xf32>
    %94 = arith.addf %84, %93 : vector<96x128xf32>
    %c119_i32 = arith.constant 119 : i32
    %95 = tpu.dynamic_rotate %20 by %c119_i32 dim 1 : vector<96x128xf32>, i32 -> vector<96x128xf32>
    %c8 = arith.constant 8 : index
    %c0_50 = arith.constant 0 : index
    %c0_51 = arith.constant 0 : index
    %96 = vector.load %arg5[%c8, %c0_50, %c0_51] : memref<9x96x1xf32, #tpu.memory_space<vmem>>, vector<1x96x1xf32>
    %97 = vector.shape_cast %96 : vector<1x96x1xf32> to vector<96x1xf32>
    %c8_52 = arith.constant 8 : index
    %c0_53 = arith.constant 0 : index
    %c0_54 = arith.constant 0 : index
    %98 = vector.load %arg11[%c8_52, %c0_53, %c0_54] : memref<9x1x128xf32, #tpu.memory_space<vmem>>, vector<1x1x128xf32>
    %99 = vector.shape_cast %98 : vector<1x1x128xf32> to vector<1x128xf32>
    %100 = vector.broadcast %99 : vector<1x128xf32> to vector<96x128xf32>
    %101 = arith.mulf %100, %95 : vector<96x128xf32>
    %102 = vector.broadcast %97 : vector<96x1xf32> to vector<96x128xf32>
    %103 = arith.mulf %102, %101 : vector<96x128xf32>
    %104 = arith.addf %94, %103 : vector<96x128xf32>
    %105 = vector.extract_strided_slice %104 {offsets = [0, 0], sizes = [32, 128], strides = [1, 1]} : vector<96x128xf32> to vector<32x128xf32>
    %106 = arith.truncf %105 : vector<32x128xf32> to vector<32x128xbf16>
    %c0_55 = arith.constant 0 : index
    %c0_56 = arith.constant 0 : index
    %c0_57 = arith.constant 0 : index
    %107 = vector.load %arg4[%c0_55, %c0_56, %c0_57] : memref<3x32x32xbf16, #tpu.memory_space<vmem>>, vector<1x32x32xbf16>
    %108 = vector.shape_cast %107 : vector<1x32x32xbf16> to vector<32x32xbf16>
    %cst_58 = arith.constant dense<0.000000e+00> : vector<32x128xf32>
    %109 = tpu.matmul %108, %106, %cst_58 {dimension_numbers = #tpu.dot_dimension_numbers<[1], [0], [0], [1], [0, 0, 1, 1], [], []>} : vector<32x32xbf16>, vector<32x128xbf16>, vector<32x128xf32> -> vector<32x128xf32>
    %c0_59 = arith.constant 0 : index
    %c0_60 = arith.constant 0 : index
    %c0_61 = arith.constant 0 : index
    %110 = vector.load %arg6[%c0_59, %c0_60, %c0_61] : memref<3x32x1xf32, #tpu.memory_space<vmem>>, vector<1x32x1xf32>
    %111 = vector.shape_cast %110 : vector<1x32x1xf32> to vector<32x1xf32>
    %112 = vector.broadcast %111 : vector<32x1xf32> to vector<32x128xf32>
    %113 = arith.addf %109, %112 : vector<32x128xf32>
    %c0_62 = arith.constant 0 : index
    %c0_63 = arith.constant 0 : index
    %114 = vector.load %arg15[%c0_62, %c0_63] : memref<32x128xf32, #tpu.memory_space<vmem>>, vector<32x128xf32>
    %115 = arith.subf %113, %114 : vector<32x128xf32>
    %cst_64 = arith.constant 5.000000e-01 : f32
    %116 = vector.broadcast %cst_64 : f32 to vector<32x128xf32>
    %117 = arith.mulf %115, %116 : vector<32x128xf32>
    %118 = arith.addf %114, %117 : vector<32x128xf32>
    %cst_65 = arith.constant 1.000000e+00 : f32
    %119 = vector.broadcast %cst_65 : f32 to vector<32x128xf32>
    %120 = arith.cmpf oge, %118, %119 : vector<32x128xf32>
    %121 = arith.extui %120 : vector<32x128xi1> to vector<32x128xi32>
    %122 = arith.sitofp %121 : vector<32x128xi32> to vector<32x128xf32>
    %cst_66 = arith.constant 1.000000e+00 : f32
    %123 = vector.broadcast %cst_66 : f32 to vector<32x128xf32>
    %124 = arith.subf %123, %122 : vector<32x128xf32>
    %125 = arith.mulf %118, %124 : vector<32x128xf32>
    %c0_67 = arith.constant 0 : index
    %c0_68 = arith.constant 0 : index
    %126 = vector.load %arg15[%c0_67, %c0_68] : memref<32x128xf32, #tpu.memory_space<vmem>>, vector<32x128xf32>
    tpu.vector_store %arg15[%c0_67, %c0_68], %125 {strides = array<i32>} : memref<32x128xf32, #tpu.memory_space<vmem>>, vector<32x128xf32>,
    %127 = arith.truncf %122 : vector<32x128xf32> to vector<32x128xbf16>
    %128 = vector.extract_strided_slice %104 {offsets = [32, 0], sizes = [32, 128], strides = [1, 1]} : vector<96x128xf32> to vector<32x128xf32>
    %129 = arith.truncf %128 : vector<32x128xf32> to vector<32x128xbf16>
    %c1_69 = arith.constant 1 : index
    %c0_70 = arith.constant 0 : index
    %c0_71 = arith.constant 0 : index
    %130 = vector.load %arg4[%c1_69, %c0_70, %c0_71] : memref<3x32x32xbf16, #tpu.memory_space<vmem>>, vector<1x32x32xbf16>
    %131 = vector.shape_cast %130 : vector<1x32x32xbf16> to vector<32x32xbf16>
    %cst_72 = arith.constant dense<0.000000e+00> : vector<32x128xf32>
    %132 = tpu.matmul %131, %129, %cst_72 {dimension_numbers = #tpu.dot_dimension_numbers<[1], [0], [0], [1], [0, 0, 1, 1], [], []>} : vector<32x32xbf16>, vector<32x128xbf16>, vector<32x128xf32> -> vector<32x128xf32>
    %c1_73 = arith.constant 1 : index
    %c0_74 = arith.constant 0 : index
    %c0_75 = arith.constant 0 : index
    %133 = vector.load %arg6[%c1_73, %c0_74, %c0_75] : memref<3x32x1xf32, #tpu.memory_space<vmem>>, vector<1x32x1xf32>
    %134 = vector.shape_cast %133 : vector<1x32x1xf32> to vector<32x1xf32>
    %135 = vector.broadcast %134 : vector<32x1xf32> to vector<32x128xf32>
    %136 = arith.addf %132, %135 : vector<32x128xf32>
    %c0_76 = arith.constant 0 : index
    %c0_77 = arith.constant 0 : index
    %137 = vector.load %arg16[%c0_76, %c0_77] : memref<32x128xf32, #tpu.memory_space<vmem>>, vector<32x128xf32>
    %138 = arith.subf %136, %137 : vector<32x128xf32>
    %cst_78 = arith.constant 5.000000e-01 : f32
    %139 = vector.broadcast %cst_78 : f32 to vector<32x128xf32>
    %140 = arith.mulf %138, %139 : vector<32x128xf32>
    %141 = arith.addf %137, %140 : vector<32x128xf32>
    %cst_79 = arith.constant 1.000000e+00 : f32
    %142 = vector.broadcast %cst_79 : f32 to vector<32x128xf32>
    %143 = arith.cmpf oge, %141, %142 : vector<32x128xf32>
    %144 = arith.extui %143 : vector<32x128xi1> to vector<32x128xi32>
    %145 = arith.sitofp %144 : vector<32x128xi32> to vector<32x128xf32>
    %cst_80 = arith.constant 1.000000e+00 : f32
    %146 = vector.broadcast %cst_80 : f32 to vector<32x128xf32>
    %147 = arith.subf %146, %145 : vector<32x128xf32>
    %148 = arith.mulf %141, %147 : vector<32x128xf32>
    %c0_81 = arith.constant 0 : index
    %c0_82 = arith.constant 0 : index
    %149 = vector.load %arg16[%c0_81, %c0_82] : memref<32x128xf32, #tpu.memory_space<vmem>>, vector<32x128xf32>
    tpu.vector_store %arg16[%c0_81, %c0_82], %148 {strides = array<i32>} : memref<32x128xf32, #tpu.memory_space<vmem>>, vector<32x128xf32>,
    %150 = arith.truncf %145 : vector<32x128xf32> to vector<32x128xbf16>
    %151 = vector.extract_strided_slice %104 {offsets = [64, 0], sizes = [32, 128], strides = [1, 1]} : vector<96x128xf32> to vector<32x128xf32>
    %152 = arith.truncf %151 : vector<32x128xf32> to vector<32x128xbf16>
    %c2_83 = arith.constant 2 : index
    %c0_84 = arith.constant 0 : index
    %c0_85 = arith.constant 0 : index
    %153 = vector.load %arg4[%c2_83, %c0_84, %c0_85] : memref<3x32x32xbf16, #tpu.memory_space<vmem>>, vector<1x32x32xbf16>
    %154 = vector.shape_cast %153 : vector<1x32x32xbf16> to vector<32x32xbf16>
    %cst_86 = arith.constant dense<0.000000e+00> : vector<32x128xf32>
    %155 = tpu.matmul %154, %152, %cst_86 {dimension_numbers = #tpu.dot_dimension_numbers<[1], [0], [0], [1], [0, 0, 1, 1], [], []>} : vector<32x32xbf16>, vector<32x128xbf16>, vector<32x128xf32> -> vector<32x128xf32>
    %c2_87 = arith.constant 2 : index
    %c0_88 = arith.constant 0 : index
    %c0_89 = arith.constant 0 : index
    %156 = vector.load %arg6[%c2_87, %c0_88, %c0_89] : memref<3x32x1xf32, #tpu.memory_space<vmem>>, vector<1x32x1xf32>
    %157 = vector.shape_cast %156 : vector<1x32x1xf32> to vector<32x1xf32>
    %158 = vector.broadcast %157 : vector<32x1xf32> to vector<32x128xf32>
    %159 = arith.addf %155, %158 : vector<32x128xf32>
    %c0_90 = arith.constant 0 : index
    %c0_91 = arith.constant 0 : index
    %160 = vector.load %arg17[%c0_90, %c0_91] : memref<32x128xf32, #tpu.memory_space<vmem>>, vector<32x128xf32>
    %161 = arith.subf %159, %160 : vector<32x128xf32>
    %cst_92 = arith.constant 5.000000e-01 : f32
    %162 = vector.broadcast %cst_92 : f32 to vector<32x128xf32>
    %163 = arith.mulf %161, %162 : vector<32x128xf32>
    %164 = arith.addf %160, %163 : vector<32x128xf32>
    %cst_93 = arith.constant 1.000000e+00 : f32
    %165 = vector.broadcast %cst_93 : f32 to vector<32x128xf32>
    %166 = arith.cmpf oge, %164, %165 : vector<32x128xf32>
    %167 = arith.extui %166 : vector<32x128xi1> to vector<32x128xi32>
    %168 = arith.sitofp %167 : vector<32x128xi32> to vector<32x128xf32>
    %cst_94 = arith.constant 1.000000e+00 : f32
    %169 = vector.broadcast %cst_94 : f32 to vector<32x128xf32>
    %170 = arith.subf %169, %168 : vector<32x128xf32>
    %171 = arith.mulf %164, %170 : vector<32x128xf32>
    %c0_95 = arith.constant 0 : index
    %c0_96 = arith.constant 0 : index
    %172 = vector.load %arg17[%c0_95, %c0_96] : memref<32x128xf32, #tpu.memory_space<vmem>>, vector<32x128xf32>
    tpu.vector_store %arg17[%c0_95, %c0_96], %171 {strides = array<i32>} : memref<32x128xf32, #tpu.memory_space<vmem>>, vector<32x128xf32>,
    %173 = arith.truncf %168 : vector<32x128xf32> to vector<32x128xbf16>
    %c0_97 = arith.constant 0 : index
    %c0_98 = arith.constant 0 : index
    %174 = vector.load %arg12[%c0_97, %c0_98] : memref<32x32xf32, #tpu.memory_space<vmem>>, vector<32x32xf32>
    %175 = vector.extract_strided_slice %173 {offsets = [0, 0], sizes = [32, 64], strides = [1, 1]} : vector<32x128xbf16> to vector<32x64xbf16>
    %176 = vector.extract_strided_slice %150 {offsets = [0, 0], sizes = [32, 64], strides = [1, 1]} : vector<32x128xbf16> to vector<32x64xbf16>
    %cst_99 = arith.constant dense<0.000000e+00> : vector<32x32xf32>
    %177 = tpu.matmul %175, %176, %cst_99 {dimension_numbers = #tpu.dot_dimension_numbers<[1], [1], [0], [0], [0, 0, 1, 0], [], []>} : vector<32x64xbf16>, vector<32x64xbf16>, vector<32x32xf32> -> vector<32x32xf32>
    %178 = arith.mulf %177, %174 : vector<32x32xf32>
    %179 = arith.truncf %178 : vector<32x32xf32> to vector<32x32xbf16>
    %180 = vector.extract_strided_slice %127 {offsets = [0, 0], sizes = [32, 64], strides = [1, 1]} : vector<32x128xbf16> to vector<32x64xbf16>
    %cst_100 = arith.constant dense<0.000000e+00> : vector<32x64xf32>
    %181 = tpu.matmul %179, %180, %cst_100 {dimension_numbers = #tpu.dot_dimension_numbers<[1], [0], [0], [1], [0, 0, 1, 1], [], []>} : vector<32x32xbf16>, vector<32x64xbf16>, vector<32x64xf32> -> vector<32x64xf32>
    %c0_101 = arith.constant 0 : index
    %c0_102 = arith.constant 0 : index
    %182 = vector.load %arg19[%c0_101, %c0_102] : memref<32x128xf32, #tpu.memory_space<vmem>>, vector<32x64xf32>
    tpu.vector_store %arg19[%c0_101, %c0_102], %181 {strides = array<i32>} : memref<32x128xf32, #tpu.memory_space<vmem>>, vector<32x64xf32>,
    %183 = vector.extract_strided_slice %173 {offsets = [0, 64], sizes = [32, 64], strides = [1, 1]} : vector<32x128xbf16> to vector<32x64xbf16>
    %184 = vector.extract_strided_slice %150 {offsets = [0, 64], sizes = [32, 64], strides = [1, 1]} : vector<32x128xbf16> to vector<32x64xbf16>
    %cst_103 = arith.constant dense<0.000000e+00> : vector<32x32xf32>
    %185 = tpu.matmul %183, %184, %cst_103 {dimension_numbers = #tpu.dot_dimension_numbers<[1], [1], [0], [0], [0, 0, 1, 0], [], []>} : vector<32x64xbf16>, vector<32x64xbf16>, vector<32x32xf32> -> vector<32x32xf32>
    %186 = arith.mulf %185, %174 : vector<32x32xf32>
    %187 = arith.truncf %186 : vector<32x32xf32> to vector<32x32xbf16>
    %188 = vector.extract_strided_slice %127 {offsets = [0, 64], sizes = [32, 64], strides = [1, 1]} : vector<32x128xbf16> to vector<32x64xbf16>
    %cst_104 = arith.constant dense<0.000000e+00> : vector<32x64xf32>
    %189 = tpu.matmul %187, %188, %cst_104 {dimension_numbers = #tpu.dot_dimension_numbers<[1], [0], [0], [1], [0, 0, 1, 1], [], []>} : vector<32x32xbf16>, vector<32x64xbf16>, vector<32x64xf32> -> vector<32x64xf32>
    %c0_105 = arith.constant 0 : index
    %c64 = arith.constant 64 : index
    %190 = vector.load %arg19[%c0_105, %c64] : memref<32x128xf32, #tpu.memory_space<vmem>>, vector<32x64xf32>
    tpu.vector_store %arg19[%c0_105, %c64], %189 {strides = array<i32>} : memref<32x128xf32, #tpu.memory_space<vmem>>, vector<32x64xf32>,
    %c0_106 = arith.constant 0 : index
    %c0_107 = arith.constant 0 : index
    %191 = vector.load %arg19[%c0_106, %c0_107] : memref<32x128xf32, #tpu.memory_space<vmem>>, vector<32x128xf32>
    %c0_108 = arith.constant 0 : index
    %c0_109 = arith.constant 0 : index
    %192 = vector.load %arg18[%c0_108, %c0_109] : memref<32x128xf32, #tpu.memory_space<vmem>>, vector<32x128xf32>
    %193 = arith.subf %191, %192 : vector<32x128xf32>
    %cst_110 = arith.constant 5.000000e-01 : f32
    %194 = vector.broadcast %cst_110 : f32 to vector<32x128xf32>
    %195 = arith.mulf %193, %194 : vector<32x128xf32>
    %196 = arith.addf %192, %195 : vector<32x128xf32>
    %cst_111 = arith.constant 5.000000e-01 : f32
    %197 = vector.broadcast %cst_111 : f32 to vector<32x128xf32>
    %198 = arith.cmpf oge, %196, %197 : vector<32x128xf32>
    %199 = arith.extui %198 : vector<32x128xi1> to vector<32x128xi32>
    %200 = arith.sitofp %199 : vector<32x128xi32> to vector<32x128xf32>
    %cst_112 = arith.constant 1.000000e+00 : f32
    %201 = vector.broadcast %cst_112 : f32 to vector<32x128xf32>
    %202 = arith.subf %201, %200 : vector<32x128xf32>
    %203 = arith.mulf %196, %202 : vector<32x128xf32>
    %c0_113 = arith.constant 0 : index
    %c0_114 = arith.constant 0 : index
    %204 = vector.load %arg18[%c0_113, %c0_114] : memref<32x128xf32, #tpu.memory_space<vmem>>, vector<32x128xf32>
    tpu.vector_store %arg18[%c0_113, %c0_114], %203 {strides = array<i32>} : memref<32x128xf32, #tpu.memory_space<vmem>>, vector<32x128xf32>,
    %205 = arith.truncf %200 : vector<32x128xf32> to vector<32x128xbf16>
    %c0_115 = arith.constant 0 : index
    %c0_116 = arith.constant 0 : index
    %206 = vector.load %arg7[%c0_115, %c0_116] : memref<32x32xbf16, #tpu.memory_space<vmem>>, vector<32x32xbf16>
    %cst_117 = arith.constant dense<0.000000e+00> : vector<32x128xf32>
    %207 = tpu.matmul %206, %205, %cst_117 {dimension_numbers = #tpu.dot_dimension_numbers<[1], [0], [0], [1], [0, 0, 1, 1], [], []>} : vector<32x32xbf16>, vector<32x128xbf16>, vector<32x128xf32> -> vector<32x128xf32>
    %c4_118 = arith.constant 4 : index
    %c0_119 = arith.constant 0 : index
    %c0_120 = arith.constant 0 : index
    %208 = vector.load %arg9[%c4_118, %c0_119, %c0_120] : memref<9x32x1xf32, #tpu.memory_space<vmem>>, vector<1x32x1xf32>
    %209 = vector.shape_cast %208 : vector<1x32x1xf32> to vector<32x1xf32>
    %210 = vector.broadcast %209 : vector<32x1xf32> to vector<32x128xf32>
    %211 = arith.mulf %210, %207 : vector<32x128xf32>
    %c9_i32_121 = arith.constant 9 : i32
    %212 = tpu.dynamic_rotate %207 by %c9_i32_121 dim 1 : vector<32x128xf32>, i32 -> vector<32x128xf32>
    %c0_122 = arith.constant 0 : index
    %c0_123 = arith.constant 0 : index
    %c0_124 = arith.constant 0 : index
    %213 = vector.load %arg9[%c0_122, %c0_123, %c0_124] : memref<9x32x1xf32, #tpu.memory_space<vmem>>, vector<1x32x1xf32>
    %214 = vector.shape_cast %213 : vector<1x32x1xf32> to vector<32x1xf32>
    %c0_125 = arith.constant 0 : index
    %c0_126 = arith.constant 0 : index
    %c0_127 = arith.constant 0 : index
    %215 = vector.load %arg11[%c0_125, %c0_126, %c0_127] : memref<9x1x128xf32, #tpu.memory_space<vmem>>, vector<1x1x128xf32>
    %216 = vector.shape_cast %215 : vector<1x1x128xf32> to vector<1x128xf32>
    %217 = vector.broadcast %216 : vector<1x128xf32> to vector<32x128xf32>
    %218 = arith.mulf %217, %212 : vector<32x128xf32>
    %219 = vector.broadcast %214 : vector<32x1xf32> to vector<32x128xf32>
    %220 = arith.mulf %219, %218 : vector<32x128xf32>
    %221 = arith.addf %211, %220 : vector<32x128xf32>
    %c8_i32_128 = arith.constant 8 : i32
    %222 = tpu.dynamic_rotate %207 by %c8_i32_128 dim 1 : vector<32x128xf32>, i32 -> vector<32x128xf32>
    %c1_129 = arith.constant 1 : index
    %c0_130 = arith.constant 0 : index
    %c0_131 = arith.constant 0 : index
    %223 = vector.load %arg9[%c1_129, %c0_130, %c0_131] : memref<9x32x1xf32, #tpu.memory_space<vmem>>, vector<1x32x1xf32>
    %224 = vector.shape_cast %223 : vector<1x32x1xf32> to vector<32x1xf32>
    %c1_132 = arith.constant 1 : index
    %c0_133 = arith.constant 0 : index
    %c0_134 = arith.constant 0 : index
    %225 = vector.load %arg11[%c1_132, %c0_133, %c0_134] : memref<9x1x128xf32, #tpu.memory_space<vmem>>, vector<1x1x128xf32>
    %226 = vector.shape_cast %225 : vector<1x1x128xf32> to vector<1x128xf32>
    %227 = vector.broadcast %226 : vector<1x128xf32> to vector<32x128xf32>
    %228 = arith.mulf %227, %222 : vector<32x128xf32>
    %229 = vector.broadcast %224 : vector<32x1xf32> to vector<32x128xf32>
    %230 = arith.mulf %229, %228 : vector<32x128xf32>
    %231 = arith.addf %221, %230 : vector<32x128xf32>
    %c7_i32_135 = arith.constant 7 : i32
    %232 = tpu.dynamic_rotate %207 by %c7_i32_135 dim 1 : vector<32x128xf32>, i32 -> vector<32x128xf32>
    %c2_136 = arith.constant 2 : index
    %c0_137 = arith.constant 0 : index
    %c0_138 = arith.constant 0 : index
    %233 = vector.load %arg9[%c2_136, %c0_137, %c0_138] : memref<9x32x1xf32, #tpu.memory_space<vmem>>, vector<1x32x1xf32>
    %234 = vector.shape_cast %233 : vector<1x32x1xf32> to vector<32x1xf32>
    %c2_139 = arith.constant 2 : index
    %c0_140 = arith.constant 0 : index
    %c0_141 = arith.constant 0 : index
    %235 = vector.load %arg11[%c2_139, %c0_140, %c0_141] : memref<9x1x128xf32, #tpu.memory_space<vmem>>, vector<1x1x128xf32>
    %236 = vector.shape_cast %235 : vector<1x1x128xf32> to vector<1x128xf32>
    %237 = vector.broadcast %236 : vector<1x128xf32> to vector<32x128xf32>
    %238 = arith.mulf %237, %232 : vector<32x128xf32>
    %239 = vector.broadcast %234 : vector<32x1xf32> to vector<32x128xf32>
    %240 = arith.mulf %239, %238 : vector<32x128xf32>
    %241 = arith.addf %231, %240 : vector<32x128xf32>
    %c1_i32_142 = arith.constant 1 : i32
    %242 = tpu.dynamic_rotate %207 by %c1_i32_142 dim 1 : vector<32x128xf32>, i32 -> vector<32x128xf32>
    %c3_143 = arith.constant 3 : index
    %c0_144 = arith.constant 0 : index
    %c0_145 = arith.constant 0 : index
    %243 = vector.load %arg9[%c3_143, %c0_144, %c0_145] : memref<9x32x1xf32, #tpu.memory_space<vmem>>, vector<1x32x1xf32>
    %244 = vector.shape_cast %243 : vector<1x32x1xf32> to vector<32x1xf32>
    %c3_146 = arith.constant 3 : index
    %c0_147 = arith.constant 0 : index
    %c0_148 = arith.constant 0 : index
    %245 = vector.load %arg11[%c3_146, %c0_147, %c0_148] : memref<9x1x128xf32, #tpu.memory_space<vmem>>, vector<1x1x128xf32>
    %246 = vector.shape_cast %245 : vector<1x1x128xf32> to vector<1x128xf32>
    %247 = vector.broadcast %246 : vector<1x128xf32> to vector<32x128xf32>
    %248 = arith.mulf %247, %242 : vector<32x128xf32>
    %249 = vector.broadcast %244 : vector<32x1xf32> to vector<32x128xf32>
    %250 = arith.mulf %249, %248 : vector<32x128xf32>
    %251 = arith.addf %241, %250 : vector<32x128xf32>
    %c127_i32_149 = arith.constant 127 : i32
    %252 = tpu.dynamic_rotate %207 by %c127_i32_149 dim 1 : vector<32x128xf32>, i32 -> vector<32x128xf32>
    %c5_150 = arith.constant 5 : index
    %c0_151 = arith.constant 0 : index
    %c0_152 = arith.constant 0 : index
    %253 = vector.load %arg9[%c5_150, %c0_151, %c0_152] : memref<9x32x1xf32, #tpu.memory_space<vmem>>, vector<1x32x1xf32>
    %254 = vector.shape_cast %253 : vector<1x32x1xf32> to vector<32x1xf32>
    %c5_153 = arith.constant 5 : index
    %c0_154 = arith.constant 0 : index
    %c0_155 = arith.constant 0 : index
    %255 = vector.load %arg11[%c5_153, %c0_154, %c0_155] : memref<9x1x128xf32, #tpu.memory_space<vmem>>, vector<1x1x128xf32>
    %256 = vector.shape_cast %255 : vector<1x1x128xf32> to vector<1x128xf32>
    %257 = vector.broadcast %256 : vector<1x128xf32> to vector<32x128xf32>
    %258 = arith.mulf %257, %252 : vector<32x128xf32>
    %259 = vector.broadcast %254 : vector<32x1xf32> to vector<32x128xf32>
    %260 = arith.mulf %259, %258 : vector<32x128xf32>
    %261 = arith.addf %251, %260 : vector<32x128xf32>
    %c121_i32_156 = arith.constant 121 : i32
    %262 = tpu.dynamic_rotate %207 by %c121_i32_156 dim 1 : vector<32x128xf32>, i32 -> vector<32x128xf32>
    %c6_157 = arith.constant 6 : index
    %c0_158 = arith.constant 0 : index
    %c0_159 = arith.constant 0 : index
    %263 = vector.load %arg9[%c6_157, %c0_158, %c0_159] : memref<9x32x1xf32, #tpu.memory_space<vmem>>, vector<1x32x1xf32>
    %264 = vector.shape_cast %263 : vector<1x32x1xf32> to vector<32x1xf32>
    %c6_160 = arith.constant 6 : index
    %c0_161 = arith.constant 0 : index
    %c0_162 = arith.constant 0 : index
    %265 = vector.load %arg11[%c6_160, %c0_161, %c0_162] : memref<9x1x128xf32, #tpu.memory_space<vmem>>, vector<1x1x128xf32>
    %266 = vector.shape_cast %265 : vector<1x1x128xf32> to vector<1x128xf32>
    %267 = vector.broadcast %266 : vector<1x128xf32> to vector<32x128xf32>
    %268 = arith.mulf %267, %262 : vector<32x128xf32>
    %269 = vector.broadcast %264 : vector<32x1xf32> to vector<32x128xf32>
    %270 = arith.mulf %269, %268 : vector<32x128xf32>
    %271 = arith.addf %261, %270 : vector<32x128xf32>
    %c120_i32_163 = arith.constant 120 : i32
    %272 = tpu.dynamic_rotate %207 by %c120_i32_163 dim 1 : vector<32x128xf32>, i32 -> vector<32x128xf32>
    %c7_164 = arith.constant 7 : index
    %c0_165 = arith.constant 0 : index
    %c0_166 = arith.constant 0 : index
    %273 = vector.load %arg9[%c7_164, %c0_165, %c0_166] : memref<9x32x1xf32, #tpu.memory_space<vmem>>, vector<1x32x1xf32>
    %274 = vector.shape_cast %273 : vector<1x32x1xf32> to vector<32x1xf32>
    %c7_167 = arith.constant 7 : index
    %c0_168 = arith.constant 0 : index
    %c0_169 = arith.constant 0 : index
    %275 = vector.load %arg11[%c7_167, %c0_168, %c0_169] : memref<9x1x128xf32, #tpu.memory_space<vmem>>, vector<1x1x128xf32>
    %276 = vector.shape_cast %275 : vector<1x1x128xf32> to vector<1x128xf32>
    %277 = vector.broadcast %276 : vector<1x128xf32> to vector<32x128xf32>
    %278 = arith.mulf %277, %272 : vector<32x128xf32>
    %279 = vector.broadcast %274 : vector<32x1xf32> to vector<32x128xf32>
    %280 = arith.mulf %279, %278 : vector<32x128xf32>
    %281 = arith.addf %271, %280 : vector<32x128xf32>
    %c119_i32_170 = arith.constant 119 : i32
    %282 = tpu.dynamic_rotate %207 by %c119_i32_170 dim 1 : vector<32x128xf32>, i32 -> vector<32x128xf32>
    %c8_171 = arith.constant 8 : index
    %c0_172 = arith.constant 0 : index
    %c0_173 = arith.constant 0 : index
    %283 = vector.load %arg9[%c8_171, %c0_172, %c0_173] : memref<9x32x1xf32, #tpu.memory_space<vmem>>, vector<1x32x1xf32>
    %284 = vector.shape_cast %283 : vector<1x32x1xf32> to vector<32x1xf32>
    %c8_174 = arith.constant 8 : index
    %c0_175 = arith.constant 0 : index
    %c0_176 = arith.constant 0 : index
    %285 = vector.load %arg11[%c8_174, %c0_175, %c0_176] : memref<9x1x128xf32, #tpu.memory_space<vmem>>, vector<1x1x128xf32>
    %286 = vector.shape_cast %285 : vector<1x1x128xf32> to vector<1x128xf32>
    %287 = vector.broadcast %286 : vector<1x128xf32> to vector<32x128xf32>
    %288 = arith.mulf %287, %282 : vector<32x128xf32>
    %289 = vector.broadcast %284 : vector<32x1xf32> to vector<32x128xf32>
    %290 = arith.mulf %289, %288 : vector<32x128xf32>
    %291 = arith.addf %281, %290 : vector<32x128xf32>
    %c0_177 = arith.constant 0 : index
    %c0_178 = arith.constant 0 : index
    %292 = vector.load %arg8[%c0_177, %c0_178] : memref<32x32xbf16, #tpu.memory_space<vmem>>, vector<32x32xbf16>
    %293 = arith.truncf %291 : vector<32x128xf32> to vector<32x128xbf16>
    %cst_179 = arith.constant dense<0.000000e+00> : vector<32x128xf32>
    %294 = tpu.matmul %292, %293, %cst_179 {dimension_numbers = #tpu.dot_dimension_numbers<[1], [0], [0], [1], [0, 0, 1, 1], [], []>} : vector<32x32xbf16>, vector<32x128xbf16>, vector<32x128xf32> -> vector<32x128xf32>
    %c0_180 = arith.constant 0 : index
    %c0_181 = arith.constant 0 : index
    %295 = vector.load %arg10[%c0_180, %c0_181] : memref<32x1xf32, #tpu.memory_space<vmem>>, vector<32x1xf32>
    %296 = vector.broadcast %295 : vector<32x1xf32> to vector<32x128xf32>
    %297 = arith.addf %294, %296 : vector<32x128xf32>
    %c0_182 = arith.constant 0 : index
    %c0_183 = arith.constant 0 : index
    %c0_184 = arith.constant 0 : index
    %298 = vector.load %arg13[%c0_182, %c0_183, %c0_184] : memref<1x32x128xf32, #tpu.memory_space<vmem>>, vector<1x32x128xf32>
    %299 = vector.shape_cast %298 : vector<1x32x128xf32> to vector<32x128xf32>
    %300 = vector.shape_cast %297 : vector<32x128xf32> to vector<1x32x128xf32>
    tpu.vector_store %arg13[%c0_182, %c0_183, %c0_184], %300 {strides = array<i32>} : memref<1x32x128xf32, #tpu.memory_space<vmem>>, vector<1x32x128xf32>,
    return
  }
  func.func @transform_0(%arg0: i32, %arg1: i32) -> (i32, i32, i32) {
    %c0_i32 = arith.constant 0 : i32
    %c0_i32_0 = arith.constant 0 : i32
    return %arg1, %c0_i32, %arg0 : i32, i32, i32
  }
  func.func @transform_1(%arg0: i32, %arg1: i32) -> (i32, i32) {
    %c0_i32 = arith.constant 0 : i32
    %c0_i32_0 = arith.constant 0 : i32
    %c0_i32_1 = arith.constant 0 : i32
    return %c0_i32, %c0_i32_0 : i32, i32
  }
  func.func @transform_2(%arg0: i32, %arg1: i32) -> (i32, i32, i32) {
    %c0_i32 = arith.constant 0 : i32
    %c0_i32_0 = arith.constant 0 : i32
    %c0_i32_1 = arith.constant 0 : i32
    %c0_i32_2 = arith.constant 0 : i32
    return %c0_i32, %c0_i32_0, %c0_i32_1 : i32, i32, i32
  }
  func.func @transform_3(%arg0: i32, %arg1: i32) -> (i32, i32, i32) {
    %c0_i32 = arith.constant 0 : i32
    %c0_i32_0 = arith.constant 0 : i32
    %c0_i32_1 = arith.constant 0 : i32
    %c0_i32_2 = arith.constant 0 : i32
    return %c0_i32, %c0_i32_0, %c0_i32_1 : i32, i32, i32
  }
  func.func @transform_4(%arg0: i32, %arg1: i32) -> (i32, i32, i32) {
    %c0_i32 = arith.constant 0 : i32
    %c0_i32_0 = arith.constant 0 : i32
    %c0_i32_1 = arith.constant 0 : i32
    %c0_i32_2 = arith.constant 0 : i32
    return %c0_i32, %c0_i32_0, %c0_i32_1 : i32, i32, i32
  }
  func.func @transform_5(%arg0: i32, %arg1: i32) -> (i32, i32) {
    %c0_i32 = arith.constant 0 : i32
    %c0_i32_0 = arith.constant 0 : i32
    %c0_i32_1 = arith.constant 0 : i32
    return %c0_i32, %c0_i32_0 : i32, i32
  }
  func.func @transform_6(%arg0: i32, %arg1: i32) -> (i32, i32) {
    %c0_i32 = arith.constant 0 : i32
    %c0_i32_0 = arith.constant 0 : i32
    %c0_i32_1 = arith.constant 0 : i32
    return %c0_i32, %c0_i32_0 : i32, i32
  }
  func.func @transform_7(%arg0: i32, %arg1: i32) -> (i32, i32, i32) {
    %c0_i32 = arith.constant 0 : i32
    %c0_i32_0 = arith.constant 0 : i32
    %c0_i32_1 = arith.constant 0 : i32
    %c0_i32_2 = arith.constant 0 : i32
    return %c0_i32, %c0_i32_0, %c0_i32_1 : i32, i32, i32
  }
  func.func @transform_8(%arg0: i32, %arg1: i32) -> (i32, i32) {
    %c0_i32 = arith.constant 0 : i32
    %c0_i32_0 = arith.constant 0 : i32
    %c0_i32_1 = arith.constant 0 : i32
    return %c0_i32, %c0_i32_0 : i32, i32
  }
  func.func @transform_9(%arg0: i32, %arg1: i32) -> (i32, i32, i32) {
    %c0_i32 = arith.constant 0 : i32
    %c0_i32_0 = arith.constant 0 : i32
    %c0_i32_1 = arith.constant 0 : i32
    %c0_i32_2 = arith.constant 0 : i32
    return %c0_i32, %c0_i32_0, %c0_i32_1 : i32, i32, i32
  }
  func.func @transform_10(%arg0: i32, %arg1: i32) -> (i32, i32) {
    %c0_i32 = arith.constant 0 : i32
    %c0_i32_0 = arith.constant 0 : i32
    %c0_i32_1 = arith.constant 0 : i32
    return %c0_i32, %c0_i32_0 : i32, i32
  }
  func.func @transform_11(%arg0: i32, %arg1: i32) -> (i32, i32, i32) {
    %c0_i32 = arith.constant 0 : i32
    %c0_i32_0 = arith.constant 0 : i32
    return %arg1, %c0_i32, %arg0 : i32, i32, i32
  }
}

</mosaic_0001>

<bundles_post_ra>
// kernel: tpu_custom_call.1
= control target key start
LH: loop header
LB: loop body
LE: loop exit
PB: predicated region body
PF: predicated region fallthrough
CT: control target
= control target key end

     0   :  { %s5741_s0 = inlined_call_operand.vmem [shape: f32[2,32,128], index: 0, kind: input, shape index: {}]   ;;  %s5742_s1 = inlined_call_operand.vmem [shape: bf16[96,32], index: 1, kind: input, shape index: {}]   ;;  %s5743_s2 = inlined_call_operand.vmem [shape: bf16[3,32,32], index: 2, kind: input, shape index: {}]   ;;  %s5744_s3 = inlined_call_operand.vmem [shape: f32[9,96,1], index: 3, kind: input, shape index: {}]   ;;  %s5745_s4 = inlined_call_operand.vmem [shape: f32[3,32,1], index: 4, kind: input, shape index: {}]   ;;  %s5746_s5 = inlined_call_operand.vmem [shape: bf16[32,32], index: 5, kind: input, shape index: {}]   ;;  %s5747_s6 = inlined_call_operand.vmem [shape: bf16[32,32], index: 6, kind: input, shape index: {}]   ;;  %s5748_s7 = inlined_call_operand.vmem [shape: f32[9,32,1], index: 7, kind: input, shape index: {}]   ;;  %s5749_s8 = inlined_call_operand.vmem [shape: f32[32,1], index: 8, kind: input, shape index: {}]   ;;  %s5750_s9 = inlined_call_operand.vmem [shape: f32[9,1,128], index: 9, kind: input, shape index: {}]   ;;  %s5751_s10 = inlined_call_operand.vmem [shape: f32[32,32], index: 10, kind: input, shape index: {}]   ;;  %s5752_s11 = inlined_call_operand.hbm [shape: f32[2,32,128], index: 11, kind: output, shape index: {}]  }
   0x1   :  { %5784 = sst [smem:[#allocation71_spill]] %s5741_s0 }
   0x2   :  { %5785 = sst [smem:[#allocation72_spill]] %s5742_s1 }
   0x3   :  { %5786 = sst [smem:[#allocation73_spill]] %s5743_s2 }
   0x4   :  { %5787 = sst [smem:[#allocation74_spill]] %s5744_s3 }
   0x5   :  { %5788 = sst [smem:[#allocation75_spill]] %s5745_s4 }
   0x6   :  { %5789 = sst [smem:[#allocation76_spill]] %s5751_s10 }
   0x7   :  { %16 = vsyncpa [#allocation9], 0 }
   0x8   :  { %18 = vsyncpa [#allocation9 + $0x1], 0  ;;  %s3934_s17 = smov 0   ;;  %s3936_s18 = smov 0  }
   0x9   :  { %s3938_s19 = smov 0   ;;  %s3940_s20 = smov 0  }
   0xa   :  { %s3942_s21 = smov 0   ;;  %s3944_s22 = smov 0  }
   0xb LB: > { %5790 = sst [smem:[#allocation11_spill]] %s3845_s19  ;;  %s3294_s23 = sadd.s32 4294967295, %s3857_s22   ;;  %s3857_s22 = sphi %s3944_s22, %s24_s22   ;;  %s3853_s21 = sphi %s3942_s21, %s5977_s21   ;;  %s3849_s20 = sphi %s3940_s20, %s5976_s20   ;;  %s3845_s19 = sphi %s3938_s19, %s5975_s19   ;;  %s3841_s18 = sphi %s3936_s18, %s5979_s18   ;;  %s3837_s17 = sphi %s3934_s17, %s5978_s17  }
   0xc   : > { %5791 = sst [smem:[#allocation12_spill]] %s3853_s21  ;;  %s3295_s24 = sadd.s32 4294967294, %s3857_s22  }
   0xd   : > { %s33_s25 = sadd.s32 1, %s3853_s21  ;;  %s283_s26 = sadd.s32 1, %s3845_s19 }
   0xe   : > { %p34_p0 = scmp.ge.s32.totalorder %s33_s25, 2  ;;  %p293_p1 = scmp.ne.s32.totalorder %s3845_s19, %s3841_s18 }
   0xf   : > { %p294_p2 = scmp.eq.s32.totalorder %s3294_s23, 1  ;;  %p299_p3 = scmp.ne.s32.totalorder %s3841_s18, %s3837_s17 }
  0x10   : > { %s5981_s25 = smov (%p34_p0, %s33_s25), 0  ;;  %p300_p5 = scmp.eq.s32.totalorder %s3295_s24, 1 }
  0x11   : > { %5792 = sst [smem:[#allocation13_spill]] %s5981_s25  ;;  %p3974_p4 = por %p294_p2, %p293_p1 }
  0x12   : > { %s278_s28 = ssub.s32 %s3853_s21, %s5981_s25  ;;  %p3298_p6 = scmp.ge.s32.totalorder %s3857_s22, 1 }
  0x13   : > { %p281_p7 = scmp.eq.s32.totalorder %s278_s28, 0  ;;  %p3981_p8 = por %p300_p5, %p299_p3 }
  0x14   : > { %p359_p9 = scmp.lt.s32.totalorder %s3857_s22, 3 }
  0x15   : > { %s5794_s29 = scalar_select %p3981_p8, 1, 0 }
  0x16   : > { %s3987_s30 = scalar_select %p281_p7, %s3845_s19, %s283_s26  }
  0x17   : > { %5795 = sst [smem:[#allocation14_spill]] %s5794_s29  ;;  %p360_p10 = pnand %p3298_p6, %p359_p9 }
  0x18   : > { %5796 = sst [smem:[#allocation15_spill]] %s3987_s30 }
  0x19   : > { %363 = sbr.rel (%p360_p10) target bundleno = 2229 (0x8b5), region = 64 }
  0x20   : > { %s5753_s12 = sand.u32 1, %s3841_s18   ;;  %p402_p11 = scmp.lt.s32.totalorder %s3849_s20, 1 }
  0x21   : > { %s3299_s13 = sshll.u32 %s5753_s12, 5  ;;  %s5797_s0 = sld [smem:[#allocation71_spill]] }
  0x22   : > { %s403_s14 = scalar_select %p402_p11, %s3849_s20, 1 }
  0x23   : > { %s3999_s28 = scalar_lea.vmem [#allocation8], %s3299_s13  ;;  %p3302_p12 = scmp.ne.s32.totalorder %s3849_s20, 0 }
  0x24   : > { %s3554_s15 = sshll.u32 %s403_s14, 5  ;;  %v3859_v0 = vmov (!%p3302_p12), 0.0  }
  0x25   : > { %414 = sbr.rel (%p3302_p12) target bundleno = 47 (0x2f), region = 68  ;;  %415 = vst [vmem:[#allocation2] sm:$0xff] (!%p3302_p12), %v3859_v0  ;;  %416 = vst [vmem:[#allocation2 + $0x8] sm:$0xff] (!%p3302_p12), %v3859_v0 }
  0x26   : > { %417 = vst [vmem:[#allocation2 + $0x10] sm:$0xff] (!%p3302_p12), %v3859_v0  ;;  %418 = vst [vmem:[#allocation2 + $0x18] sm:$0xff] (!%p3302_p12), %v3859_v0 }
  0x27   : > { %s3997_s24 = scalar_lea.vmem %s5797_s0, %s3554_s15  ;;  %419 = vst [vmem:[#allocation3] sm:$0xff] (!%p3302_p12), %v3859_v0  ;;  %420 = vst [vmem:[#allocation3 + $0x8] sm:$0xff] (!%p3302_p12), %v3859_v0 }
  0x28   : > { %421 = vst [vmem:[#allocation3 + $0x10] sm:$0xff] (!%p3302_p12), %v3859_v0  ;;  %422 = vst [vmem:[#allocation3 + $0x18] sm:$0xff] (!%p3302_p12), %v3859_v0 }
  0x29   : > { %423 = vst [vmem:[#allocation4] sm:$0xff] (!%p3302_p12), %v3859_v0  ;;  %424 = vst [vmem:[#allocation4 + $0x8] sm:$0xff] (!%p3302_p12), %v3859_v0 }
  0x2a   : > { %425 = vst [vmem:[#allocation4 + $0x10] sm:$0xff] (!%p3302_p12), %v3859_v0  ;;  %426 = vst [vmem:[#allocation4 + $0x18] sm:$0xff] (!%p3302_p12), %v3859_v0 }
  0x2b   : > { %427 = vst [vmem:[#allocation5] sm:$0xff] (!%p3302_p12), %v3859_v0  ;;  %428 = vst [vmem:[#allocation5 + $0x8] sm:$0xff] (!%p3302_p12), %v3859_v0 }
  0x2c   : > { %429 = vst [vmem:[#allocation5 + $0x10] sm:$0xff] %v3859_v0  ;;  %430 = vst [vmem:[#allocation5 + $0x18] sm:$0xff] %v3859_v0 }
  0x2d   : > { %431 = vst [vmem:[#allocation6] sm:$0xff] %v3859_v0  ;;  %432 = vst [vmem:[#allocation6 + $0x8] sm:$0xff] %v3859_v0 }
  0x2e   : > { %433 = vst [vmem:[#allocation6 + $0x10] sm:$0xff] %v3859_v0  ;;  %434 = vst [vmem:[#allocation6 + $0x18] sm:$0xff] %v3859_v0 }
  0x2f PF: > { %s5798_s3 = sld [smem:[#allocation74_spill]]  ;;  %v3860_v3 = vmov 0   ;;  %v435_v4 = vld [vmem:[%s3997_s24] sm:$0xff]  ;;  %v436_v5 = vld [vmem:[%s3997_s24 + $0x8] sm:$0xff]  ;;  %v437_v12 = vld [vmem:[%s3997_s24 + $0x10] sm:$0xff]  ;;  %vm523_vm0 = vcmask 261120  }
  0x30   : > { %3762 = vset.pattern.permute.xlu1 %v3860_v3  ;;  %3761 = vset.pattern.permute.xlu0 %v3860_v3  ;;  %v439_v7 = vld [vmem:[#allocation2] sm:$0xff]  ;;  %v440_v8 = vld [vmem:[#allocation2 + $0x8] sm:$0xff]  ;;  %v438_v13 = vld [vmem:[%s3997_s24 + $0x18] sm:$0xff]  ;;  %s5799_s1 = sld [smem:[#allocation72_spill]]  ;;  %v5757_v29 = vmov 0.0   ;;  %s5765_s23 = smov 9  }
  0x31   : > { %v443_v10 = vsub.f32 %v435_v4, %v439_v7  ;;  %v444_v11 = vsub.f32 %v436_v5, %v440_v8  ;;  %v441_v14 = vld [vmem:[#allocation2 + $0x10] sm:$0xff]  ;;  %v442_v15 = vld [vmem:[#allocation2 + $0x18] sm:$0xff]  ;;  %v5755_v34 = vmov 1.0|1.0   ;;  %s5763_s24 = smov 8   ;;  %s5761_s26 = smov 7  }
  0x32   : > { %v445_v18 = vsub.f32 %v437_v12, %v441_v14  ;;  %v446_v19 = vsub.f32 %v438_v13, %v442_v15  ;;  %s5759_s13 = smov 1   ;;  %s5770_s12 = smov 127   ;;  %vm2253_vm11 = vcmask 523264  }
  0x33   : > { %v447_v16 = vmul.f32 0.5, %v443_v10  ;;  %v448_v17 = vmul.f32 0.5, %v444_v11  ;;  %s5767_s14 = smov 121   ;;  %s5775_s0 = smov 120  }
  0x34   : > { %v449_v25 = vmul.f32 0.5, %v445_v18  ;;  %v450_v26 = vmul.f32 0.5, %v446_v19  ;;  %s5773_s25 = smov 119   ;;  %s5856_s2 = sld [smem:[#allocation73_spill]] }
  0x35   : > { %v732_v1 = vld [vmem:[%s5798_s3] sm:$0xff]  ;;  %v733_v6 = vld [vmem:[%s5798_s3 + $0x8] sm:$0xff]  ;;  %v451_v21 = vadd.f32 %v447_v16, %v439_v7  ;;  %v452_v22 = vadd.f32 %v448_v17, %v440_v8  ;;  %v3326_v35 = vld [vmem:[%s5798_s3 + $0x198] sm:$0xff]  ;;  %s5860_s16 = smov 119   ;;  %s5861_s15 = smov 7  }
  0x36   : > { %v3323_v2 = vld [vmem:[%s5798_s3 + $0x180] sm:$0xff]  ;;  %765 = vperm.xlu1 %3762, %v732_v1   ;;  %v3324_v9 = vld [vmem:[%s5798_s3 + $0x188] sm:$0xff]  ;;  %v453_v27 = vadd.f32 %v449_v25, %v441_v14  ;;  %v454_v28 = vadd.f32 %v450_v26, %v442_v15  ;;  %v3325_v36 = vld [vmem:[%s5798_s3 + $0x190] sm:$0xff]  ;;  %s5891_s4 = sld [smem:[#allocation75_spill]]  ;;  %s5781_s30 = smov 64  }
  0x37   : > { %638 = vperm.xlu0 %3761, %v3323_v2   ;;  %v3763_v20 = vld [vmem:[%s5799_s1] sm:$0xff]   ;;  %v3337_v23 = vld [vmem:[%s5798_s3 + $0x68] sm:$0xff]  ;;  %vm455_vm1 = vcmp.ge.f32.partialorder %v451_v21, 1.0  ;;  %vm456_vm2 = vcmp.ge.f32.partialorder %v452_v22, 1.0  ;;  %v735_v46 = vld [vmem:[%s5798_s3 + $0x18] sm:$0xff]  ;;  %s5947_s10 = sld [smem:[#allocation76_spill]] }
  0x38   : > { %v3336_v24 = vld [vmem:[%s5798_s3 + $0x60] sm:$0xff]  ;;  %3604 = vmatprep.mubr.msk.bf16.mxu0 %vm523_vm0, %v3763_v20  ;;  %v3303_v30 = vsel %vm455_vm1, 1.0, %v5757_v29  ;;  %v3304_v31 = vsel %vm456_vm2, 1.0, %v5757_v29  ;;  %vm3313_vm3 = vmpackc.low %vm456_vm2, %vm455_vm1  ;;  %vm457_vm4 = vcmp.ge.f32.partialorder %v453_v27, 1.0  ;;  %vm458_vm5 = vcmp.ge.f32.partialorder %v454_v28, 1.0  ;;  %v3764_v45 = vld [vmem:[%s5799_s1 + $0x8] sm:$0xff]  }
  0x39   : > { %v467_v32 = vsub.f32 1.0, %v3303_v30  ;;  %v468_v33 = vsub.f32 1.0, %v3304_v31  ;;  %3600 = vmatprep.subr.msk.bf16.mxu0 %vm3313_vm3, %v5755_v34  ;;  %v3305_v37 = vsel %vm457_vm4, 1.0, %v5757_v29  ;;  %v3306_v38 = vsel %vm458_vm5, 1.0, %v5757_v29  ;;  %vm3315_vm6 = vmpackc.low %vm458_vm5, %vm457_vm4  ;;  %v734_v47 = vld [vmem:[%s5798_s3 + $0x10] sm:$0xff]  ;;  %v3351_v49 = vld [vmem:[%s5798_s3 + $0xc8] sm:$0xff] }
  0x3a   : > { %770 = vperm.xlu1 %3762, %v733_v6   ;;  %3601 = vmatpush3.bf16.msk.msra.mxu0 %vm3313_vm3, %v5755_v34  ;;  %v469_v41 = vsub.f32 1.0, %v3305_v37  ;;  %v470_v42 = vsub.f32 1.0, %v3306_v38  ;;  %v3765_v48 = vld [vmem:[%s5799_s1 + $0x10] sm:$0xff]   ;;  %v3350_v50 = vld [vmem:[%s5798_s3 + $0xc0] sm:$0xff]  ;;  %v3766_v51 = vld [vmem:[%s5799_s1 + $0x18] sm:$0xff]   ;;  %s3872_s21 = smov [#allocation8]  }
  0x3b   : > { %643 = vperm.xlu0 %3761, %v3324_v9   ;;  %v471_v39 = vmul.f32 %v467_v32, %v451_v21  ;;  %v472_v40 = vmul.f32 %v468_v33, %v452_v22  ;;  %3602 = vmatprep.subr.msk.bf16.mxu0 %vm3315_vm6, %v5755_v34  ;;  %v3339_v52 = vld [vmem:[%s5798_s3 + $0x78] sm:$0xff]  ;;  %v3338_v53 = vld [vmem:[%s5798_s3 + $0x70] sm:$0xff]  ;;  %v3767_v54 = vld [vmem:[%s5799_s1 + $0x20] sm:$0xff]  }
  0x3c   : > { %v473_v43 = vmul.f32 %v469_v41, %v453_v27  ;;  %v474_v44 = vmul.f32 %v470_v42, %v454_v28  ;;  %v3365_v55 = vld [vmem:[%s5798_s3 + $0x128] sm:$0xff]  ;;  %v3364_v56 = vld [vmem:[%s5798_s3 + $0x120] sm:$0xff]  ;;  %v3353_v62 = vld [vmem:[%s5798_s3 + $0xd8] sm:$0xff] }
  0x3d   : > { %475 = vst [vmem:[#allocation2] sm:$0xff] %v471_v39  ;;  %476 = vst [vmem:[#allocation2 + $0x8] sm:$0xff] %v472_v40  ;;  %v3328_v57 = vld [vmem:[%s5798_s3 + $0x1a8] sm:$0xff]  ;;  %v3327_v58 = vld [vmem:[%s5798_s3 + $0x1a0] sm:$0xff] }
  0x3e   : > { %911 = vperm.xlu1 %3762, %v3337_v23   ;;  %3603 = vmatpush3.bf16.msk.msra.mxu0 %vm3315_vm6, %v5755_v34  ;;  %477 = vst [vmem:[#allocation2 + $0x10] sm:$0xff] %v473_v43  ;;  %478 = vst [vmem:[#allocation2 + $0x18] sm:$0xff] %v474_v44  ;;  %v3768_v59 = vld [vmem:[%s5799_s1 + $0x28] sm:$0xff]   ;;  %v736_v61 = vld [vmem:[%s5798_s3 + $0x20] sm:$0xff]  ;;  %s5862_s1 = smov 1  }
  0x3f   : > { %906 = vperm.xlu0 %3761, %v3336_v24   ;;  %v737_v60 = vld [vmem:[%s5798_s3 + $0x28] sm:$0xff]  ;;  %v3352_v63 = vld [vmem:[%s5798_s3 + $0xd0] sm:$0xff]  ;;  %v3378_v1 = vld [vmem:[%s5798_s3 + $0x1e0] sm:$0xff] }
  0x40   : > { %v3379_v0 = vld [vmem:[%s5798_s3 + $0x1e8] sm:$0xff]  ;;  %v3340_v3 = vld [vmem:[%s5798_s3 + $0x80] sm:$0xff]  ;;  %v3367_v4 = vld [vmem:[%s5798_s3 + $0x138] sm:$0xff] }
  0x41   : > { %3605 = vmatmul.mubr.msk.bf16.vlgmr.msra.gmra.mrb[0].mxu0 %vm523_vm0, %v3764_v45  ;;  %v3341_v2 = vld [vmem:[%s5798_s3 + $0x88] sm:$0xff]  ;;  %v3366_v5 = vld [vmem:[%s5798_s3 + $0x130] sm:$0xff]  ;;  %v3392_v7 = vld [vmem:[%s5798_s3 + $0x240] sm:$0xff] }
  0x42   : > { %653 = vperm.xlu1 %3762, %v3326_v35   ;;  %3608 = vmatprep.mubr.msk.bf16.mxu0 %vm523_vm0, %v3765_v48  ;;  %v3393_v6 = vld [vmem:[%s5798_s3 + $0x248] sm:$0xff]  ;;  %v3330_v8 = vld [vmem:[%s5798_s3 + $0x1b8] sm:$0xff]  ;;  %v3329_v9 = vld [vmem:[%s5798_s3 + $0x1b0] sm:$0xff] }
  0x43   : > { %648 = vperm.xlu0 %3761, %v3325_v36   ;;  %v739_v10 = vld [vmem:[%s5798_s3 + $0x38] sm:$0xff]  ;;  %v738_v11 = vld [vmem:[%s5798_s3 + $0x30] sm:$0xff]  ;;  %v3355_v12 = vld [vmem:[%s5798_s3 + $0xe8] sm:$0xff] }
  0x44   : > { %v3354_v13 = vld [vmem:[%s5798_s3 + $0xe0] sm:$0xff]  ;;  %v3381_v14 = vld [vmem:[%s5798_s3 + $0x1f8] sm:$0xff]  ;;  %v3380_v15 = vld [vmem:[%s5798_s3 + $0x1f0] sm:$0xff] }
  0x45   : > { %v3407_v16 = vld [vmem:[%s5798_s3 + $0x2a8] sm:$0xff]  ;;  %v3406_v17 = vld [vmem:[%s5798_s3 + $0x2a0] sm:$0xff]  ;;  %v3343_v18 = vld [vmem:[%s5798_s3 + $0x98] sm:$0xff] }
  0x46   : > { %780 = vperm.xlu1 %3762, %v735_v46   ;;  %v3342_v19 = vld [vmem:[%s5798_s3 + $0x90] sm:$0xff]  ;;  %v3369_v20 = vld [vmem:[%s5798_s3 + $0x148] sm:$0xff]  ;;  %v3368_v21 = vld [vmem:[%s5798_s3 + $0x140] sm:$0xff] }
  0x47   : > { %775 = vperm.xlu0 %3761, %v734_v47   ;;  %v3395_v22 = vld [vmem:[%s5798_s3 + $0x258] sm:$0xff]  ;;  %v3394_v23 = vld [vmem:[%s5798_s3 + $0x250] sm:$0xff]  ;;  %v3421_v24 = vld [vmem:[%s5798_s3 + $0x308] sm:$0xff] }
  0x48   : > { %v3420_v25 = vld [vmem:[%s5798_s3 + $0x300] sm:$0xff]  ;;  %v3357_v26 = vld [vmem:[%s5798_s3 + $0xf8] sm:$0xff]  ;;  %v3356_v27 = vld [vmem:[%s5798_s3 + $0xf0] sm:$0xff] }
  0x49   : > { %3609 = vmatmul.mubr.msk.bf16.gmra.mrb[4].mxu0 %vm523_vm0, %v3766_v51  ;;  %v3383_v28 = vld [vmem:[%s5798_s3 + $0x208] sm:$0xff]  ;;  %v3382_v30 = vld [vmem:[%s5798_s3 + $0x200] sm:$0xff]  ;;  %v3409_v31 = vld [vmem:[%s5798_s3 + $0x2b8] sm:$0xff] }
  0x4a   : > { %1052 = vperm.xlu1 %3762, %v3351_v49   ;;  %3612 = vmatprep.mubr.msk.bf16.mxu0 %vm523_vm0, %v3767_v54  ;;  %v3408_v32 = vld [vmem:[%s5798_s3 + $0x2b0] sm:$0xff]  ;;  %v3371_v33 = vld [vmem:[%s5798_s3 + $0x158] sm:$0xff]  ;;  %v3397_v36 = vld [vmem:[%s5798_s3 + $0x268] sm:$0xff] }
  0x4b   : > { %1047 = vperm.xlu0 %3761, %v3350_v50   ;;  %v3370_v35 = vld [vmem:[%s5798_s3 + $0x150] sm:$0xff]  ;;  %v3396_v37 = vld [vmem:[%s5798_s3 + $0x260] sm:$0xff]  ;;  %v3423_v38 = vld [vmem:[%s5798_s3 + $0x318] sm:$0xff] }
  0x4c   : > { %v3422_v39 = vld [vmem:[%s5798_s3 + $0x310] sm:$0xff]  ;;  %v3385_v40 = vld [vmem:[%s5798_s3 + $0x218] sm:$0xff]  ;;  %v3411_v42 = vld [vmem:[%s5798_s3 + $0x2c8] sm:$0xff] }
  0x4d   : > { %v3384_v41 = vld [vmem:[%s5798_s3 + $0x210] sm:$0xff]  ;;  %v3410_v43 = vld [vmem:[%s5798_s3 + $0x2c0] sm:$0xff]  ;;  %v3399_v44 = vld [vmem:[%s5798_s3 + $0x278] sm:$0xff] }
  0x4e   : > { %921 = vperm.xlu1 %3762, %v3339_v52   ;;  %v3398_v45 = vld [vmem:[%s5798_s3 + $0x270] sm:$0xff]  ;;  %v3425_v47 = vld [vmem:[%s5798_s3 + $0x328] sm:$0xff]  ;;  %v3424_v48 = vld [vmem:[%s5798_s3 + $0x320] sm:$0xff] }
  0x4f   : > { %916 = vperm.xlu0 %3761, %v3338_v53   ;;  %v3332_v50 = vld [vmem:[%s5798_s3 + $0x1c8] sm:$0xff]  ;;  %v3331_v51 = vld [vmem:[%s5798_s3 + $0x1c0] sm:$0xff] }
  0x50   : > { %v741_v54 = vld [vmem:[%s5798_s3 + $0x48] sm:$0xff] }
  0x51   : > { %3613 = vmatmul.mubr.msk.bf16.gmra.mrb[8].mxu0 %vm523_vm0, %v3768_v59 }
  0x52   : > { %1193 = vperm.xlu1 %3762, %v3365_v55   ;;  %v740_v55 = vld [vmem:[%s5798_s3 + $0x40] sm:$0xff] }
  0x53   : > { %1188 = vperm.xlu0 %3761, %v3364_v56  }
  0x56   : > { %663 = vperm.xlu1 %3762, %v3328_v57  }
  0x57   : > { %658 = vperm.xlu0 %3761, %v3327_v58  }
  0x5a   : > { %790 = vperm.xlu1 %3762, %v737_v60  }
  0x5b   : > { %785 = vperm.xlu0 %3761, %v736_v61  }
  0x5e   : > { %1062 = vperm.xlu1 %3762, %v3353_v62  }
  0x5f   : > { %1057 = vperm.xlu0 %3761, %v3352_v63  }
  0x62   : > { %1334 = vperm.xlu1 %3762, %v3379_v0  }
  0x63   : > { %1329 = vperm.xlu0 %3761, %v3378_v1  }
  0x66   : > { %931 = vperm.xlu1 %3762, %v3341_v2  }
  0x67   : > { %926 = vperm.xlu0 %3761, %v3340_v3  }
  0x6a   : > { %1203 = vperm.xlu1 %3762, %v3367_v4  }
  0x6b   : > { %1198 = vperm.xlu0 %3761, %v3366_v5  }
  0x6e   : > { %1475 = vperm.xlu1 %3762, %v3393_v6  }
  0x6f   : > { %1470 = vperm.xlu0 %3761, %v3392_v7  }
  0x72   : > { %673 = vperm.xlu1 %3762, %v3330_v8  }
  0x73   : > { %668 = vperm.xlu0 %3761, %v3329_v9  }
  0x76   : > { %800 = vperm.xlu1 %3762, %v739_v10  }
  0x77   : > { %795 = vperm.xlu0 %3761, %v738_v11  }
  0x7a   : > { %1072 = vperm.xlu1 %3762, %v3355_v12  }
  0x7b   : > { %1067 = vperm.xlu0 %3761, %v3354_v13  }
  0x7e   : > { %1344 = vperm.xlu1 %3762, %v3381_v14  }
  0x7f   : > { %1339 = vperm.xlu0 %3761, %v3380_v15  }
  0x82   : > { %1616 = vperm.xlu1 %3762, %v3407_v16  }
  0x83   : > { %1611 = vperm.xlu0 %3761, %v3406_v17  }
  0x86   : > { %941 = vperm.xlu1 %3762, %v3343_v18  }
  0x87   : > { %936 = vperm.xlu0 %3761, %v3342_v19  }
  0x8a   : > { %1213 = vperm.xlu1 %3762, %v3369_v20  }
  0x8b   : > { %1208 = vperm.xlu0 %3761, %v3368_v21  }
  0x8e   : > { %1485 = vperm.xlu1 %3762, %v3395_v22  }
  0x8f   : > { %1480 = vperm.xlu0 %3761, %v3394_v23  }
  0x92   : > { %1757 = vperm.xlu1 %3762, %v3421_v24  }
  0x93   : > { %1752 = vperm.xlu0 %3761, %v3420_v25  }
  0x96   : > { %1082 = vperm.xlu1 %3762, %v3357_v26  }
  0x97   : > { %1077 = vperm.xlu0 %3761, %v3356_v27  }
  0x9a   : > { %1354 = vperm.xlu1 %3762, %v3383_v28  }
  0x9b   : > { %1349 = vperm.xlu0 %3761, %v3382_v30  }
  0x9e   : > { %1626 = vperm.xlu1 %3762, %v3409_v31  }
  0x9f   : > { %1621 = vperm.xlu0 %3761, %v3408_v32  }
  0xa2   : > { %1223 = vperm.xlu1 %3762, %v3371_v33  }
  0xa3   : > { %1218 = vperm.xlu0 %3761, %v3370_v35  }
  0xa6   : > { %1495 = vperm.xlu1 %3762, %v3397_v36  }
  0xa7   : > { %1490 = vperm.xlu0 %3761, %v3396_v37  }
  0xaa   : > { %1767 = vperm.xlu1 %3762, %v3423_v38  }
  0xab   : > { %1762 = vperm.xlu0 %3761, %v3422_v39  }
  0xae   : > { %1364 = vperm.xlu1 %3762, %v3385_v40  }
  0xaf   : > { %1359 = vperm.xlu0 %3761, %v3384_v41  }
  0xb2   : > { %1636 = vperm.xlu1 %3762, %v3411_v42  }
  0xb3   : > { %1631 = vperm.xlu0 %3761, %v3410_v43  }
  0xb5   : > { %v4244_v49 = vpop.permute.xlu1 %765 }
  0xb6   : > { %1505 = vperm.xlu1 %3762, %v3399_v44   ;;  %v4236_v46 = vpop.permute.xlu0 %638 }
  0xb7   : > { %1500 = vperm.xlu0 %3761, %v3398_v45  }
  0xb9   : > { %v4254_v53 = vpop.permute.xlu1 %770 }
  0xba   : > { %1777 = vperm.xlu1 %3762, %v3425_v47   ;;  %v4252_v52 = vpop.permute.xlu0 %643 }
  0xbb   : > { %1772 = vperm.xlu0 %3761, %v3424_v48  }
  0xbd   : > { %v4264_v57 = vpop.permute.xlu1 %911 }
  0xbe   : > { %683 = vperm.xlu1 %3762, %v3332_v50   ;;  %v4262_v56 = vpop.permute.xlu0 %906 }
  0xbf   : > { %678 = vperm.xlu0 %3761, %v3331_v51  }
  0xc1   : > { %v4268_v59 = vpop.permute.xlu1 %653 }
  0xc2   : > { %810 = vperm.xlu1 %3762, %v741_v54   ;;  %v4266_v58 = vpop.permute.xlu0 %648 }
  0xc3   : > { %805 = vperm.xlu0 %3761, %v740_v55  }
  0xc5   : > { %v4272_v61 = vpop.permute.xlu1 %780 }
  0xc6   : > { %v4270_v60 = vpop.permute.xlu0 %775 }
  0xc9   : > { %v4276_v63 = vpop.permute.xlu1 %1052 }
  0xca   : > { %v4274_v62 = vpop.permute.xlu0 %1047 }
  0xcd   : > { %v4280_v1 = vpop.permute.xlu1 %921 }
  0xce   : > { %v4278_v0 = vpop.permute.xlu0 %916 }
  0xd1   : > { %v4284_v3 = vpop.permute.xlu1 %1193 }
  0xd2   : > { %v4282_v2 = vpop.permute.xlu0 %1188 }
  0xd5   : > { %v4288_v5 = vpop.permute.xlu1 %663 }
  0xd6   : > { %v4286_v4 = vpop.permute.xlu0 %658  ;;  %5801 = vst [vmem:[#allocation17_spill] sm:$0xff] %v4288_v5 }
  0xd7   : > { %5800 = vst [vmem:[#allocation16_spill] sm:$0xff] %v4286_v4 }
  0xd9   : > { %v4292_v7 = vpop.permute.xlu1 %790 }
  0xda   : > { %v4290_v6 = vpop.permute.xlu0 %785  ;;  %5803 = vst [vmem:[#allocation19_spill] sm:$0xff] %v4292_v7 }
  0xdb   : > { %5802 = vst [vmem:[#allocation18_spill] sm:$0xff] %v4290_v6 }
  0xdd   : > { %v4296_v9 = vpop.permute.xlu1 %1062 }
  0xde   : > { %v4294_v8 = vpop.permute.xlu0 %1057  ;;  %5804 = vst [vmem:[#allocation20_spill] sm:$0xff] %v4296_v9 }
  0xe1   : > { %v4300_v11 = vpop.permute.xlu1 %1334 }
  0xe2   : > { %v4298_v10 = vpop.permute.xlu0 %1329 }
  0xe5   : > { %v4304_v13 = vpop.permute.xlu1 %931 }
  0xe6   : > { %v4302_v12 = vpop.permute.xlu0 %926  ;;  %5806 = vst [vmem:[#allocation22_spill] sm:$0xff] %v4304_v13  ;;  %v742_v13 = vld [vmem:[%s5798_s3 + $0x50] sm:$0xff] }
  0xe7   : > { %5805 = vst [vmem:[#allocation21_spill] sm:$0xff] %v4302_v12 }
  0xe9   : > { %v4308_v15 = vpop.permute.xlu1 %1203 }
  0xea   : > { %v4306_v14 = vpop.permute.xlu0 %1198  ;;  %5808 = vst [vmem:[#allocation24_spill] sm:$0xff] %v4308_v15 }
  0xeb   : > { %5807 = vst [vmem:[#allocation23_spill] sm:$0xff] %v4306_v14 }
  0xed   : > { %v4312_v17 = vpop.permute.xlu1 %1475 }
  0xee   : > { %v4310_v16 = vpop.permute.xlu0 %1470 }
  0xf1   : > { %v4316_v19 = vpop.permute.xlu1 %673 }
  0xf2   : > { %v4314_v18 = vpop.permute.xlu0 %668  ;;  %5810 = vst [vmem:[#allocation26_spill] sm:$0xff] %v4316_v19 }
  0xf3   : > { %5809 = vst [vmem:[#allocation25_spill] sm:$0xff] %v4314_v18 }
  0xf5   : > { %v4320_v21 = vpop.permute.xlu1 %800 }
  0xf6   : > { %v4318_v20 = vpop.permute.xlu0 %795  ;;  %5812 = vst [vmem:[#allocation28_spill] sm:$0xff] %v4320_v21 }
  0xf7   : > { %5811 = vst [vmem:[#allocation27_spill] sm:$0xff] %v4318_v20 }
  0xf9   : > { %v4336_v27 = vpop.permute.xlu1 %1072 }
  0xfa   : > { %v4330_v25 = vpop.permute.xlu0 %1067  ;;  %5814 = vst [vmem:[#allocation30_spill] sm:$0xff] %v4336_v27  ;;  %v3334_v27 = vld [vmem:[%s5798_s3 + $0x1d8] sm:$0xff] }
  0xfb   : > { %5813 = vst [vmem:[#allocation29_spill] sm:$0xff] %v4330_v25 }
  0xfd   : > { %v4352_v33 = vpop.permute.xlu1 %1344 }
  0xfe   : > { %v4344_v30 = vpop.permute.xlu0 %1339  ;;  %5817 = vst [vmem:[#allocation33_spill] sm:$0xff] %v4352_v33 }
  0xff   : > { %5815 = vst [vmem:[#allocation31_spill] sm:$0xff] %v4344_v30 }
 0x101   : > { %v4366_v38 = vpop.permute.xlu1 %1616 }
 0x102   : > { %v4360_v36 = vpop.permute.xlu0 %1611 }
 0x105   : > { %v4382_v43 = vpop.permute.xlu1 %941 }
 0x106   : > { %v4378_v42 = vpop.permute.xlu0 %936  ;;  %5820 = vst [vmem:[#allocation36_spill] sm:$0xff] %v4382_v43 }
 0x107   : > { %5819 = vst [vmem:[#allocation35_spill] sm:$0xff] %v4378_v42 }
 0x109   : > { %v4392_v45 = vpop.permute.xlu1 %1213 }
 0x10a   : > { %v4388_v44 = vpop.permute.xlu0 %1208  ;;  %5822 = vst [vmem:[#allocation38_spill] sm:$0xff] %v4392_v45 }
 0x10b   : > { %5821 = vst [vmem:[#allocation37_spill] sm:$0xff] %v4388_v44 }
 0x10d   : > { %v4402_v48 = vpop.permute.xlu1 %1485 }
 0x10e   : > { %v4398_v47 = vpop.permute.xlu0 %1480  ;;  %5824 = vst [vmem:[#allocation40_spill] sm:$0xff] %v4402_v48 }
 0x10f   : > { %5823 = vst [vmem:[#allocation39_spill] sm:$0xff] %v4398_v47  ;;  %v3373_v47 = vld [vmem:[%s5798_s3 + $0x168] sm:$0xff] }
 0x111   : > { %v4412_v51 = vpop.permute.xlu1 %1757 }
 0x112   : > { %v4408_v50 = vpop.permute.xlu0 %1752 }
 0x114   : > { %v4322_v22 = vpop.f32.mrb[0].mxu0 }
 0x115   : > { %712 = vrot.lane.b32.xlu0 %v4322_v22, %s5765_s23  ;;  %v4326_v23 = vpop.f32.mrb[1].mxu0  ;;  %v4422_v55 = vpop.permute.xlu1 %1082 }
 0x116   : > { %v4328_v24 = vpop.f32.mrb[2].mxu0  ;;  %v4418_v54 = vpop.permute.xlu0 %1077  ;;  %5826 = vst [vmem:[#allocation42_spill] sm:$0xff] %v4422_v55 }
 0x117   : > { %714 = vrot.lane.b32.xlu1 %v4328_v24, %s5765_s23  ;;  %v4334_v26 = vpop.f32.mrb[3].mxu0  ;;  %5825 = vst [vmem:[#allocation41_spill] sm:$0xff] %v4418_v54 }
 0x119   : > { %851 = vrot.lane.b32.xlu0 %v4322_v22, %s5763_s24  ;;  %v4432_v29 = vpop.permute.xlu1 %1354 }
 0x11a   : > { %v4428_v34 = vpop.permute.xlu0 %1349  ;;  %5828 = vst [vmem:[#allocation44_spill] sm:$0xff] %v4432_v29 }
 0x11b   : > { %853 = vrot.lane.b32.xlu1 %v4328_v24, %s5763_s24  ;;  %5827 = vst [vmem:[#allocation43_spill] sm:$0xff] %v4428_v34  ;;  %v3345_v34 = vld [vmem:[%s5798_s3 + $0xa8] sm:$0xff] }
 0x11c   : > { %v4342_v28 = vpop.f32.mrb[4].mxu0 }
 0x11d   : > { %992 = vrot.lane.b32.xlu0 %v4322_v22, %s5761_s26  ;;  %v4348_v31 = vpop.f32.mrb[5].mxu0  ;;  %v4442_v54 = vpop.permute.xlu1 %1626 }
 0x11e   : > { %5816 = vst [vmem:[#allocation32_spill] sm:$0xff] %v4348_v31  ;;  %v4350_v32 = vpop.f32.mrb[6].mxu0  ;;  %v4438_v55 = vpop.permute.xlu0 %1621  ;;  %5830 = vst [vmem:[#allocation46_spill] sm:$0xff] %v4442_v54 }
 0x11f   : > { %994 = vrot.lane.b32.xlu1 %v4328_v24, %s5761_s26  ;;  %v4356_v35 = vpop.f32.mrb[7].mxu0  ;;  %5829 = vst [vmem:[#allocation45_spill] sm:$0xff] %v4438_v55  ;;  %v3372_v55 = vld [vmem:[%s5798_s3 + $0x160] sm:$0xff] }
 0x120   : > { %5818 = vst [vmem:[#allocation34_spill] sm:$0xff] %v4356_v35 }
 0x121   : > { %1133 = vrot.lane.b32.xlu0 %v4322_v22, %s5759_s13  ;;  %v4452_v19 = vpop.permute.xlu1 %1223 }
 0x122   : > { %v4448_v43 = vpop.permute.xlu0 %1218  ;;  %5832 = vst [vmem:[#allocation48_spill] sm:$0xff] %v4452_v19 }
 0x123   : > { %1135 = vrot.lane.b32.xlu1 %v4328_v24, %s5759_s13  ;;  %5831 = vst [vmem:[#allocation47_spill] sm:$0xff] %v4448_v43 }
 0x124   : > { %v4364_v37 = vpop.f32.mrb[8].mxu0 }
 0x125   : > { %1274 = vrot.lane.b32.xlu0 %v4322_v22, %s5770_s12  ;;  %v4370_v39 = vpop.f32.mrb[9].mxu0  ;;  %v4462_v18 = vpop.permute.xlu1 %1495 }
 0x126   : > { %v4372_v40 = vpop.f32.mrb[10].mxu0  ;;  %v4458_v42 = vpop.permute.xlu0 %1490  ;;  %5834 = vst [vmem:[#allocation50_spill] sm:$0xff] %v4462_v18 }
 0x127   : > { %1276 = vrot.lane.b32.xlu1 %v4328_v24, %s5770_s12  ;;  %v4376_v41 = vpop.f32.mrb[11].mxu0  ;;  %5833 = vst [vmem:[#allocation49_spill] sm:$0xff] %v4458_v42 }
 0x129   : > { %1415 = vrot.lane.b32.xlu0 %v4322_v22, %s5767_s14  ;;  %v4472_v43 = vpop.permute.xlu1 %1767 }
 0x12a   : > { %v4468_v19 = vpop.permute.xlu0 %1762  ;;  %5836 = vst [vmem:[#allocation52_spill] sm:$0xff] %v4472_v43 }
 0x12b   : > { %1417 = vrot.lane.b32.xlu1 %v4328_v24, %s5767_s14  ;;  %5835 = vst [vmem:[#allocation51_spill] sm:$0xff] %v4468_v19 }
 0x12d   : > { %1556 = vrot.lane.b32.xlu0 %v4322_v22, %s5775_s0  ;;  %v4482_v20 = vpop.permute.xlu1 %1364 }
 0x12e   : > { %v4478_v21 = vpop.permute.xlu0 %1359  ;;  %5838 = vst [vmem:[#allocation54_spill] sm:$0xff] %v4482_v20 }
 0x12f   : > { %1558 = vrot.lane.b32.xlu1 %v4328_v24, %s5775_s0  ;;  %5837 = vst [vmem:[#allocation53_spill] sm:$0xff] %v4478_v21 }
 0x131   : > { %708 = vrot.lane.b32.xlu0 %v4326_v23, %s5765_s23  ;;  %v4492_v42 = vpop.permute.xlu1 %1636 }
 0x132   : > { %v4488_v18 = vpop.permute.xlu0 %1631  ;;  %5840 = vst [vmem:[#allocation56_spill] sm:$0xff] %v4492_v42 }
 0x133   : > { %710 = vrot.lane.b32.xlu1 %v4334_v26, %s5765_s23  ;;  %5839 = vst [vmem:[#allocation55_spill] sm:$0xff] %v4488_v18 }
 0x135   : > { %847 = vrot.lane.b32.xlu0 %v4326_v23, %s5763_s24  ;;  %v4502_v21 = vpop.permute.xlu1 %1505 }
 0x136   : > { %v4498_v20 = vpop.permute.xlu0 %1500  ;;  %5842 = vst [vmem:[#allocation58_spill] sm:$0xff] %v4502_v21  ;;  %v3412_v21 = vld [vmem:[%s5798_s3 + $0x2d0] sm:$0xff] }
 0x137   : > { %849 = vrot.lane.b32.xlu1 %v4334_v26, %s5763_s24  ;;  %5841 = vst [vmem:[#allocation57_spill] sm:$0xff] %v4498_v20  ;;  %v3413_v20 = vld [vmem:[%s5798_s3 + $0x2d8] sm:$0xff] }
 0x139   : > { %988 = vrot.lane.b32.xlu0 %v4326_v23, %s5761_s26  ;;  %v4512_v18 = vpop.permute.xlu1 %1777 }
 0x13a   : > { %v4508_v42 = vpop.permute.xlu0 %1772  ;;  %5844 = vst [vmem:[#allocation60_spill] sm:$0xff] %v4512_v18  ;;  %v3344_v18 = vld [vmem:[%s5798_s3 + $0xa0] sm:$0xff] }
 0x13b   : > { %990 = vrot.lane.b32.xlu1 %v4334_v26, %s5761_s26  ;;  %5843 = vst [vmem:[#allocation59_spill] sm:$0xff] %v4508_v42 }
 0x13d   : > { %1129 = vrot.lane.b32.xlu0 %v4326_v23, %s5759_s13  ;;  %v4529_v29 = vpop.permute.xlu1 %683 }
 0x13e   : > { %v4524_v42 = vpop.permute.xlu0 %678  ;;  %5846 = vst [vmem:[#allocation62_spill] sm:$0xff] %v4529_v29 }
 0x13f   : > { %1131 = vrot.lane.b32.xlu1 %v4334_v26, %s5759_s13  ;;  %5845 = vst [vmem:[#allocation61_spill] sm:$0xff] %v4524_v42 }
 0x141   : > { %1270 = vrot.lane.b32.xlu0 %v4326_v23, %s5770_s12  ;;  %v4536_v44 = vpop.permute.xlu1 %810 }
 0x142   : > { %v4534_v45 = vpop.permute.xlu0 %805  ;;  %5848 = vst [vmem:[#allocation64_spill] sm:$0xff] %v4536_v44  ;;  %v3333_v44 = vld [vmem:[%s5798_s3 + $0x1d0] sm:$0xff] }
 0x143   : > { %1272 = vrot.lane.b32.xlu1 %v4334_v26, %s5770_s12  ;;  %5847 = vst [vmem:[#allocation63_spill] sm:$0xff] %v4534_v45 }
 0x145   : > { %1411 = vrot.lane.b32.xlu0 %v4326_v23, %s5767_s14 }
 0x147   : > { %1413 = vrot.lane.b32.xlu1 %v4334_v26, %s5767_s14 }
 0x149   : > { %1552 = vrot.lane.b32.xlu0 %v4326_v23, %s5775_s0 }
 0x14b   : > { %1554 = vrot.lane.b32.xlu1 %v4334_v26, %s5775_s0 }
 0x14d   : > { %1693 = vrot.lane.b32.xlu0 %v4326_v23, %s5773_s25 }
 0x14f   : > { %1695 = vrot.lane.b32.xlu1 %v4334_v26, %s5773_s25 }
 0x151   : > { %720 = vrot.lane.b32.xlu0 %v4342_v28, %s5765_s23 }
 0x153   : > { %722 = vrot.lane.b32.xlu1 %v4350_v32, %s5765_s23 }
 0x155   : > { %859 = vrot.lane.b32.xlu0 %v4342_v28, %s5763_s24 }
 0x157   : > { %861 = vrot.lane.b32.xlu1 %v4350_v32, %s5763_s24 }
 0x159   : > { %1000 = vrot.lane.b32.xlu0 %v4342_v28, %s5761_s26 }
 0x15b   : > { %1002 = vrot.lane.b32.xlu1 %v4350_v32, %s5761_s26 }
 0x15d   : > { %1141 = vrot.lane.b32.xlu0 %v4342_v28, %s5759_s13 }
 0x15f   : > { %1143 = vrot.lane.b32.xlu1 %v4350_v32, %s5759_s13 }
 0x161   : > { %716 = vrot.lane.b32.xlu0 %v4348_v31, %s5765_s23 }
 0x163   : > { %718 = vrot.lane.b32.xlu1 %v4356_v35, %s5765_s23  ;;  %s5858_s23 = smov 8  }
 0x165   : > { %855 = vrot.lane.b32.xlu0 %v4348_v31, %s5763_s24 }
 0x167   : > { %857 = vrot.lane.b32.xlu1 %v4356_v35, %s5763_s24  ;;  %s3216_s24 = sshll.u32 %s3999_s28, 4  ;;  %s5688_s24 = int_to_ptr.vmem [resolvable:$true] %s3216_s24 }
 0x168   : > { %s3779_s19 = scalar_lea.vmem %s5688_s24, 512 }
 0x169   : > { %996 = vrot.lane.b32.xlu0 %v4348_v31, %s5761_s26  ;;  %p3780_p13 = scmp.ne.s32.totalorder %s5688_s24, %s3779_s19 }
 0x16b   : > { %998 = vrot.lane.b32.xlu1 %v4356_v35, %s5761_s26  ;;  %s5852_s26 = smov 121   ;;  %p3781_p0 = pnand %p3780_p13, %p3974_p4 }
 0x16d   : > { %1137 = vrot.lane.b32.xlu0 %v4348_v31, %s5759_s13  ;;  %p3782_p1 = pneg %p3781_p0 }
 0x16f   : > { %1139 = vrot.lane.b32.xlu1 %v4356_v35, %s5759_s13  ;;  %s5855_s13 = smov 9  }
 0x171   : > { %1278 = vrot.lane.b32.xlu0 %v4348_v31, %s5770_s12 }
 0x173   : > { %1280 = vrot.lane.b32.xlu1 %v4356_v35, %s5770_s12 }
 0x175   : > { %1419 = vrot.lane.b32.xlu0 %v4348_v31, %s5767_s14 }
 0x177   : > { %1421 = vrot.lane.b32.xlu1 %v4356_v35, %s5767_s14 }
 0x179   : > { %1697 = vrot.lane.b32.xlu0 %v4322_v22, %s5773_s25 }
 0x17b   : > { %1699 = vrot.lane.b32.xlu1 %v4328_v24, %s5773_s25 }
 0x17d   : > { %1641 = vperm.xlu0 %3761, %v3412_v21  }
 0x17f   : > { %1646 = vperm.xlu1 %3762, %v3413_v20   ;;  %v3427_v20 = vld [vmem:[%s5798_s3 + $0x338] sm:$0xff] }
 0x181   : > { %946 = vperm.xlu0 %3761, %v3344_v18   ;;  %v3426_v18 = vld [vmem:[%s5798_s3 + $0x330] sm:$0xff] }
 0x183   : > { %951 = vperm.xlu1 %3762, %v3345_v34  }
 0x185   : > { %1282 = vrot.lane.b32.xlu0 %v4342_v28, %s5770_s12 }
 0x187   : > { %v4540_v21 = vpop.permute.xlu0 %712  ;;  %1284 = vrot.lane.b32.xlu1 %v4350_v32, %s5770_s12  ;;  %s5873_s12 = smov 127  }
 0x189   : > { %v4544_v42 = vpop.permute.xlu1 %714  ;;  %1560 = vrot.lane.b32.xlu0 %v4348_v31, %s5775_s0 }
 0x18b   : > { %v4551_v34 = vpop.permute.xlu0 %851  ;;  %1562 = vrot.lane.b32.xlu1 %v4356_v35, %s5775_s0 }
 0x18d   : > { %v4558_v29 = vpop.permute.xlu1 %853  ;;  %1782 = vperm.xlu0 %3761, %v3426_v18   ;;  %v743_v18 = vld [vmem:[%s5798_s3 + $0x58] sm:$0xff] }
 0x18f   : > { %v4563_v45 = vpop.permute.xlu0 %992  ;;  %1787 = vperm.xlu1 %3762, %v3427_v20   ;;  %v3358_v20 = vld [vmem:[%s5798_s3 + $0x100] sm:$0xff] }
 0x191   : > { %v4568_v25 = vpop.permute.xlu1 %994  ;;  %688 = vperm.xlu0 %3761, %v3333_v44   ;;  %v3359_v44 = vld [vmem:[%s5798_s3 + $0x108] sm:$0xff] }
 0x193   : > { %v4573_v5 = vpop.permute.xlu0 %1133  ;;  %693 = vperm.xlu1 %3762, %v3334_v27  }
 0x195   : > { %v4578_v12 = vpop.permute.xlu1 %1135  ;;  %815 = vperm.xlu0 %3761, %v742_v13  }
 0x197   : > { %v4583_v4 = vpop.permute.xlu0 %1274  ;;  %820 = vperm.xlu1 %3762, %v743_v18  }
 0x199   : > { %v4588_v7 = vpop.permute.xlu1 %1276  ;;  %1087 = vperm.xlu0 %3761, %v3358_v20  }
 0x19a   : > { %5849 = vst [vmem:[#allocation65_spill] sm:$0xff] %v4588_v7  ;;  %v4667_v7 = vld [vmem:[%s5750_s9 + $0x5] ss:$0 sm:$0xff] }
 0x19b   : > { %v4590_v27 = vpop.permute.xlu0 %1415  ;;  %1092 = vperm.xlu1 %3762, %v3359_v44   ;;  %v3346_v44 = vld [vmem:[%s5798_s3 + $0xb0] sm:$0xff] }
 0x19c   : > { %5850 = vst [vmem:[#allocation66_spill] sm:$0xff] %v4590_v27 }
 0x19d   : > { %v4592_v6 = vpop.permute.xlu1 %1417  ;;  %1423 = vrot.lane.b32.xlu0 %v4342_v28, %s5852_s26 }
 0x19e   : > { %5851 = vst [vmem:[#allocation67_spill] sm:$0xff] %v4592_v6 }
 0x19f   : > { %v4596_v13 = vpop.permute.xlu0 %1556  ;;  %1425 = vrot.lane.b32.xlu1 %v4350_v32, %s5852_s26 }
 0x1a0   : > { %5853 = vst [vmem:[#allocation68_spill] sm:$0xff] %v4596_v13 }
 0x1a1   : > { %v4600_v18 = vpop.permute.xlu1 %1558  ;;  %1701 = vrot.lane.b32.xlu0 %v4348_v31, %s5773_s25  ;;  %v3347_v31 = vld [vmem:[%s5798_s3 + $0xb8] sm:$0xff] }
 0x1a2   : > { %5854 = vst [vmem:[#allocation69_spill] sm:$0xff] %v4600_v18 }
 0x1a3   : > { %v709_v43 = vpop.permute.xlu0 %708  ;;  %1703 = vrot.lane.b32.xlu1 %v4356_v35, %s5773_s25  ;;  %v3769_v35 = vld [vmem:[%s5856_s2] sm:$0xff]   ;;  %s5857_s25 = smov 120  }
 0x1a4   : > { %3620 = vmatprep.mubr.msk.bf16.mxu1 %vm523_vm0, %v3769_v35 }
 0x1a5   : > { %v711_v20 = vpop.permute.xlu1 %710  ;;  %724 = vrot.lane.b32.xlu0 %v4370_v39, %s5855_s13 }
 0x1a7   : > { %v848_v19 = vpop.permute.xlu0 %847  ;;  %726 = vrot.lane.b32.xlu1 %v4376_v41, %s5855_s13 }
 0x1a9   : > { %v850_v54 = vpop.permute.xlu1 %849  ;;  %956 = vperm.xlu0 %3761, %v3346_v44   ;;  %v4629_v44 = vld [vmem:[%s5750_s9] ss:$0 sm:$0xff] }
 0x1aa   : > { %v751_v13 = vmul.f32 %v4629_v44, %v709_v43  ;;  %v752_v35 = vmul.f32 %v4629_v44, %v711_v20 }
 0x1ab   : > { %v989_v48 = vpop.permute.xlu0 %988  ;;  %961 = vperm.xlu1 %3762, %v3347_v31   ;;  %v4635_v31 = vld [vmem:[%s5750_s9 + $0x1] ss:$0 sm:$0xff] }
 0x1ac   : > { %v892_v30 = vmul.f32 %v4635_v31, %v848_v19  ;;  %v893_v43 = vmul.f32 %v4635_v31, %v850_v54  ;;  %v4654_v19 = vld [vmem:[%s5750_s9 + $0x3] ss:$0 sm:$0xff]  ;;  %v824_v20 = vmul.f32 %v4254_v53, %v752_v35  ;;  %v696_v54 = vmul.f32 %v4236_v46, %v4326_v23 }
 0x1ad   : > { %v991_v18 = vpop.permute.xlu1 %990  ;;  %1228 = vperm.xlu0 %3761, %v3372_v55   ;;  %v4644_v55 = vld [vmem:[%s5750_s9 + $0x2] ss:$0 sm:$0xff]  ;;  %v697_v53 = vmul.f32 %v4252_v52, %v4334_v26  ;;  %v4688_v26 = vld [vmem:[%s5750_s9 + $0x6] ss:$0 sm:$0xff] }
 0x1ae   : > { %v1033_v27 = vmul.f32 %v4644_v55, %v989_v48  ;;  %v1034_v14 = vmul.f32 %v4644_v55, %v991_v18  ;;  %v965_v18 = vmul.f32 %v4264_v57, %v893_v43 }
 0x1af   : > { %v1130_v33 = vpop.permute.xlu0 %1129  ;;  %1233 = vperm.xlu1 %3762, %v3373_v47   ;;  %v823_v47 = vmul.f32 %v4244_v49, %v751_v13  ;;  %v964_v49 = vmul.f32 %v4262_v56, %v892_v30  ;;  %v3360_v56 = vld [vmem:[%s5798_s3 + $0x110] sm:$0xff]  ;;  %v836_v9 = vadd.f32 %v824_v20, %v697_v53  ;;  %v3386_v20 = vld [vmem:[%s5798_s3 + $0x220] sm:$0xff]  ;;  %v3387_v53 = vld [vmem:[%s5798_s3 + $0x228] sm:$0xff] }
 0x1b0   : > { %v1174_v48 = vmul.f32 %v4654_v19, %v1130_v33  ;;  %v1105_v30 = vmul.f32 %v4274_v62, %v1033_v27  ;;  %v1106_v52 = vmul.f32 %v4276_v63, %v1034_v14 }
 0x1b1   : > { %v1132_v6 = vpop.permute.xlu1 %1131  ;;  %1564 = vrot.lane.b32.xlu0 %v4342_v28, %s5857_s25  ;;  %v835_v23 = vadd.f32 %v823_v47, %v696_v54  ;;  %v977_v43 = vadd.f32 %v965_v18, %v836_v9  ;;  %v4700_v54 = vld [vmem:[%s5750_s9 + $0x7] ss:$0 sm:$0xff] }
 0x1b2   : > { %v1175_v46 = vmul.f32 %v4654_v19, %v1132_v6  ;;  %v3361_v6 = vld [vmem:[%s5798_s3 + $0x118] sm:$0xff] }
 0x1b3   : > { %v1271_v15 = vpop.permute.xlu0 %1270  ;;  %1566 = vrot.lane.b32.xlu1 %v4350_v32, %s5857_s25  ;;  %v976_v62 = vadd.f32 %v964_v49, %v835_v23  ;;  %v1118_v9 = vadd.f32 %v1106_v52, %v977_v43 }
 0x1b4   : > { %v1315_v33 = vmul.f32 %v4667_v7, %v1271_v15  ;;  %v1246_v15 = vmul.f32 %v4282_v2, %v1174_v48  ;;  %v1247_v47 = vmul.f32 %v4284_v3, %v1175_v46 }
 0x1b5   : > { %v1273_v13 = vpop.permute.xlu1 %1272  ;;  %863 = vrot.lane.b32.xlu0 %v4370_v39, %s5858_s23  ;;  %v1117_v49 = vadd.f32 %v1105_v30, %v976_v62 }
 0x1b6   : > { %v1316_v57 = vmul.f32 %v4667_v7, %v1273_v13  ;;  %v1387_v2 = vmul.f32 %v4298_v10, %v1315_v33  ;;  %v1259_v10 = vadd.f32 %v1247_v47, %v1118_v9 }
 0x1b7   : > { %v1412_v35 = vpop.permute.xlu0 %1411  ;;  %865 = vrot.lane.b32.xlu1 %v4376_v41, %s5858_s23  ;;  %v1258_v18 = vadd.f32 %v1246_v15, %v1117_v49 }
 0x1b8   : > { %v1456_v63 = vmul.f32 %v4688_v26, %v1412_v35  ;;  %v1388_v3 = vmul.f32 %v4300_v11, %v1316_v57 }
 0x1b9   : > { %v1414_v27 = vpop.permute.xlu1 %1413  ;;  %1097 = vperm.xlu0 %3761, %v3360_v56   ;;  %v4711_v56 = vld [vmem:[%s5750_s9 + $0x8] ss:$0 sm:$0xff]  ;;  %v1399_v33 = vadd.f32 %v1387_v2, %v1258_v18 }
 0x1ba   : > { %v1457_v14 = vmul.f32 %v4688_v26, %v1414_v27  ;;  %5859 = vst [vmem:[#allocation70_spill] sm:$0xff] %v4711_v56  ;;  %v1528_v23 = vmul.f32 %v4310_v16, %v1456_v63  ;;  %v1400_v52 = vadd.f32 %v1388_v3, %v1259_v10  ;;  %v3375_v3 = vld [vmem:[%s5798_s3 + $0x178] sm:$0xff] }
 0x1bb   : > { %v1553_v48 = vpop.permute.xlu0 %1552  ;;  %1102 = vperm.xlu1 %3762, %v3361_v6  }
 0x1bc   : > { %v1597_v13 = vmul.f32 %v4700_v54, %v1553_v48  ;;  %v1529_v30 = vmul.f32 %v4312_v17, %v1457_v14  ;;  %v1540_v27 = vadd.f32 %v1528_v23, %v1399_v33 }
 0x1bd   : > { %v1555_v46 = vpop.permute.xlu1 %1554  ;;  %1369 = vperm.xlu0 %3761, %v3386_v20  }
 0x1be   : > { %v1598_v11 = vmul.f32 %v4700_v54, %v1555_v46  ;;  %v1669_v57 = vmul.f32 %v4360_v36, %v1597_v13  ;;  %v1541_v16 = vadd.f32 %v1529_v30, %v1400_v52  ;;  %v3401_v46 = vld [vmem:[%s5798_s3 + $0x288] sm:$0xff]  ;;  %v753_v52 = vmul.f32 %v4629_v44, %v4540_v21 }
 0x1bf   : > { %v1694_v35 = vpop.permute.xlu0 %1693  ;;  %1374 = vperm.xlu1 %3762, %v3387_v53   ;;  %v3400_v53 = vld [vmem:[%s5798_s3 + $0x280] sm:$0xff]  ;;  %v895_v21 = vmul.f32 %v4635_v31, %v4558_v29  ;;  %v3415_v29 = vld [vmem:[%s5798_s3 + $0x2e8] sm:$0xff] }
 0x1c0   : > { %v1670_v6 = vmul.f32 %v4366_v38, %v1598_v11  ;;  %v1738_v62 = vmul.f32 %v4711_v56, %v1694_v35  ;;  %v1681_v38 = vadd.f32 %v1669_v57, %v1540_v27  ;;  %v3388_v35 = vld [vmem:[%s5798_s3 + $0x230] sm:$0xff] }
 0x1c1   : > { %v1696_v15 = vpop.permute.xlu1 %1695  ;;  %1705 = vrot.lane.b32.xlu0 %v4342_v28, %s5860_s16 }
 0x1c2   : > { %v1810_v17 = vmul.f32 %v4408_v50, %v1738_v62  ;;  %v1739_v43 = vmul.f32 %v4711_v56, %v1696_v15  ;;  %v1682_v63 = vadd.f32 %v1670_v6, %v1541_v16  ;;  %v754_v6 = vmul.f32 %v4629_v44, %v4544_v42  ;;  %v3389_v62 = vld [vmem:[%s5798_s3 + $0x238] sm:$0xff]  ;;  %v3414_v16 = vld [vmem:[%s5798_s3 + $0x2e0] sm:$0xff] }
 0x1c3   : > { %v4723_v47 = vpop.permute.xlu0 %720  ;;  %1707 = vrot.lane.b32.xlu1 %v4350_v32, %s5860_s16  ;;  %v894_v15 = vmul.f32 %v4635_v31, %v4551_v34  ;;  %v1035_v42 = vmul.f32 %v4644_v55, %v4563_v45  ;;  %v1176_v45 = vmul.f32 %v4654_v19, %v4573_v5 }
 0x1c4   : > { %v1811_v36 = vmul.f32 %v4412_v51, %v1739_v43  ;;  %v1822_v20 = vadd.f32 %v1810_v17, %v1681_v38  ;;  %v3374_v51 = vld [vmem:[%s5798_s3 + $0x170] sm:$0xff]  ;;  %v825_v17 = vmul.f32 %v4270_v60, %v753_v52  ;;  %v826_v34 = vmul.f32 %v4272_v61, %v754_v6  ;;  %v5868_v6 = vld [vmem:[#allocation67_spill] sm:$0xff] }
 0x1c5   : > { %v4728_v14 = vpop.permute.xlu1 %722  ;;  %728 = vrot.lane.b32.xlu0 %v4364_v37, %s5855_s13  ;;  %v698_v38 = vmul.f32 %v4322_v22, %v4266_v58  ;;  %v966_v60 = vmul.f32 %v4278_v0, %v894_v15  ;;  %v699_v61 = vmul.f32 %v4328_v24, %v4268_v59  ;;  %v1317_v58 = vmul.f32 %v4667_v7, %v4583_v4  ;;  %v5863_v22 = vld [vmem:[#allocation20_spill] sm:$0xff] }
 0x1c6   : > { %v1823_v49 = vadd.f32 %v1811_v36, %v1682_v63  ;;  %v1036_v36 = vmul.f32 %v4644_v55, %v4568_v25  ;;  %v967_v25 = vmul.f32 %v4280_v1, %v895_v21  ;;  %v5865_v1 = vld [vmem:[#allocation23_spill] sm:$0xff] }
 0x1c7   : > { %v4732_v2 = vpop.permute.xlu0 %859  ;;  %730 = vrot.lane.b32.xlu1 %v4372_v40, %s5855_s13  ;;  %v838_v5 = vadd.f32 %v826_v34, %v699_v61  ;;  %v5869_v21 = vld [vmem:[#allocation31_spill] sm:$0xff]  ;;  %v5870_v34 = vld [vmem:[#allocation33_spill] sm:$0xff] }
 0x1c8   : > { %v1834_v50 = vpack.c.bf16 %v1823_v49, %v1822_v20  ;;  %v1177_v20 = vmul.f32 %v4654_v19, %v4578_v12  ;;  %v837_v49 = vadd.f32 %v825_v17, %v698_v38  ;;  %v5866_v12 = vld [vmem:[#allocation24_spill] sm:$0xff] }
 0x1c9   : > { %v4736_v48 = vpop.permute.xlu1 %861  ;;  %1004 = vrot.lane.b32.xlu0 %v4370_v39, %s5861_s15 }
 0x1ca   : > { %3616 = vmatprep.subr.bf16.mxu1 %v1834_v50  ;;  %v978_v24 = vadd.f32 %v966_v60, %v837_v49  ;;  %v1249_v4 = vmul.f32 %v5866_v12, %v1177_v20  ;;  %v5872_v60 = vld [vmem:[#allocation69_spill] sm:$0xff]  ;;  %v5874_v49 = vld [vmem:[#allocation39_spill] sm:$0xff] }
 0x1cb   : > { %3617 = vmatpush3.bf16.msra.mxu1 %v1834_v50  ;;  %v4743_v9 = vpop.permute.xlu0 %1000  ;;  %1006 = vrot.lane.b32.xlu1 %v4376_v41, %s5861_s15  ;;  %v1107_v50 = vmul.f32 %v4294_v8, %v1035_v42  ;;  %v979_v8 = vadd.f32 %v967_v25, %v838_v5 }
 0x1cd   : > { %v4750_v13 = vpop.permute.xlu1 %1002  ;;  %1238 = vperm.xlu0 %3761, %v3374_v51   ;;  %v1108_v51 = vmul.f32 %v5863_v22, %v1036_v36  ;;  %v1119_v15 = vadd.f32 %v1107_v50, %v978_v24  ;;  %v3402_v22 = vld [vmem:[%s5798_s3 + $0x290] sm:$0xff]  ;;  %v5876_v24 = vld [vmem:[#allocation45_spill] sm:$0xff] }
 0x1cf   : > { %v4755_v18 = vpop.permute.xlu0 %1141  ;;  %1243 = vperm.xlu1 %3762, %v3375_v3   ;;  %v5864_v3 = vld [vmem:[#allocation65_spill] sm:$0xff]  ;;  %v1120_v42 = vadd.f32 %v1108_v51, %v979_v8 }
 0x1d0   : > { %v1318_v59 = vmul.f32 %v4667_v7, %v5864_v3 }
 0x1d1   : > { %v4760_v10 = vpop.permute.xlu1 %1143  ;;  %1510 = vperm.xlu0 %3761, %v3400_v53   ;;  %v1248_v53 = vmul.f32 %v5865_v1, %v1176_v45  ;;  %v1600_v45 = vmul.f32 %v4700_v54, %v5872_v60  ;;  %v1261_v20 = vadd.f32 %v1249_v4, %v1120_v42  ;;  %v3403_v4 = vld [vmem:[%s5798_s3 + $0x298] sm:$0xff] }
 0x1d2   : > { %v1390_v36 = vmul.f32 %v5870_v34, %v1318_v59 }
 0x1d3   : > { %v4762_v23 = vpop.permute.xlu0 %716  ;;  %1515 = vperm.xlu1 %3762, %v3401_v46   ;;  %v1260_v61 = vadd.f32 %v1248_v53, %v1119_v15  ;;  %v5877_v53 = vld [vmem:[#allocation46_spill] sm:$0xff] }
 0x1d4   : > { %v1402_v59 = vadd.f32 %v1390_v36, %v1261_v20  ;;  %v1672_v8 = vmul.f32 %v5877_v53, %v1600_v45  ;;  %v5879_v36 = vld [vmem:[#allocation52_spill] sm:$0xff]  ;;  %v3770_v20 = vld [vmem:[%s5856_s2 + $0x8] sm:$0xff]  }
 0x1d5   : > { %v4764_v30 = vpop.permute.xlu1 %718  ;;  %867 = vrot.lane.b32.xlu0 %v4364_v37, %s5858_s23 }
 0x1d7   : > { %v4768_v11 = vpop.permute.xlu0 %855  ;;  %869 = vrot.lane.b32.xlu1 %v4372_v40, %s5858_s23 }
 0x1d9   : > { %v4772_v33 = vpop.permute.xlu1 %857  ;;  %1145 = vrot.lane.b32.xlu0 %v4370_v39, %s5862_s1 }
 0x1db   : > { %v4781_v57 = vpop.permute.xlu0 %996  ;;  %1147 = vrot.lane.b32.xlu1 %v4376_v41, %s5862_s1 }
 0x1dd   : > { %v4792_v27 = vpop.permute.xlu1 %998  ;;  %1379 = vperm.xlu0 %3761, %v3388_v35   ;;  %v5867_v35 = vld [vmem:[#allocation66_spill] sm:$0xff] }
 0x1de   : > { %v1458_v52 = vmul.f32 %v4688_v26, %v5867_v35 }
 0x1df   : > { %v4802_v43 = vpop.permute.xlu0 %1137  ;;  %1384 = vperm.xlu1 %3762, %v3389_v62   ;;  %v1459_v62 = vmul.f32 %v4688_v26, %v5868_v6 }
 0x1e0   : > { %v1530_v50 = vmul.f32 %v5874_v49, %v1458_v52  ;;  %v3771_v49 = vld [vmem:[%s5856_s2 + $0x10] sm:$0xff]  }
 0x1e1   : > { %v4815_v63 = vpop.permute.xlu1 %1139  ;;  %1651 = vperm.xlu0 %3761, %v3414_v16   ;;  %v1389_v16 = vmul.f32 %v5869_v21, %v1317_v58  ;;  %v5875_v58 = vld [vmem:[#allocation40_spill] sm:$0xff] }
 0x1e2   : > { %v1531_v5 = vmul.f32 %v5875_v58, %v1459_v62  ;;  %v5878_v62 = vld [vmem:[#allocation51_spill] sm:$0xff] }
 0x1e3   : > { %v4825_v0 = vpop.permute.xlu0 %1278  ;;  %1656 = vperm.xlu1 %3762, %v3415_v29   ;;  %v5871_v29 = vld [vmem:[#allocation68_spill] sm:$0xff]  ;;  %v1401_v51 = vadd.f32 %v1389_v16, %v1260_v61 }
 0x1e4   : > { %v1599_v38 = vmul.f32 %v4700_v54, %v5871_v29  ;;  %v1543_v6 = vadd.f32 %v1531_v5, %v1402_v59  ;;  %v3428_v16 = vld [vmem:[%s5798_s3 + $0x340] sm:$0xff]  ;;  %v3417_v5 = vld [vmem:[%s5798_s3 + $0x2f8] sm:$0xff] }
 0x1e5   : > { %v4831_v46 = vpop.permute.xlu1 %1280  ;;  %1008 = vrot.lane.b32.xlu0 %v4364_v37, %s5861_s15  ;;  %v1542_v52 = vadd.f32 %v1530_v50, %v1401_v51  ;;  %v3416_v50 = vld [vmem:[%s5798_s3 + $0x2f0] sm:$0xff] }
 0x1e6   : > { %v1671_v1 = vmul.f32 %v5876_v24, %v1599_v38  ;;  %v1684_v34 = vadd.f32 %v1672_v8, %v1543_v6  ;;  %v3429_v38 = vld [vmem:[%s5798_s3 + $0x348] sm:$0xff]  ;;  %v3431_v8 = vld [vmem:[%s5798_s3 + $0x358] sm:$0xff] }
 0x1e7   : > { %v4841_v17 = vpop.permute.xlu0 %1419  ;;  %1010 = vrot.lane.b32.xlu1 %v4372_v40, %s5861_s15 }
 0x1e8   : > { %v1683_v42 = vadd.f32 %v1671_v1, %v1542_v52  ;;  %v3430_v1 = vld [vmem:[%s5798_s3 + $0x350] sm:$0xff]  ;;  %v755_v52 = vmul.f32 %v4629_v44, %v4762_v23 }
 0x1e9   : > { %v4850_v25 = vpop.permute.xlu1 %1421  ;;  %1286 = vrot.lane.b32.xlu0 %v4370_v39, %s5873_s12  ;;  %v5880_v23 = vld [vmem:[#allocation18_spill] sm:$0xff] }
 0x1eb   : > { %v1698_v3 = vpop.permute.xlu0 %1697  ;;  %1288 = vrot.lane.b32.xlu1 %v4376_v41, %s5873_s12 }
 0x1ec   : > { %v1740_v12 = vmul.f32 %v4711_v56, %v1698_v3 }
 0x1ed   : > { %v1700_v35 = vpop.permute.xlu1 %1699  ;;  %1520 = vperm.xlu0 %3761, %v3402_v22  }
 0x1ee   : > { %v1812_v15 = vmul.f32 %v5878_v62, %v1740_v12  ;;  %v1741_v21 = vmul.f32 %v4711_v56, %v1700_v35  ;;  %v756_v62 = vmul.f32 %v4629_v44, %v4764_v30 }
 0x1ef   : > { %1525 = vperm.xlu1 %3762, %v3403_v4  }
 0x1f0   : > { %v1813_v29 = vmul.f32 %v5879_v36, %v1741_v21  ;;  %v1824_v60 = vadd.f32 %v1812_v15, %v1683_v42  ;;  %v896_v15 = vmul.f32 %v4635_v31, %v4768_v11  ;;  %v827_v42 = vmul.f32 %v5880_v23, %v755_v52  ;;  %v5881_v36 = vld [vmem:[#allocation19_spill] sm:$0xff] }
 0x1f1   : > { %1792 = vperm.xlu0 %3761, %v3428_v16   ;;  %v897_v16 = vmul.f32 %v4635_v31, %v4772_v33  ;;  %v1038_v11 = vmul.f32 %v4644_v55, %v4792_v27  ;;  %v5883_v33 = vld [vmem:[#allocation16_spill] sm:$0xff]  ;;  %v1179_v27 = vmul.f32 %v4654_v19, %v4815_v63 }
 0x1f2   : > { %v1825_v45 = vadd.f32 %v1813_v29, %v1684_v34  ;;  %v1037_v34 = vmul.f32 %v4644_v55, %v4781_v57  ;;  %v828_v29 = vmul.f32 %v5881_v36, %v756_v62  ;;  %v5885_v57 = vld [vmem:[#allocation34_spill] sm:$0xff]  ;;  %v5888_v62 = vld [vmem:[#allocation29_spill] sm:$0xff] }
 0x1f3   : > { %1797 = vperm.xlu1 %3762, %v3429_v38   ;;  %v5882_v38 = vld [vmem:[#allocation32_spill] sm:$0xff] }
 0x1f4   : > { %v1835_v61 = vpack.c.bf16 %v1825_v45, %v1824_v60  ;;  %v700_v60 = vmul.f32 %v5883_v33, %v5882_v38  ;;  %v5884_v45 = vld [vmem:[#allocation21_spill] sm:$0xff]  ;;  %v1109_v23 = vmul.f32 %v5888_v62, %v1037_v34  ;;  %v5889_v38 = vld [vmem:[#allocation30_spill] sm:$0xff] }
 0x1f5   : > { %1149 = vrot.lane.b32.xlu0 %v4364_v37, %s5862_s1  ;;  %v1110_v33 = vmul.f32 %v5889_v38, %v1038_v11  ;;  %v1460_v11 = vmul.f32 %v4688_v26, %v4841_v17  ;;  %v5895_v38 = vld [vmem:[#allocation49_spill] sm:$0xff] }
 0x1f6   : > { %3618 = vmatprep.subr.bf16.mxu1 %v1835_v61  ;;  %v839_v52 = vadd.f32 %v827_v42, %v700_v60  ;;  %v5892_v60 = vld [vmem:[#allocation38_spill] sm:$0xff] }
 0x1f7   : > { %3619 = vmatpush3.bf16.msra.mxu1 %v1835_v61  ;;  %1151 = vrot.lane.b32.xlu1 %v4372_v40, %s5862_s1  ;;  %v968_v61 = vmul.f32 %v5884_v45, %v896_v15  ;;  %v1319_v15 = vmul.f32 %v4667_v7, %v4825_v0  ;;  %v5890_v45 = vld [vmem:[#allocation37_spill] sm:$0xff]  ;;  %v3446_v0 = vld [vmem:[%s5891_s4 + $0x20] sm:$0xff] }
 0x1f9   : > { %1427 = vrot.lane.b32.xlu0 %v4370_v39, %s5852_s26  ;;  %v980_v63 = vadd.f32 %v968_v61, %v839_v52 }
 0x1fa   : > { %3621 = vmatmul.mubr.msk.bf16.vlgmr.msra.gmra.mrb[0].mxu1 %vm523_vm0, %v3770_v20  ;;  %v1178_v20 = vmul.f32 %v4654_v19, %v4802_v43 }
 0x1fb   : > { %1429 = vrot.lane.b32.xlu1 %v4376_v41, %s5852_s26  ;;  %3628 = vmatprep.mubr.msk.bf16.mxu1 %vm523_vm0, %v3771_v49  ;;  %v1121_v61 = vadd.f32 %v1109_v23, %v980_v63  ;;  %v3448_v23 = vld [vmem:[%s5891_s4 + $0x30] sm:$0xff]  ;;  %v1532_v63 = vmul.f32 %v5895_v38, %v1460_v11  ;;  %v3462_v11 = vld [vmem:[%s5891_s4 + $0x40] sm:$0xff] }
 0x1fc   : > { %v4895_v58 = vpop.permute.xlu0 %1641 }
 0x1fd   : > { %1661 = vperm.xlu0 %3761, %v3416_v50   ;;  %v5886_v50 = vld [vmem:[#allocation17_spill] sm:$0xff] }
 0x1fe   : > { %v4900_v22 = vpop.permute.xlu1 %1646 }
 0x1ff   : > { %1666 = vperm.xlu1 %3762, %v3417_v5   ;;  %v701_v5 = vmul.f32 %v5886_v50, %v5885_v57  ;;  %v1250_v57 = vmul.f32 %v5890_v45, %v1178_v20  ;;  %v5893_v20 = vld [vmem:[#allocation43_spill] sm:$0xff]  ;;  %v5896_v45 = vld [vmem:[#allocation50_spill] sm:$0xff] }
 0x200   : > { %v4902_v51 = vpop.permute.xlu0 %946  ;;  %v1391_v50 = vmul.f32 %v5893_v20, %v1319_v15 }
 0x201   : > { %1290 = vrot.lane.b32.xlu0 %v4364_v37, %s5873_s12  ;;  %v840_v36 = vadd.f32 %v828_v29, %v701_v5  ;;  %v1251_v29 = vmul.f32 %v5892_v60, %v1179_v27  ;;  %v5894_v27 = vld [vmem:[#allocation44_spill] sm:$0xff] }
 0x202   : > { %v4906_v3 = vpop.permute.xlu1 %951 }
 0x203   : > { %1292 = vrot.lane.b32.xlu1 %v4372_v40, %s5873_s12 }
 0x204   : > { %v4910_v59 = vpop.permute.xlu0 %1282 }
 0x205   : > { %1568 = vrot.lane.b32.xlu0 %v4370_v39, %s5857_s25 }
 0x206   : > { %v4914_v24 = vpop.permute.xlu1 %1284 }
 0x207   : > { %1570 = vrot.lane.b32.xlu1 %v4376_v41, %s5857_s25 }
 0x208   : > { %v1561_v53 = vpop.permute.xlu0 %1560 }
 0x209   : > { %1802 = vperm.xlu0 %3761, %v3430_v1   ;;  %v5887_v1 = vld [vmem:[#allocation22_spill] sm:$0xff]  ;;  %v1601_v17 = vmul.f32 %v4700_v54, %v1561_v53  ;;  %v3449_v53 = vld [vmem:[%s5891_s4 + $0x38] sm:$0xff] }
 0x20a   : > { %v1563_v12 = vpop.permute.xlu1 %1562 }
 0x20b   : > { %1807 = vperm.xlu1 %3762, %v3431_v8   ;;  %v969_v8 = vmul.f32 %v5887_v1, %v897_v16  ;;  %v1320_v16 = vmul.f32 %v4667_v7, %v4831_v46  ;;  %v1461_v46 = vmul.f32 %v4688_v26, %v4850_v25  ;;  %v3447_v1 = vld [vmem:[%s5891_s4 + $0x28] sm:$0xff]  ;;  %v1602_v62 = vmul.f32 %v4700_v54, %v1563_v12 }
 0x20c   : > { %v4924_v4 = vpop.permute.xlu0 %1782  ;;  %v1262_v25 = vadd.f32 %v1250_v57, %v1121_v61  ;;  %v5897_v57 = vld [vmem:[#allocation55_spill] sm:$0xff] }
 0x20d   : > { %1431 = vrot.lane.b32.xlu0 %v4364_v37, %s5852_s26  ;;  %v981_v34 = vadd.f32 %v969_v8, %v840_v36  ;;  %v1392_v52 = vmul.f32 %v5894_v27, %v1320_v16  ;;  %v1533_v60 = vmul.f32 %v5896_v45, %v1461_v46 }
 0x20e   : > { %v4928_v35 = vpop.permute.xlu1 %1787 }
 0x20f   : > { %1433 = vrot.lane.b32.xlu1 %v4372_v40, %s5852_s26  ;;  %v1122_v8 = vadd.f32 %v1110_v33, %v981_v34  ;;  %v1403_v33 = vadd.f32 %v1391_v50, %v1262_v25  ;;  %v5898_v34 = vld [vmem:[#allocation56_spill] sm:$0xff] }
 0x210   : > { %v4934_v6 = vpop.permute.xlu0 %688  ;;  %v1674_v61 = vmul.f32 %v5898_v34, %v1602_v62  ;;  %v757_v34 = vmul.f32 %v4629_v44, %v4723_v47 }
 0x211   : > { %1709 = vrot.lane.b32.xlu0 %v4370_v39, %s5860_s16  ;;  %v1263_v15 = vadd.f32 %v1251_v29, %v1122_v8  ;;  %v1544_v46 = vadd.f32 %v1532_v63, %v1403_v33  ;;  %v3464_v63 = vld [vmem:[%s5891_s4 + $0x50] sm:$0xff] }
 0x212   : > { %v4942_v21 = vpop.permute.xlu1 %693 }
 0x213   : > { %1711 = vrot.lane.b32.xlu1 %v4376_v41, %s5860_s16  ;;  %v1404_v12 = vadd.f32 %v1392_v52, %v1263_v15 }
 0x214   : > { %v4951_v30 = vpop.permute.xlu0 %815 }
 0x215   : > { %1572 = vrot.lane.b32.xlu0 %v4364_v37, %s5857_s25  ;;  %v1545_v50 = vadd.f32 %v1533_v60, %v1404_v12 }
 0x216   : > { %v4963_v49 = vpop.permute.xlu1 %820 }
 0x217   : > { %1574 = vrot.lane.b32.xlu1 %v4372_v40, %s5857_s25  ;;  %v1686_v25 = vadd.f32 %v1674_v61, %v1545_v50  ;;  %v5901_v50 = vld [vmem:[#allocation27_spill] sm:$0xff] }
 0x218   : > { %v4975_v43 = vpop.permute.xlu0 %1087 }
 0x219   : > { %1713 = vrot.lane.b32.xlu0 %v4364_v37, %s5860_s16 }
 0x21a   : > { %v4983_v42 = vpop.permute.xlu1 %1092 }
 0x21b   : > { %1715 = vrot.lane.b32.xlu1 %v4372_v40, %s5860_s16 }
 0x21c   : > { %v4996_v5 = vpop.permute.xlu0 %1423 }
 0x21d   : > { %1985 = vperm.xlu0 %3761, %v3446_v0   ;;  %v1673_v0 = vmul.f32 %v5897_v57, %v1601_v17  ;;  %v3463_v17 = vld [vmem:[%s5891_s4 + $0x48] sm:$0xff] }
 0x21e   : > { %v5004_v36 = vpop.permute.xlu1 %1425 }
 0x21f   : > { %1990 = vperm.xlu1 %3762, %v3447_v1   ;;  %v5899_v1 = vld [vmem:[#allocation59_spill] sm:$0xff]  ;;  %v1685_v62 = vadd.f32 %v1673_v0, %v1544_v46  ;;  %v899_v46 = vmul.f32 %v4635_v31, %v4736_v48  ;;  %v1180_v48 = vmul.f32 %v4654_v19, %v4755_v18  ;;  %v5908_v18 = vld [vmem:[#allocation42_spill] sm:$0xff] }
 0x220   : > { %v1702_v16 = vpop.permute.xlu0 %1701 }
 0x221   : > { %v1742_v20 = vmul.f32 %v4711_v56, %v1702_v16  ;;  %1995 = vperm.xlu0 %3761, %v3448_v23   ;;  %v5900_v23 = vld [vmem:[#allocation60_spill] sm:$0xff]  ;;  %v3465_v16 = vld [vmem:[%s5891_s4 + $0x58] sm:$0xff] }
 0x222   : > { %v1704_v29 = vpop.permute.xlu1 %1703 }
 0x223   : > { %v1814_v8 = vmul.f32 %v5899_v1, %v1742_v20  ;;  %v1743_v27 = vmul.f32 %v4711_v56, %v1704_v29  ;;  %2000 = vperm.xlu1 %3762, %v3449_v53   ;;  %v758_v20 = vmul.f32 %v4629_v44, %v4728_v14  ;;  %v898_v29 = vmul.f32 %v4635_v31, %v4732_v2  ;;  %v5903_v14 = vld [vmem:[#allocation25_spill] sm:$0xff]  ;;  %v5904_v2 = vld [vmem:[#allocation35_spill] sm:$0xff] }
 0x224   : > { %v5022_v52 = vpop.permute.xlu0 %724  ;;  %v829_v1 = vmul.f32 %v5901_v50, %v757_v34 }
 0x225   : > { %v1815_v15 = vmul.f32 %v5900_v23, %v1743_v27  ;;  %2124 = vperm.xlu0 %3761, %v3462_v11   ;;  %v1826_v45 = vadd.f32 %v1814_v8, %v1685_v62  ;;  %v1039_v8 = vmul.f32 %v4644_v55, %v4743_v9  ;;  %v1040_v62 = vmul.f32 %v4644_v55, %v4750_v13  ;;  %v5907_v13 = vld [vmem:[#allocation41_spill] sm:$0xff] }
 0x226   : > { %v5028_v38 = vpop.permute.xlu1 %726  ;;  %v970_v23 = vmul.f32 %v5904_v2, %v898_v29 }
 0x227   : > { %v1827_v60 = vadd.f32 %v1815_v15, %v1686_v25  ;;  %2129 = vperm.xlu1 %3762, %v3463_v17   ;;  %v5902_v17 = vld [vmem:[#allocation28_spill] sm:$0xff]  ;;  %v702_v25 = vmul.f32 %v4342_v28, %v5903_v14  ;;  %v1111_v34 = vmul.f32 %v5907_v13, %v1039_v8  ;;  %v1321_v28 = vmul.f32 %v4667_v7, %v4910_v59  ;;  %v5909_v14 = vld [vmem:[#allocation47_spill] sm:$0xff] }
 0x228   : > { %v5033_v33 = vpop.permute.xlu0 %956  ;;  %v830_v47 = vmul.f32 %v5902_v17, %v758_v20  ;;  %v1112_v50 = vmul.f32 %v5908_v18, %v1040_v62  ;;  %v1322_v17 = vmul.f32 %v4667_v7, %v4914_v24  ;;  %v1462_v8 = vmul.f32 %v4688_v26, %v4996_v5  ;;  %v5913_v5 = vld [vmem:[#allocation57_spill] sm:$0xff]  ;;  %v5914_v18 = vld [vmem:[#allocation58_spill] sm:$0xff] }
 0x229   : > { %2134 = vperm.xlu0 %3761, %v3464_v63   ;;  %v1971_v53 = vpack.c.bf16 %v1827_v60, %v1826_v45  ;;  %v5905_v63 = vld [vmem:[#allocation26_spill] sm:$0xff]  ;;  %v5906_v45 = vld [vmem:[#allocation36_spill] sm:$0xff]  ;;  %v1463_v59 = vmul.f32 %v4688_v26, %v5004_v36 }
 0x22a   : > { %v5038_v12 = vpop.permute.xlu1 %961  ;;  %v703_v9 = vmul.f32 %v4350_v32, %v5905_v63  ;;  %v971_v60 = vmul.f32 %v5906_v45, %v899_v46  ;;  %v1252_v46 = vmul.f32 %v5909_v14, %v1180_v48  ;;  %v5911_v63 = vld [vmem:[#allocation53_spill] sm:$0xff] }
 0x22b   : > { %3624 = vmatprep.subr.bf16.mxu1 %v1971_v53  ;;  %2139 = vperm.xlu1 %3762, %v3465_v16   ;;  %v1181_v16 = vmul.f32 %v4654_v19, %v4760_v10  ;;  %v1393_v62 = vmul.f32 %v5911_v63, %v1321_v28  ;;  %v1535_v36 = vmul.f32 %v5914_v18, %v1463_v59 }
 0x22c   : > { %3625 = vmatpush3.bf16.msra.mxu1 %v1971_v53  ;;  %v5040_v57 = vpop.permute.xlu0 %1228  ;;  %v841_v53 = vadd.f32 %v829_v1, %v702_v25  ;;  %v842_v29 = vadd.f32 %v830_v47, %v703_v9  ;;  %v5910_v1 = vld [vmem:[#allocation48_spill] sm:$0xff] }
 0x22d   : > { %v1253_v25 = vmul.f32 %v5910_v1, %v1181_v16 }
 0x22e   : > { %v5042_v0 = vpop.permute.xlu1 %1233  ;;  %v982_v32 = vadd.f32 %v970_v23, %v841_v53  ;;  %v983_v10 = vadd.f32 %v971_v60, %v842_v29  ;;  %v5912_v23 = vld [vmem:[#allocation54_spill] sm:$0xff]  ;;  %v1534_v29 = vmul.f32 %v5913_v5, %v1462_v8 }
 0x22f   : > { %v1394_v45 = vmul.f32 %v5912_v23, %v1322_v17 }
 0x230   : > { %v1565_v61 = vpop.permute.xlu0 %1564  ;;  %v1123_v47 = vadd.f32 %v1111_v34, %v982_v32  ;;  %v1124_v24 = vadd.f32 %v1112_v50, %v983_v10 }
 0x231   : > { %v1603_v48 = vmul.f32 %v4700_v54, %v1565_v61 }
 0x232   : > { %v1567_v11 = vpop.permute.xlu1 %1566  ;;  %v1264_v53 = vadd.f32 %v1252_v46, %v1123_v47  ;;  %v1265_v13 = vadd.f32 %v1253_v25, %v1124_v24 }
 0x233   : > { %v1604_v60 = vmul.f32 %v4700_v54, %v1567_v11  ;;  %v1675_v14 = vmul.f32 %v4895_v58, %v1603_v48 }
 0x234   : > { %v5055_v27 = vpop.permute.xlu0 %863  ;;  %v1405_v34 = vadd.f32 %v1393_v62, %v1264_v53  ;;  %v1406_v28 = vadd.f32 %v1394_v45, %v1265_v13  ;;  %v3772_v45 = vld [vmem:[%s5856_s2 + $0x18] sm:$0xff]  }
 0x235   : > { %v1676_v50 = vmul.f32 %v4900_v22, %v1604_v60 }
 0x236   : > { %v5065_v15 = vpop.permute.xlu1 %865  ;;  %v1546_v10 = vadd.f32 %v1534_v29, %v1405_v34  ;;  %v1547_v11 = vadd.f32 %v1535_v36, %v1406_v28 }
 0x238   : > { %v5075_v20 = vpop.permute.xlu0 %1097  ;;  %v1687_v8 = vadd.f32 %v1675_v14, %v1546_v10  ;;  %v1688_v47 = vadd.f32 %v1676_v50, %v1547_v11 }
 0x23a   : > { %v5081_v2 = vpop.permute.xlu1 %1102 }
 0x23c   : > { %v5089_v9 = vpop.permute.xlu0 %1369 }
 0x23e   : > { %v5094_v16 = vpop.permute.xlu1 %1374 }
 0x240   : > { %v1706_v32 = vpop.permute.xlu0 %1705 }
 0x241   : > { %v1744_v17 = vmul.f32 %v4711_v56, %v1706_v32 }
 0x242   : > { %v1708_v61 = vpop.permute.xlu1 %1707 }
 0x243   : > { %v1816_v46 = vmul.f32 %v4924_v4, %v1744_v17  ;;  %v1745_v1 = vmul.f32 %v4711_v56, %v1708_v61  ;;  %v3773_v4 = vld [vmem:[%s5856_s2 + $0x20] sm:$0xff]  }
 0x244   : > { %v729_v25 = vpop.permute.xlu0 %728 }
 0x245   : > { %v1817_v59 = vmul.f32 %v4928_v35, %v1745_v1  ;;  %v1828_v62 = vadd.f32 %v1816_v46, %v1687_v8 }
 0x246   : > { %v731_v63 = vpop.permute.xlu1 %730 }
 0x247   : > { %v1829_v24 = vadd.f32 %v1817_v59, %v1688_v47 }
 0x248   : > { %v1005_v58 = vpop.permute.xlu0 %1004 }
 0x249   : > { %v1972_v23 = vpack.c.bf16 %v1829_v24, %v1828_v62  ;;  %v1041_v56 = vmul.f32 %v4644_v55, %v1005_v58 }
 0x24a   : > { %v1007_v22 = vpop.permute.xlu1 %1006 }
 0x24b   : > { %3626 = vmatprep.subr.bf16.mxu1 %v1972_v23 }
 0x24c   : > { %v5107_v48 = vpop.permute.xlu0 %1238  ;;  %3627 = vmatpush3.bf16.msra.mxu1 %v1972_v23 }
 0x24d   : > { %5915 = vst [vmem:[#allocation20_spill] sm:$0xff] %v5107_v48  ;;  %v5929_v48 = vld [vmem:[#allocation62_spill] sm:$0xff] }
 0x24e   : > { %v5112_v60 = vpop.permute.xlu1 %1243 }
 0x24f   : > { %5916 = vst [vmem:[#allocation65_spill] sm:$0xff] %v5112_v60  ;;  %3629 = vmatmul.mubr.msk.bf16.vlgmr.msra.gmra.mrb[4].mxu1 %vm523_vm0, %v3772_v45  ;;  %v759_v45 = vmul.f32 %v4629_v44, %v5022_v52  ;;  %v5928_v60 = vld [vmem:[#allocation64_spill] sm:$0xff] }
 0x250   : > { %v5115_v35 = vpop.permute.xlu0 %1510  ;;  %3636 = vmatprep.mubr.msk.bf16.mxu1 %vm523_vm0, %v3773_v4  ;;  %v760_v4 = vmul.f32 %v4629_v44, %v5028_v38  ;;  %v705_v38 = vmul.f32 %v5929_v48, %v4376_v41 }
 0x252   : > { %v5118_v53 = vpop.permute.xlu1 %1515  ;;  %v832_v52 = vmul.f32 %v5928_v60, %v760_v4  ;;  %v706_v60 = vmul.f32 %v4364_v37, %v4934_v6 }
 0x254   : > { %v868_v13 = vpop.permute.xlu0 %867 }
 0x256   : > { %v870_v5 = vpop.permute.xlu1 %869 }
 0x258   : > { %v1146_v29 = vpop.permute.xlu0 %1145 }
 0x259   : > { %v1182_v58 = vmul.f32 %v4654_v19, %v1146_v29 }
 0x25a   : > { %v1148_v18 = vpop.permute.xlu1 %1147 }
 0x25c   : > { %v5120_v36 = vpop.permute.xlu0 %1379 }
 0x25d   : > { %5917 = vst [vmem:[#allocation23_spill] sm:$0xff] %v5120_v36 }
 0x25e   : > { %v5122_v34 = vpop.permute.xlu1 %1384 }
 0x25f   : > { %5918 = vst [vmem:[#allocation24_spill] sm:$0xff] %v5122_v34  ;;  %v761_v34 = vmul.f32 %v4629_v44, %v729_v25 }
 0x260   : > { %v5124_v32 = vpop.permute.xlu0 %1651 }
 0x261   : > { %5919 = vst [vmem:[#allocation66_spill] sm:$0xff] %v5124_v32  ;;  %v5930_v32 = vld [vmem:[#allocation61_spill] sm:$0xff] }
 0x262   : > { %v5126_v28 = vpop.permute.xlu1 %1656 }
 0x263   : > { %5920 = vst [vmem:[#allocation67_spill] sm:$0xff] %v5126_v28  ;;  %v1042_v28 = vmul.f32 %v4644_v55, %v1007_v22 }
 0x264   : > { %v1009_v14 = vpop.permute.xlu0 %1008 }
 0x265   : > { %v1114_v37 = vmul.f32 %v4983_v42, %v1042_v28  ;;  %v1043_v42 = vmul.f32 %v4644_v55, %v1009_v14 }
 0x266   : > { %v1011_v50 = vpop.permute.xlu1 %1010 }
 0x268   : > { %v1287_v17 = vpop.permute.xlu0 %1286 }
 0x269   : > { %v1323_v6 = vmul.f32 %v4667_v7, %v1287_v17 }
 0x26a   : > { %v1289_v61 = vpop.permute.xlu1 %1288 }
 0x26c   : > { %v5128_v10 = vpop.permute.xlu0 %1520 }
 0x26d   : > { %5921 = vst [vmem:[#allocation31_spill] sm:$0xff] %v5128_v10 }
 0x26e   : > { %v5130_v11 = vpop.permute.xlu1 %1525 }
 0x26f   : > { %5922 = vst [vmem:[#allocation33_spill] sm:$0xff] %v5130_v11  ;;  %v900_v11 = vmul.f32 %v4635_v31, %v5055_v27 }
 0x270   : > { %v5132_v46 = vpop.permute.xlu0 %1792 }
 0x271   : > { %5923 = vst [vmem:[#allocation68_spill] sm:$0xff] %v5132_v46  ;;  %v972_v25 = vmul.f32 %v4902_v51, %v900_v11  ;;  %v1183_v51 = vmul.f32 %v4654_v19, %v1148_v18  ;;  %v1254_v18 = vmul.f32 %v5040_v57, %v1182_v58  ;;  %v1395_v11 = vmul.f32 %v5089_v9, %v1323_v6 }
 0x272   : > { %v5134_v1 = vpop.permute.xlu1 %1797  ;;  %v1115_v9 = vmul.f32 %v5075_v20, %v1043_v42 }
 0x273   : > { %5924 = vst [vmem:[#allocation69_spill] sm:$0xff] %v5134_v1  ;;  %v901_v1 = vmul.f32 %v4635_v31, %v5065_v15  ;;  %v704_v15 = vmul.f32 %v5930_v32, %v4370_v39  ;;  %v903_v39 = vmul.f32 %v4635_v31, %v870_v5  ;;  %v1324_v32 = vmul.f32 %v4667_v7, %v1289_v61 }
 0x274   : > { %v1150_v8 = vpop.permute.xlu0 %1149  ;;  %v1044_v61 = vmul.f32 %v4644_v55, %v1011_v50 }
 0x276   : > { %v1152_v47 = vpop.permute.xlu1 %1151  ;;  %v5941_v42 = vld [vmem:[#allocation33_spill] sm:$0xff] }
 0x277   : > { %v1185_v14 = vmul.f32 %v4654_v19, %v1152_v47 }
 0x278   : > { %v1428_v59 = vpop.permute.xlu0 %1427 }
 0x27a   : > { %v1430_v62 = vpop.permute.xlu1 %1429 }
 0x27b   : > { %v1465_v28 = vmul.f32 %v4688_v26, %v1430_v62 }
 0x27c   : > { %v5136_v24 = vpop.permute.xlu0 %1661 }
 0x27d   : > { %5925 = vst [vmem:[#allocation39_spill] sm:$0xff] %v5136_v24  ;;  %v762_v24 = vmul.f32 %v4629_v44, %v731_v63  ;;  %v973_v44 = vmul.f32 %v4906_v3, %v901_v1  ;;  %v902_v63 = vmul.f32 %v4635_v31, %v868_v13  ;;  %v707_v3 = vmul.f32 %v4372_v40, %v4942_v21 }
 0x27e   : > { %v5138_v23 = vpop.permute.xlu1 %1666  ;;  %v1113_v13 = vmul.f32 %v4975_v43, %v1041_v56  ;;  %v1464_v40 = vmul.f32 %v4688_v26, %v1428_v59  ;;  %v975_v56 = vmul.f32 %v5038_v12, %v903_v39  ;;  %v1255_v43 = vmul.f32 %v5042_v0, %v1183_v51 }
 0x27f   : > { %5926 = vst [vmem:[#allocation40_spill] sm:$0xff] %v5138_v23  ;;  %v5927_v23 = vld [vmem:[#allocation63_spill] sm:$0xff]  ;;  %v834_v41 = vmul.f32 %v4963_v49, %v762_v24  ;;  %v1396_v1 = vmul.f32 %v5094_v16, %v1324_v32  ;;  %v1184_v0 = vmul.f32 %v4654_v19, %v1150_v8  ;;  %v1537_v50 = vmul.f32 %v5118_v53, %v1465_v28  ;;  %v5931_v19 = vld [vmem:[#allocation66_spill] sm:$0xff]  ;;  %v5939_v32 = vld [vmem:[#allocation69_spill] sm:$0xff] }
 0x280   : > { %v5144_v10 = vpop.permute.xlu0 %1290  ;;  %v831_v46 = vmul.f32 %v5927_v23, %v759_v45  ;;  %v833_v23 = vmul.f32 %v4951_v30, %v761_v34  ;;  %v844_v45 = vadd.f32 %v832_v52, %v705_v38  ;;  %v974_v34 = vmul.f32 %v5033_v33, %v902_v63  ;;  %v5933_v63 = vld [vmem:[#allocation70_spill] sm:$0xff] }
 0x281   : > { %v846_v5 = vadd.f32 %v834_v41, %v707_v3  ;;  %v1536_v62 = vmul.f32 %v5115_v35, %v1464_v40  ;;  %v1116_v16 = vmul.f32 %v5081_v2, %v1044_v61  ;;  %v5932_v35 = vld [vmem:[#allocation67_spill] sm:$0xff]  ;;  %v5935_v41 = vld [vmem:[#allocation65_spill] sm:$0xff] }
 0x282   : > { %v1293_v36 = vpop.permute.xlu1 %1292  ;;  %v843_v48 = vadd.f32 %v831_v46, %v704_v15  ;;  %v985_v29 = vadd.f32 %v973_v44, %v844_v45  ;;  %v845_v31 = vadd.f32 %v833_v23, %v706_v60  ;;  %v5934_v23 = vld [vmem:[#allocation20_spill] sm:$0xff]  ;;  %v1257_v53 = vmul.f32 %v5935_v41, %v1185_v14  ;;  %v5937_v3 = vld [vmem:[#allocation23_spill] sm:$0xff] }
 0x283   : > { %v987_v52 = vadd.f32 %v975_v56, %v846_v5  ;;  %v1326_v15 = vmul.f32 %v4667_v7, %v1293_v36  ;;  %v1256_v20 = vmul.f32 %v5934_v23, %v1184_v0  ;;  %v2068_v41 = vld [vmem:[#allocation4] sm:$0xff] }
 0x284   : > { %v1569_v27 = vpop.permute.xlu0 %1568  ;;  %v984_v49 = vadd.f32 %v972_v25, %v843_v48  ;;  %v1126_v33 = vadd.f32 %v1114_v37, %v985_v29  ;;  %v986_v57 = vadd.f32 %v974_v34, %v845_v31  ;;  %v5938_v37 = vld [vmem:[#allocation24_spill] sm:$0xff] }
 0x285   : > { %v1605_v59 = vmul.f32 %v4700_v54, %v1569_v27  ;;  %v1325_v27 = vmul.f32 %v4667_v7, %v5144_v10  ;;  %v5936_v7 = vld [vmem:[#allocation68_spill] sm:$0xff]  ;;  %v1128_v51 = vadd.f32 %v1116_v16, %v987_v52  ;;  %v1398_v6 = vmul.f32 %v5938_v37, %v1326_v15 }
 0x286   : > { %v1571_v22 = vpop.permute.xlu1 %1570  ;;  %v1125_v17 = vadd.f32 %v1113_v13, %v984_v49  ;;  %v1267_v55 = vadd.f32 %v1255_v43, %v1126_v33  ;;  %v1127_v39 = vadd.f32 %v1115_v9, %v986_v57 }
 0x287   : > { %v1606_v12 = vmul.f32 %v4700_v54, %v1571_v22  ;;  %v1677_v47 = vmul.f32 %v5931_v19, %v1605_v59  ;;  %v1397_v13 = vmul.f32 %v5937_v3, %v1325_v27  ;;  %v1269_v40 = vadd.f32 %v1257_v53, %v1128_v51 }
 0x288   : > { %v5175_v30 = vpop.permute.xlu0 %1802  ;;  %v1266_v24 = vadd.f32 %v1254_v18, %v1125_v17  ;;  %v1408_v25 = vadd.f32 %v1396_v1, %v1267_v55  ;;  %v1268_v18 = vadd.f32 %v1256_v20, %v1127_v39  ;;  %v5942_v1 = vld [vmem:[#allocation39_spill] sm:$0xff] }
 0x289   : > { %v1678_v44 = vmul.f32 %v5932_v35, %v1606_v12  ;;  %v5943_v12 = vld [vmem:[#allocation40_spill] sm:$0xff] }
 0x28a   : > { %v5181_v21 = vpop.permute.xlu1 %1807  ;;  %v1407_v38 = vadd.f32 %v1395_v11, %v1266_v24  ;;  %v1549_v48 = vadd.f32 %v1537_v50, %v1408_v25  ;;  %v1409_v11 = vadd.f32 %v1397_v13, %v1268_v18 }
 0x28c   : > { %v1432_v46 = vpop.permute.xlu0 %1431  ;;  %v1548_v58 = vadd.f32 %v1536_v62, %v1407_v38  ;;  %v1690_v34 = vadd.f32 %v1678_v44, %v1549_v48 }
 0x28d   : > { %v1466_v2 = vmul.f32 %v4688_v26, %v1432_v46  ;;  %v1410_v46 = vadd.f32 %v1398_v6, %v1269_v40 }
 0x28e   : > { %v1434_v4 = vpop.permute.xlu1 %1433  ;;  %v1689_v29 = vadd.f32 %v1677_v47, %v1548_v58 }
 0x28f   : > { %v1467_v10 = vmul.f32 %v4688_v26, %v1434_v4  ;;  %v5940_v26 = vld [vmem:[#allocation31_spill] sm:$0xff] }
 0x290   : > { %v1710_v8 = vpop.permute.xlu0 %1709  ;;  %v1538_v56 = vmul.f32 %v5940_v26, %v1466_v2 }
 0x291   : > { %v1746_v60 = vmul.f32 %v5933_v63, %v1710_v8  ;;  %v1539_v28 = vmul.f32 %v5941_v42, %v1467_v10  ;;  %v3774_v8 = vld [vmem:[%s5856_s2 + $0x28] sm:$0xff]   ;;  %s5946_s2 = smov 64  }
 0x292   : > { %v1712_v22 = vpop.permute.xlu1 %1711  ;;  %v1550_v4 = vadd.f32 %v1538_v56, %v1409_v11 }
 0x293   : > { %v1818_v36 = vmul.f32 %v5936_v7, %v1746_v60  ;;  %v1747_v45 = vmul.f32 %v5933_v63, %v1712_v22  ;;  %v1551_v52 = vadd.f32 %v1539_v28, %v1410_v46  ;;  %v2070_v60 = vld [vmem:[#allocation4 + $0x10] sm:$0xff]  ;;  %v2071_v22 = vld [vmem:[#allocation4 + $0x18] sm:$0xff] }
 0x294   : > { %v1573_v49 = vpop.permute.xlu0 %1572 }
 0x295   : > { %v1819_v31 = vmul.f32 %v5939_v32, %v1747_v45  ;;  %v1607_v5 = vmul.f32 %v4700_v54, %v1573_v49  ;;  %v1830_v17 = vadd.f32 %v1818_v36, %v1689_v29  ;;  %v2069_v36 = vld [vmem:[#allocation4 + $0x8] sm:$0xff] }
 0x296   : > { %v1575_v43 = vpop.permute.xlu1 %1574 }
 0x297   : > { %v1831_v33 = vadd.f32 %v1819_v31, %v1690_v34  ;;  %v1608_v61 = vmul.f32 %v4700_v54, %v1575_v43  ;;  %v1679_v59 = vmul.f32 %v5942_v1, %v1607_v5  ;;  %v5944_v31 = vmov 0.0  }
 0x298   : > { %v1714_v57 = vpop.permute.xlu0 %1713 }
 0x299   : > { %v1680_v24 = vmul.f32 %v5943_v12, %v1608_v61  ;;  %v1748_v0 = vmul.f32 %v5933_v63, %v1714_v57  ;;  %v2110_v14 = vpack.c.bf16 %v1831_v33, %v1830_v17  ;;  %v1691_v54 = vadd.f32 %v1679_v59, %v1550_v4  ;;  %v2209_v4 = vld [vmem:[#allocation5 + $0x10] sm:$0xff] }
 0x29a   : > { %v1716_v62 = vpop.permute.xlu1 %1715 }
 0x29b   : > { %v1820_v55 = vmul.f32 %v5175_v30, %v1748_v0  ;;  %v1749_v9 = vmul.f32 %v5933_v63, %v1716_v62  ;;  %3632 = vmatprep.subr.bf16.mxu1 %v2110_v14  ;;  %v1692_v50 = vadd.f32 %v1680_v24, %v1551_v52 }
 0x29c   : > { %3633 = vmatpush3.bf16.msra.mxu1 %v2110_v14 }
 0x29d   : > { %v1821_v16 = vmul.f32 %v5181_v21, %v1749_v9  ;;  %v1832_v38 = vadd.f32 %v1820_v55, %v1691_v54  ;;  %v1986_v21 = vpop.permute.xlu0 %1985  ;;  %v2207_v9 = vld [vmem:[#allocation5] sm:$0xff] }
 0x29e   : > { %v1991_v35 = vpop.permute.xlu1 %1990 }
 0x29f   : > { %v1833_v27 = vadd.f32 %v1821_v16, %v1692_v50 }
 0x2a1   : > { %v2111_v15 = vpack.c.bf16 %v1833_v27, %v1832_v38  ;;  %v1996_v44 = vpop.permute.xlu0 %1995  ;;  %v2210_v38 = vld [vmem:[#allocation5 + $0x18] sm:$0xff] }
 0x2a2   : > { %v2001_v53 = vpop.permute.xlu1 %2000 }
 0x2a3   : > { %3634 = vmatprep.subr.bf16.mxu1 %v2111_v15 }
 0x2a4   : > { %3635 = vmatpush3.bf16.msra.mxu1 %v2111_v15 }
 0x2a5   : > { %v2125_v24 = vpop.permute.xlu0 %2124 }
 0x2a6   : > { %v2130_v0 = vpop.permute.xlu1 %2129 }
 0x2a7   : > { %3637 = vmatmul.mubr.msk.bf16.vlgmr.msra.gmra.mrb[8].mxu1 %vm523_vm0, %v3774_v8 }
 0x2a9   : > { %v2135_v14 = vpop.permute.xlu0 %2134 }
 0x2aa   : > { %v2140_v54 = vpop.permute.xlu1 %2139 }
 0x2cd   : > { %v5227_v30 = vpop.f32.mrb[0].mxu1 }
 0x2ce   : > { %v5229_v25 = vpop.f32.mrb[1].mxu1 }
 0x2cf   : > { %v5231_v19 = vpop.f32.mrb[2].mxu1 }
 0x2d0   : > { %v5233_v47 = vpop.f32.mrb[3].mxu1 }
 0x322   : > { %v3630_v63 = vpop.f32.mrb[4].mxu1 }
 0x323   : > { %v2062_v23 = vadd.f32 %v3630_v63, %v1996_v44  ;;  %v2053_v20 = vpop.f32.mrb[5].mxu1 }
 0x324   : > { %v2054_v58 = vadd.f32 %v2053_v20, %v1986_v21  ;;  %v3631_v2 = vpop.f32.mrb[6].mxu1  ;;  %v2208_v21 = vld [vmem:[#allocation5 + $0x8] sm:$0xff] }
 0x325   : > { %v2074_v48 = vsub.f32 %v2062_v23, %v2070_v60  ;;  %v2065_v10 = vadd.f32 %v3631_v2, %v2001_v53  ;;  %v2056_v7 = vpop.f32.mrb[7].mxu1 }
 0x326   : > { %v2072_v45 = vsub.f32 %v2054_v58, %v2068_v41  ;;  %v2057_v39 = vadd.f32 %v2056_v7, %v1991_v35 }
 0x327   : > { %v2078_v51 = vmul.f32 0.5, %v2074_v48  ;;  %v2075_v3 = vsub.f32 %v2065_v10, %v2071_v22 }
 0x328   : > { %v2076_v13 = vmul.f32 0.5, %v2072_v45  ;;  %v2073_v37 = vsub.f32 %v2057_v39, %v2069_v36 }
 0x329   : > { %v2082_v6 = vadd.f32 %v2078_v51, %v2070_v60  ;;  %v2079_v49 = vmul.f32 0.5, %v2075_v3 }
 0x32a   : > { %v2080_v29 = vadd.f32 %v2076_v13, %v2068_v41  ;;  %v2077_v34 = vmul.f32 0.5, %v2073_v37 }
 0x32b   : > { %vm2086_vm7 = vcmp.ge.f32.partialorder %v2082_v6, 1.0  ;;  %v2083_v32 = vadd.f32 %v2079_v49, %v2071_v22 }
 0x32c   : > { %v3456_v5 = vsel %vm2086_vm7, 1.0, %v5944_v31  ;;  %vm2084_vm8 = vcmp.ge.f32.partialorder %v2080_v29, 1.0  ;;  %v2081_v18 = vadd.f32 %v2077_v34, %v2069_v36  ;;  %vm2538_vm7 = vcmask 1048064  }
 0x32d   : > { %v2098_v40 = vsub.f32 1.0, %v3456_v5  ;;  %v3454_v26 = vsel %vm2084_vm8, 1.0, %v5944_v31  ;;  %vm2087_vm9 = vcmp.ge.f32.partialorder %v2083_v32, 1.0 }
 0x32e   : > { %v2096_v56 = vsub.f32 1.0, %v3454_v26  ;;  %v3457_v43 = vsel %vm2087_vm9, 1.0, %v5944_v31  ;;  %vm2085_vm10 = vcmp.ge.f32.partialorder %v2081_v18, 1.0 }
 0x32f   : > { %v2102_v42 = vmul.f32 %v2098_v40, %v2082_v6  ;;  %v2099_v28 = vsub.f32 1.0, %v3457_v43  ;;  %v3455_v17 = vsel %vm2085_vm10, 1.0, %v5944_v31  ;;  %v2109_v33 = vpack.c.bf16 %v3457_v43, %v3456_v5  ;;  %v1841_v5 = vld [vmem:[%s5891_s4 + $0x8] sm:$0xff]  ;;  %v1843_v40 = vld [vmem:[%s5891_s4 + $0x18] sm:$0xff] }
 0x330   : > { %v2100_v61 = vmul.f32 %v2096_v56, %v2080_v29  ;;  %v2097_v11 = vsub.f32 1.0, %v3455_v17  ;;  %v2108_v46 = vpack.c.bf16 %v3455_v17, %v3454_v26  ;;  %v1842_v26 = vld [vmem:[%s5891_s4 + $0x10] sm:$0xff] }
 0x331   : > { %2106 = vst [vmem:[#allocation4 + $0x10] sm:$0xff] %v2102_v42  ;;  %v2103_v57 = vmul.f32 %v2099_v28, %v2083_v32  ;;  %2390 = vrot.lane.b32.xlu1 %v2109_v33, %s5781_s30  ;;  %v2264_v12 = vsel %vm2253_vm11, %v2109_v33, 0 }
 0x332   : > { %2104 = vst [vmem:[#allocation4] sm:$0xff] %v2100_v61  ;;  %v2101_v1 = vmul.f32 %v2097_v11, %v2081_v18  ;;  %2388 = vrot.lane.b32.xlu0 %v2108_v46, %s5781_s30  ;;  %3688 = vmatprep.subr.msk.bf16.mxu0 %vm2253_vm11, %v2108_v46  ;;  %v2261_v59 = vsel %vm2253_vm11, %v2108_v46, 0  ;;  %v1840_v18 = vld [vmem:[%s5891_s4] sm:$0xff]  ;;  %v1930_v61 = vld [vmem:[#allocation3 + $0x8] sm:$0xff] }
 0x333   : > { %2107 = vst [vmem:[#allocation4 + $0x18] sm:$0xff] %v2103_v57  ;;  %3641 = vmatpush3.bf16.xpose.msra.mxu0 %v2261_v59  ;;  %v1929_v57 = vld [vmem:[#allocation3] sm:$0xff] }
 0x334   : > { %2105 = vst [vmem:[#allocation4 + $0x8] sm:$0xff] %v2101_v1  ;;  %3689 = vmatprep.subr.msk.bf16.mxu0 %vm2253_vm11, %v2109_v33 }
 0x33b   : > { %3643 = vmatpush3.bf16.xpose.msra.mxu0 %v2264_v12 }
 0x37a   : > { %v3638_v62 = vpop.f32.mrb[8].mxu1 }
 0x37b   : > { %v2201_v52 = vadd.f32 %v3638_v62, %v2135_v14  ;;  %v2192_v55 = vpop.f32.mrb[9].mxu1 }
 0x37c   : > { %v2193_v50 = vadd.f32 %v2192_v55, %v2125_v24  ;;  %v3639_v16 = vpop.f32.mrb[10].mxu1 }
 0x37d   : > { %v2213_v27 = vsub.f32 %v2201_v52, %v2209_v4  ;;  %v2204_v15 = vadd.f32 %v3639_v16, %v2140_v54  ;;  %v2195_v8 = vpop.f32.mrb[11].mxu1  ;;  %v1931_v52 = vld [vmem:[#allocation3 + $0x10] sm:$0xff] }
 0x37e   : > { %v2211_v35 = vsub.f32 %v2193_v50, %v2207_v9  ;;  %v2196_v44 = vadd.f32 %v2195_v8, %v2130_v0  ;;  %v1932_v0 = vld [vmem:[#allocation3 + $0x18] sm:$0xff] }
 0x37f   : > { %v2217_v63 = vmul.f32 0.5, %v2213_v27  ;;  %v2214_v60 = vsub.f32 %v2204_v15, %v2210_v38 }
 0x380   : > { %v2215_v23 = vmul.f32 0.5, %v2211_v35  ;;  %v2212_v20 = vsub.f32 %v2196_v44, %v2208_v21 }
 0x381   : > { %v2221_v41 = vadd.f32 %v2217_v63, %v2209_v4  ;;  %v2218_v53 = vmul.f32 0.5, %v2214_v60  ;;  %v5945_v60 = vmov 1.0|1.0  }
 0x382   : > { %v2219_v58 = vadd.f32 %v2215_v23, %v2207_v9  ;;  %v2216_v2 = vmul.f32 0.5, %v2212_v20 }
 0x383   : > { %vm2225_vm12 = vcmp.ge.f32.partialorder %v2221_v41, 1.0  ;;  %v2222_v22 = vadd.f32 %v2218_v53, %v2210_v38 }
 0x384   : > { %v3472_v48 = vsel %vm2225_vm12, 1.0, %v5944_v31  ;;  %vm2223_vm13 = vcmp.ge.f32.partialorder %v2219_v58, 1.0  ;;  %v2220_v10 = vadd.f32 %v2216_v2, %v2208_v21 }
 0x385   : > { %v2237_v7 = vsub.f32 1.0, %v3472_v48  ;;  %v3470_v36 = vsel %vm2223_vm13, 1.0, %v5944_v31  ;;  %vm2226_vm14 = vcmp.ge.f32.partialorder %v2222_v22, 1.0 }
 0x386   : > { %v2235_v45 = vsub.f32 1.0, %v3470_v36  ;;  %v3473_v39 = vsel %vm2226_vm14, 1.0, %v5944_v31  ;;  %vm2224_vm15 = vcmp.ge.f32.partialorder %v2220_v10, 1.0 }
 0x387   : > { %v2241_v51 = vmul.f32 %v2237_v7, %v2221_v41  ;;  %v2238_v3 = vsub.f32 1.0, %v3473_v39  ;;  %v3471_v13 = vsel %vm2224_vm15, 1.0, %v5944_v31  ;;  %v2248_v37 = vpack.c.bf16 %v3473_v39, %v3472_v48 }
 0x388   : > { %v2239_v6 = vmul.f32 %v2235_v45, %v2219_v58  ;;  %v2236_v49 = vsub.f32 1.0, %v3471_v13  ;;  %v2247_v29 = vpack.c.bf16 %v3471_v13, %v3470_v36  ;;  %v2252_v36 = vld [vmem:[%s5947_s10 + $0x18] sm:$0xff]  ;;  %v2249_v45 = vld [vmem:[%s5947_s10] sm:$0xff] }
 0x389   : > { %2245 = vst [vmem:[#allocation5 + $0x10] sm:$0xff] %v2241_v51  ;;  %v2242_v34 = vmul.f32 %v2238_v3, %v2222_v22  ;;  %2384 = vrot.lane.b32.xlu1 %v2248_v37, %s5781_s30  ;;  %v2250_v51 = vld [vmem:[%s5947_s10 + $0x8] sm:$0xff] }
 0x38a   : > { %2243 = vst [vmem:[#allocation5] sm:$0xff] %v2239_v6  ;;  %v2240_v32 = vmul.f32 %v2236_v49, %v2220_v10  ;;  %2382 = vrot.lane.b32.xlu0 %v2247_v29, %s5781_s30  ;;  %3644 = vmatprep.mubr.msk.bf16.mxu0 %vm2253_vm11, %v2247_v29  ;;  %v2251_v10 = vld [vmem:[%s5947_s10 + $0x10] sm:$0xff] }
 0x38b   : > { %2246 = vst [vmem:[#allocation5 + $0x18] sm:$0xff] %v2242_v34  ;;  %3645 = vmatmul.mubr.msk.bf16.vlgmr.msra.gmra.mrb[12].mxu0 %vm2253_vm11, %v2248_v37 }
 0x38c   : > { %2244 = vst [vmem:[#allocation5 + $0x8] sm:$0xff] %v2240_v32 }
 0x38d   : > { %1851 = vperm.xlu1 %3762, %v1841_v5  }
 0x38e   : > { %1846 = vperm.xlu0 %3761, %v1840_v18  }
 0x391   : > { %1861 = vperm.xlu1 %3762, %v1843_v40  }
 0x392   : > { %1856 = vperm.xlu0 %3761, %v1842_v26  }
 0x3a3   : > { %v2391_v42 = vpop.permute.xlu1 %2390 }
 0x3a4   : > { %v2389_v56 = vpop.permute.xlu0 %2388  ;;  %v2402_v28 = vsel %vm2253_vm11, %v2391_v42, 0 }
 0x3a5   : > { %v2399_v43 = vsel %vm2253_vm11, %v2389_v56, 0  ;;  %3690 = vmatprep.subr.msk.bf16.mxu0 %vm2253_vm11, %v2389_v56 }
 0x3a6   : > { %3657 = vmatpush3.bf16.xpose.msra.mxu0 %v2399_v43 }
 0x3a7   : > { %3691 = vmatprep.subr.msk.bf16.mxu0 %vm2253_vm11, %v2391_v42 }
 0x3ae   : > { %3659 = vmatpush3.bf16.xpose.msra.mxu0 %v2402_v28 }
 0x3fb   : > { %v2385_v33 = vpop.permute.xlu1 %2384 }
 0x3fc   : > { %v2383_v17 = vpop.permute.xlu0 %2382 }
 0x3fd   : > { %3660 = vmatprep.mubr.msk.bf16.mxu0 %vm2253_vm11, %v2383_v17 }
 0x3fe   : > { %3661 = vmatmul.mubr.msk.bf16.vlgmr.msra.gmra.mrb[16].mxu0 %vm2253_vm11, %v2385_v33 }
 0x40c   : > { %v1852_v11 = vpop.permute.xlu1 %1851 }
 0x40d   : > { %v1918_v46 = vadd.f32 %v5233_v47, %v1852_v11  ;;  %v1847_v1 = vpop.permute.xlu0 %1846 }
 0x40e   : > { %v1915_v59 = vadd.f32 %v5229_v25, %v1847_v1 }
 0x40f   : > { %v1934_v12 = vsub.f32 %v1918_v46, %v1930_v61 }
 0x410   : > { %v1933_v24 = vsub.f32 %v1915_v59, %v1929_v57  ;;  %v1862_v14 = vpop.permute.xlu1 %1861 }
 0x411   : > { %v1938_v62 = vmul.f32 0.5, %v1934_v12  ;;  %v1926_v4 = vadd.f32 %v5231_v19, %v1862_v14  ;;  %v1857_v55 = vpop.permute.xlu0 %1856 }
 0x412   : > { %v1937_v9 = vmul.f32 0.5, %v1933_v24  ;;  %v1923_v54 = vadd.f32 %v5227_v30, %v1857_v55  ;;  %v3775_v55 = vld [vmem:[%s5746_s5] sm:$0xff]  }
 0x413   : > { %v1942_v50 = vadd.f32 %v1938_v62, %v1930_v61  ;;  %v1936_v16 = vsub.f32 %v1926_v4, %v1932_v0  ;;  %v3498_v62 = vld [vmem:[%s5748_s7 + $0x80] sm:$0xff]  ;;  %v3499_v4 = vld [vmem:[%s5748_s7 + $0x88] sm:$0xff] }
 0x414   : > { %v1941_v38 = vadd.f32 %v1937_v9, %v1929_v57  ;;  %v1935_v47 = vsub.f32 %v1923_v54, %v1931_v52  ;;  %v2696_v9 = vld [vmem:[%s5748_s7 + $0x8] sm:$0xff]  ;;  %v3503_v54 = vld [vmem:[%s5748_s7 + $0x20] sm:$0xff] }
 0x415   : > { %v1940_v27 = vmul.f32 0.5, %v1936_v16  ;;  %vm1946_vm1 = vcmp.ge.f32.partialorder %v1942_v50, 1.0  ;;  %v3500_v16 = vld [vmem:[%s5748_s7 + $0x90] sm:$0xff] }
 0x416   : > { %v1939_v15 = vmul.f32 0.5, %v1935_v47  ;;  %vm1945_vm2 = vcmp.ge.f32.partialorder %v1941_v38, 1.0  ;;  %v3439_v25 = vsel %vm1946_vm1, 1.0, %v5944_v31  ;;  %v2697_v47 = vld [vmem:[%s5748_s7 + $0x10] sm:$0xff] }
 0x417   : > { %v1944_v8 = vadd.f32 %v1940_v27, %v1932_v0  ;;  %v3438_v21 = vsel %vm1945_vm2, 1.0, %v5944_v31  ;;  %v1958_v35 = vsub.f32 1.0, %v3439_v25  ;;  %vm3476_vm3 = vmpackc.low %vm1946_vm1, %vm1945_vm2  ;;  %v2698_v27 = vld [vmem:[%s5748_s7 + $0x18] sm:$0xff] }
 0x418   : > { %v1943_v19 = vadd.f32 %v1939_v15, %v1931_v52  ;;  %v1957_v44 = vsub.f32 1.0, %v3438_v21  ;;  %v1969_v63 = vpack.c.bf16 %v3439_v25, %v3438_v21  ;;  %3648 = vmatprep.subr.msk.bf16.mxu1 %vm3476_vm3, %v5945_v60  ;;  %v2695_v52 = vld [vmem:[%s5748_s7] sm:$0xff]  ;;  %v3510_v25 = vld [vmem:[%s5748_s7 + $0x48] sm:$0xff]  ;;  %v3506_v21 = vld [vmem:[%s5748_s7 + $0x38] sm:$0xff] }
 0x419   : > { %v1962_v30 = vmul.f32 %v1958_v35, %v1942_v50  ;;  %3649 = vmatpush3.bf16.msk.msra.mxu1 %vm3476_vm3, %v5945_v60  ;;  %vm1948_vm4 = vcmp.ge.f32.partialorder %v1944_v8, 1.0  ;;  %v3504_v50 = vld [vmem:[%s5748_s7 + $0x28] sm:$0xff]  ;;  %v3509_v15 = vld [vmem:[%s5748_s7 + $0x40] sm:$0xff] }
 0x41a   : > { %v1961_v23 = vmul.f32 %v1957_v44, %v1941_v38  ;;  %2461 = vrot.lane.b32.xlu0 %v1969_v63, %s5946_s2  ;;  %vm1947_vm5 = vcmp.ge.f32.partialorder %v1943_v19, 1.0  ;;  %v3441_v20 = vsel %vm1948_vm4, 1.0, %v5944_v31  ;;  %v3501_v38 = vld [vmem:[%s5748_s7 + $0x98] sm:$0xff]  ;;  %v3515_v35 = vld [vmem:[%s5748_s7 + $0x60] sm:$0xff]  ;;  %v3511_v44 = vld [vmem:[%s5748_s7 + $0x50] sm:$0xff] }
 0x41b   : > { %1966 = vst [vmem:[#allocation3 + $0x8] sm:$0xff] %v1962_v30  ;;  %v3440_v41 = vsel %vm1947_vm5, 1.0, %v5944_v31  ;;  %v1960_v53 = vsub.f32 1.0, %v3441_v20  ;;  %vm3478_vm6 = vmpackc.low %vm1948_vm4, %vm1947_vm5  ;;  %v3512_v63 = vld [vmem:[%s5748_s7 + $0x58] sm:$0xff]  ;;  %v3521_v30 = vld [vmem:[%s5748_s7 + $0xa0] sm:$0xff] }
 0x41c   : > { %1965 = vst [vmem:[#allocation3] sm:$0xff] %v1961_v23  ;;  %v1959_v58 = vsub.f32 1.0, %v3440_v41  ;;  %v1970_v2 = vpack.c.bf16 %v3441_v20, %v3440_v41  ;;  %3650 = vmatprep.subr.msk.bf16.mxu1 %vm3478_vm6, %v5945_v60  ;;  %v3522_v23 = vld [vmem:[%s5748_s7 + $0xa8] sm:$0xff]  ;;  %v3517_v20 = vld [vmem:[%s5748_s7 + $0x70] sm:$0xff]  ;;  %v3518_v41 = vld [vmem:[%s5748_s7 + $0x78] sm:$0xff] }
 0x41d   : > { %v1964_v22 = vmul.f32 %v1960_v53, %v1944_v8  ;;  %3651 = vmatpush3.bf16.msk.msra.mxu1 %vm3478_vm6, %v5945_v60  ;;  %v3505_v8 = vld [vmem:[%s5748_s7 + $0x30] sm:$0xff]  ;;  %v3527_v53 = vld [vmem:[%s5748_s7 + $0xc0] sm:$0xff] }
 0x41e   : > { %v1963_v48 = vmul.f32 %v1959_v58, %v1943_v19  ;;  %2463 = vrot.lane.b32.xlu1 %v1970_v2, %s5946_s2  ;;  %v3516_v19 = vld [vmem:[%s5748_s7 + $0x68] sm:$0xff]  ;;  %v3523_v2 = vld [vmem:[%s5748_s7 + $0xb0] sm:$0xff] }
 0x41f   : > { %1968 = vst [vmem:[#allocation3 + $0x18] sm:$0xff] %v1964_v22  ;;  %v3528_v58 = vld [vmem:[%s5748_s7 + $0xc8] sm:$0xff]  ;;  %v3524_v22 = vld [vmem:[%s5748_s7 + $0xb8] sm:$0xff] }
 0x420   : > { %1967 = vst [vmem:[#allocation3 + $0x10] sm:$0xff] %v1963_v48  ;;  %v3533_v48 = vld [vmem:[%s5748_s7 + $0xe0] sm:$0xff] }
 0x45e   : > { %v3646_v7 = vpop.f32.mrb[12].mxu0 }
 0x45f   : > { %v2300_v39 = vpop.f32.mrb[13].mxu0  ;;  %v2317_v13 = vmul.f32 %v3646_v7, %v2251_v10  ;;  %v3529_v7 = vld [vmem:[%s5748_s7 + $0xd0] sm:$0xff] }
 0x460   : > { %v3647_v3 = vpop.f32.mrb[14].mxu0  ;;  %v2315_v49 = vmul.f32 %v2300_v39, %v2249_v45  ;;  %v3540_v39 = vld [vmem:[%s5748_s7 + $0x108] sm:$0xff] }
 0x461   : > { %v2318_v37 = vmul.f32 %v3647_v3, %v2252_v36  ;;  %v2303_v6 = vpop.f32.mrb[15].mxu0  ;;  %v3536_v3 = vld [vmem:[%s5748_s7 + $0xf8] sm:$0xff] }
 0x462   : > { %v2316_v29 = vmul.f32 %v2303_v6, %v2250_v51 }
 0x463   : > { %v2320_v34 = vpack.c.bf16 %v2318_v37, %v2317_v13  ;;  %v3541_v13 = vld [vmem:[%s5748_s7 + $0x110] sm:$0xff]  ;;  %v3542_v37 = vld [vmem:[%s5748_s7 + $0x118] sm:$0xff] }
 0x464   : > { %v2319_v32 = vpack.c.bf16 %v2316_v29, %v2315_v49 }
 0x466   : > { %3652 = vmatprep.mubr.msk.bf16.mxu1 %vm523_vm0, %v2319_v32  ;;  %v2547_v32 = vld [vmem:[#allocation6] sm:$0xff] }
 0x467   : > { %3653 = vmatmul.mubr.msk.bf16.vlgmr.msra.gmra.mrb[12].mxu1 %vm523_vm0, %v2320_v34 }
 0x48c   : > { %v2462_v5 = vpop.permute.xlu0 %2461 }
 0x48d   : > { %3664 = vmatprep.subr.bf16.mxu1 %v2462_v5 }
 0x48e   : > { %3665 = vmatpush3.bf16.msra.mxu1 %v2462_v5 }
 0x490   : > { %v2464_v18 = vpop.permute.xlu1 %2463 }
 0x491   : > { %3666 = vmatprep.subr.bf16.mxu1 %v2464_v18 }
 0x492   : > { %3667 = vmatpush3.bf16.msra.mxu1 %v2464_v18  ;;  %v2548_v18 = vld [vmem:[#allocation6 + $0x8] sm:$0xff] }
 0x4d1   : > { %v3662_v40 = vpop.f32.mrb[16].mxu0 }
 0x4d2   : > { %v2438_v26 = vpop.f32.mrb[17].mxu0  ;;  %v2455_v43 = vmul.f32 %v3662_v40, %v2251_v10  ;;  %v3534_v10 = vld [vmem:[%s5748_s7 + $0xe8] sm:$0xff] }
 0x4d3   : > { %v3663_v56 = vpop.f32.mrb[18].mxu0  ;;  %v2453_v17 = vmul.f32 %v2438_v26, %v2249_v45  ;;  %v3539_v45 = vld [vmem:[%s5748_s7 + $0x100] sm:$0xff] }
 0x4d4   : > { %v2456_v42 = vmul.f32 %v3663_v56, %v2252_v36  ;;  %v2441_v28 = vpop.f32.mrb[19].mxu0  ;;  %v3530_v36 = vld [vmem:[%s5748_s7 + $0xd8] sm:$0xff]  ;;  %v2549_v56 = vld [vmem:[#allocation6 + $0x10] sm:$0xff] }
 0x4d5   : > { %v2454_v33 = vmul.f32 %v2441_v28, %v2250_v51  ;;  %v3535_v51 = vld [vmem:[%s5748_s7 + $0xf0] sm:$0xff] }
 0x4d6   : > { %v2458_v61 = vpack.c.bf16 %v2456_v42, %v2455_v43 }
 0x4d7   : > { %v2457_v11 = vpack.c.bf16 %v2454_v33, %v2453_v17  ;;  %v2550_v17 = vld [vmem:[#allocation6 + $0x18] sm:$0xff] }
 0x4d9   : > { %3668 = vmatprep.mubr.msk.bf16.mxu1 %vm523_vm0, %v2457_v11 }
 0x4da   : > { %3669 = vmatmul.mubr.msk.bf16.vlgmr.msra.gmra.mrb[16].mxu1 %vm523_vm0, %v2458_v61 }
 0x4db   : > { %3676 = vmatprep.mubr.msk.bf16.mxu1 %vm523_vm0, %v3775_v55 }
 0x53a   : > { %v3654_v46 = vpop.f32.mrb[12].mxu1 }
 0x53b   : > { %2378 = vst.msk [vmem:[#allocation7 + $0x10] sm:$0xff] %vm2253_vm11, %v3654_v46  ;;  %v2361_v57 = vpop.f32.mrb[13].mxu1 }
 0x53c   : > { %2376 = vst.msk [vmem:[#allocation7] sm:$0xff] %vm2253_vm11, %v2361_v57  ;;  %v3655_v1 = vpop.f32.mrb[14].mxu1 }
 0x53d   : > { %2379 = vst.msk [vmem:[#allocation7 + $0x18] sm:$0xff] %vm2253_vm11, %v3655_v1  ;;  %v2364_v59 = vpop.f32.mrb[15].mxu1 }
 0x53e   : > { %2377 = vst.msk [vmem:[#allocation7 + $0x8] sm:$0xff] %vm2253_vm11, %v2364_v59 }
 0x5ad   : > { %v3670_v12 = vpop.f32.mrb[16].mxu1 }
 0x5ae   : > { %v2507_v24 = vpop.f32.mrb[17].mxu1 }
 0x5af   : > { %2526 = vrot.lane.b32.xlu0 %v2507_v24, %s5946_s2  ;;  %v3671_v0 = vpop.f32.mrb[18].mxu1 }
 0x5b0   : > { %v2510_v14 = vpop.f32.mrb[19].mxu1 }
 0x5b1   : > { %2528 = vrot.lane.b32.xlu1 %v2510_v14, %s5946_s2 }
 0x5b3   : > { %2530 = vrot.lane.b32.xlu0 %v3670_v12, %s5946_s2 }
 0x5b5   : > { %2532 = vrot.lane.b32.xlu1 %v3671_v0, %s5946_s2 }
 0x5b7   : > { %2665 = vperm.xlu0 %3761, %v3498_v62  }
 0x5b9   : > { %2670 = vperm.xlu1 %3762, %v3499_v4  }
 0x5bb   : > { %2712 = vperm.xlu0 %3761, %v2695_v52  }
 0x5bd   : > { %2717 = vperm.xlu1 %3762, %v2696_v9  }
 0x5bf   : > { %2764 = vperm.xlu0 %3761, %v3503_v54  }
 0x5c1   : > { %2769 = vperm.xlu1 %3762, %v3504_v50  }
 0x5c3   : > { %2675 = vperm.xlu0 %3761, %v3500_v16  }
 0x5c5   : > { %2680 = vperm.xlu1 %3762, %v3501_v38  }
 0x5c7   : > { %2722 = vperm.xlu0 %3761, %v2697_v47  }
 0x5c9   : > { %2727 = vperm.xlu1 %3762, %v2698_v27   ;;  %v3776_v27 = vld [vmem:[%s5746_s5 + $0x8] sm:$0xff]  }
 0x5cb   : > { %2816 = vperm.xlu0 %3761, %v3509_v15  }
 0x5cd   : > { %2821 = vperm.xlu1 %3762, %v3510_v25  }
 0x5cf   : > { %2774 = vperm.xlu0 %3761, %v3505_v8  }
 0x5d1   : > { %2779 = vperm.xlu1 %3762, %v3506_v21  }
 0x5d3   : > { %2868 = vperm.xlu0 %3761, %v3515_v35  }
 0x5d5   : > { %2873 = vperm.xlu1 %3762, %v3516_v19  }
 0x5d7   : > { %2826 = vperm.xlu0 %3761, %v3511_v44  }
 0x5d9   : > { %2831 = vperm.xlu1 %3762, %v3512_v63  }
 0x5db   : > { %2920 = vperm.xlu0 %3761, %v3521_v30  }
 0x5dd   : > { %2925 = vperm.xlu1 %3762, %v3522_v23  }
 0x5df   : > { %2878 = vperm.xlu0 %3761, %v3517_v20  }
 0x5e1   : > { %2883 = vperm.xlu1 %3762, %v3518_v41  }
 0x5e3   : > { %2972 = vperm.xlu0 %3761, %v3527_v53  }
 0x5e5   : > { %2977 = vperm.xlu1 %3762, %v3528_v58  }
 0x5e7   : > { %2930 = vperm.xlu0 %3761, %v3523_v2  }
 0x5e9   : > { %2935 = vperm.xlu1 %3762, %v3524_v22  }
 0x5eb   : > { %3024 = vperm.xlu0 %3761, %v3533_v48  }
 0x5ed   : > { %3029 = vperm.xlu1 %3762, %v3534_v10  }
 0x5ef   : > { %2982 = vperm.xlu0 %3761, %v3529_v7  }
 0x5f1   : > { %2987 = vperm.xlu1 %3762, %v3530_v36  }
 0x5f3   : > { %3076 = vperm.xlu0 %3761, %v3539_v45  }
 0x5f5   : > { %3081 = vperm.xlu1 %3762, %v3540_v39   ;;  %v3777_v39 = vld [vmem:[%s5747_s6] sm:$0xff]  }
 0x5f6   : > { %3684 = vmatprep.mubr.msk.bf16.mxu0 %vm523_vm0, %v3777_v39 }
 0x5f7   : > { %3034 = vperm.xlu0 %3761, %v3535_v51   ;;  %v3108_v51 = vld [vmem:[%s5749_s8] sm:$0xff] }
 0x5f9   : > { %3039 = vperm.xlu1 %3762, %v3536_v3  }
 0x5fb   : > { %3086 = vperm.xlu0 %3761, %v3541_v13   ;;  %v3109_v13 = vld [vmem:[%s5749_s8 + $0x8] sm:$0xff] }
 0x5fd   : > { %3091 = vperm.xlu1 %3762, %v3542_v37  }
 0x621   : > { %v2527_v6 = vpop.permute.xlu0 %2526 }
 0x622   : > { %2539 = vst.msk [vmem:[#allocation7] sm:$0xff] %vm2538_vm7, %v2527_v6  ;;  %v3110_v6 = vld [vmem:[%s5749_s8 + $0x10] sm:$0xff] }
 0x623   : > { %v2529_v49 = vpop.permute.xlu1 %2528 }
 0x624   : > { %2540 = vst.msk [vmem:[#allocation7 + $0x8] sm:$0xff] %vm2538_vm7, %v2529_v49  ;;  %v3111_v49 = vld [vmem:[%s5749_s8 + $0x18] sm:$0xff] }
 0x625   : > { %v2531_v29 = vpop.permute.xlu0 %2530 }
 0x626   : > { %2541 = vst.msk [vmem:[#allocation7 + $0x10] sm:$0xff] %vm2538_vm7, %v2531_v29 }
 0x627   : > { %v2533_v34 = vpop.permute.xlu1 %2532 }
 0x628   : > { %2542 = vst.msk [vmem:[#allocation7 + $0x18] sm:$0xff] %vm2538_vm7, %v2533_v34 }
 0x629   : > { %v2543_v5 = vld [vmem:[#allocation7] sm:$0xff] }
 0x62a   : > { %v2551_v40 = vsub.f32 %v2543_v5, %v2547_v32 }
 0x62b   : > { %v2544_v26 = vld [vmem:[#allocation7 + $0x8] sm:$0xff] }
 0x62c   : > { %v2552_v43 = vsub.f32 %v2544_v26, %v2548_v18  ;;  %v2555_v42 = vmul.f32 0.5, %v2551_v40 }
 0x62d   : > { %v2545_v28 = vld [vmem:[#allocation7 + $0x10] sm:$0xff] }
 0x62e   : > { %v2556_v33 = vmul.f32 0.5, %v2552_v43  ;;  %v2559_v61 = vadd.f32 %v2555_v42, %v2547_v32  ;;  %v2553_v11 = vsub.f32 %v2545_v28, %v2549_v56 }
 0x62f   : > { %v2546_v46 = vld [vmem:[#allocation7 + $0x18] sm:$0xff] }
 0x630   : > { %v2560_v57 = vadd.f32 %v2556_v33, %v2548_v18  ;;  %vm2563_vm8 = vcmp.ge.f32.partialorder %v2559_v61, 0.5  ;;  %v2554_v1 = vsub.f32 %v2546_v46, %v2550_v17  ;;  %v2557_v59 = vmul.f32 0.5, %v2553_v11 }
 0x631   : > { %v3486_v12 = vsel %vm2563_vm8, 1.0, %v5944_v31 }
 0x632   : > { %vm2564_vm9 = vcmp.ge.f32.partialorder %v2560_v57, 0.5  ;;  %v2575_v24 = vsub.f32 1.0, %v3486_v12  ;;  %v2558_v0 = vmul.f32 0.5, %v2554_v1  ;;  %v2561_v14 = vadd.f32 %v2557_v59, %v2549_v56 }
 0x633   : > { %v3487_v62 = vsel %vm2564_vm9, 1.0, %v5944_v31  ;;  %vm3492_vm10 = vmpackc.low %vm2564_vm9, %vm2563_vm8 }
 0x634   : > { %v2576_v4 = vsub.f32 1.0, %v3487_v62  ;;  %v2579_v52 = vmul.f32 %v2575_v24, %v2559_v61  ;;  %3672 = vmatprep.subr.msk.bf16.mxu1 %vm3492_vm10, %v5945_v60  ;;  %v2562_v55 = vadd.f32 %v2558_v0, %v2550_v17  ;;  %vm2565_vm11 = vcmp.ge.f32.partialorder %v2561_v14, 0.5 }
 0x635   : > { %3673 = vmatpush3.bf16.msk.msra.mxu1 %vm3492_vm10, %v5945_v60  ;;  %v3488_v9 = vsel %vm2565_vm11, 1.0, %v5944_v31 }
 0x636   : > { %v2580_v54 = vmul.f32 %v2576_v4, %v2560_v57  ;;  %2583 = vst [vmem:[#allocation6] sm:$0xff] %v2579_v52  ;;  %vm2566_vm12 = vcmp.ge.f32.partialorder %v2562_v55, 0.5  ;;  %v2577_v50 = vsub.f32 1.0, %v3488_v9 }
 0x637   : > { %v3489_v16 = vsel %vm2566_vm12, 1.0, %v5944_v31  ;;  %vm3494_vm13 = vmpackc.low %vm2566_vm12, %vm2565_vm11 }
 0x638   : > { %2584 = vst [vmem:[#allocation6 + $0x8] sm:$0xff] %v2580_v54  ;;  %v2578_v38 = vsub.f32 1.0, %v3489_v16  ;;  %v2581_v47 = vmul.f32 %v2577_v50, %v2561_v14  ;;  %3674 = vmatprep.subr.msk.bf16.mxu1 %vm3494_vm13, %v5945_v60  ;;  %v5453_v35 = vpop.permute.xlu1 %2670 }
 0x639   : > { %3675 = vmatpush3.bf16.msk.msra.mxu1 %vm3494_vm13, %v5945_v60  ;;  %v5449_v60 = vpop.permute.xlu0 %2665 }
 0x63a   : > { %v2582_v15 = vmul.f32 %v2578_v38, %v2562_v55  ;;  %2585 = vst [vmem:[#allocation6 + $0x10] sm:$0xff] %v2581_v47  ;;  %v3502_v47 = vld [vmem:[%s5750_s9] ss:$0 sm:$0xff] }
 0x63c   : > { %2586 = vst [vmem:[#allocation6 + $0x18] sm:$0xff] %v2582_v15  ;;  %3677 = vmatmul.mubr.msk.bf16.vlgmr.msra.gmra.mrb[20].mxu1 %vm523_vm0, %v3776_v27  ;;  %v5463_v44 = vpop.permute.xlu1 %2717  ;;  %v3508_v15 = vld [vmem:[%s5750_s9 + $0x1] ss:$0 sm:$0xff] }
 0x63d   : > { %v5459_v19 = vpop.permute.xlu0 %2712 }
 0x640   : > { %v5473_v30 = vpop.permute.xlu1 %2769 }
 0x641   : > { %v5469_v63 = vpop.permute.xlu0 %2764 }
 0x644   : > { %v5483_v20 = vpop.permute.xlu1 %2680 }
 0x645   : > { %v5479_v23 = vpop.permute.xlu0 %2675 }
 0x648   : > { %v5493_v53 = vpop.permute.xlu1 %2727 }
 0x649   : > { %v5489_v41 = vpop.permute.xlu0 %2722 }
 0x64c   : > { %v5503_v2 = vpop.permute.xlu1 %2821 }
 0x64d   : > { %v5499_v58 = vpop.permute.xlu0 %2816 }
 0x650   : > { %v5513_v48 = vpop.permute.xlu1 %2779 }
 0x651   : > { %v5509_v22 = vpop.permute.xlu0 %2774 }
 0x654   : > { %v5523_v7 = vpop.permute.xlu1 %2873 }
 0x655   : > { %v5519_v10 = vpop.permute.xlu0 %2868 }
 0x658   : > { %v5533_v45 = vpop.permute.xlu1 %2831 }
 0x659   : > { %v5529_v36 = vpop.permute.xlu0 %2826 }
 0x65c   : > { %v5553_v37 = vpop.permute.xlu1 %2925 }
 0x65d   : > { %v5546_v3 = vpop.permute.xlu0 %2920 }
 0x660   : > { %v5563_v34 = vpop.permute.xlu1 %2883 }
 0x661   : > { %v5561_v29 = vpop.permute.xlu0 %2878 }
 0x664   : > { %v5567_v5 = vpop.permute.xlu1 %2977 }
 0x665   : > { %v5565_v32 = vpop.permute.xlu0 %2972 }
 0x668   : > { %v5571_v40 = vpop.permute.xlu1 %2935 }
 0x669   : > { %v5569_v18 = vpop.permute.xlu0 %2930  ;;  %5948 = vst [vmem:[#allocation45_spill] sm:$0xff] %v5571_v40 }
 0x66c   : > { %v5575_v56 = vpop.permute.xlu1 %3029 }
 0x66d   : > { %v5573_v26 = vpop.permute.xlu0 %3024  ;;  %5950 = vst [vmem:[#allocation51_spill] sm:$0xff] %v5575_v56 }
 0x66e   : > { %5949 = vst [vmem:[#allocation46_spill] sm:$0xff] %v5573_v26 }
 0x670   : > { %v5579_v42 = vpop.permute.xlu1 %2987 }
 0x671   : > { %v5577_v43 = vpop.permute.xlu0 %2982  ;;  %5952 = vst [vmem:[#allocation18_spill] sm:$0xff] %v5579_v42 }
 0x672   : > { %5951 = vst [vmem:[#allocation52_spill] sm:$0xff] %v5577_v43 }
 0x674   : > { %v5583_v17 = vpop.permute.xlu1 %3081 }
 0x675   : > { %v5581_v28 = vpop.permute.xlu0 %3076  ;;  %5954 = vst [vmem:[#allocation32_spill] sm:$0xff] %v5583_v17 }
 0x676   : > { %5953 = vst [vmem:[#allocation19_spill] sm:$0xff] %v5581_v28 }
 0x678   : > { %v5587_v61 = vpop.permute.xlu1 %3039 }
 0x679   : > { %v5585_v33 = vpop.permute.xlu0 %3034  ;;  %5956 = vst [vmem:[#allocation21_spill] sm:$0xff] %v5587_v61 }
 0x67a   : > { %5955 = vst [vmem:[#allocation16_spill] sm:$0xff] %v5585_v33  ;;  %v3520_v33 = vld [vmem:[%s5750_s9 + $0x3] ss:$0 sm:$0xff] }
 0x67c   : > { %v5591_v46 = vpop.permute.xlu1 %3091 }
 0x67d   : > { %v5589_v11 = vpop.permute.xlu0 %3086  ;;  %5958 = vst [vmem:[#allocation17_spill] sm:$0xff] %v5591_v46 }
 0x67e   : > { %5957 = vst [vmem:[#allocation34_spill] sm:$0xff] %v5589_v11 }
 0x70f   : > { %v5433_v25 = vpop.f32.mrb[20].mxu1 }
 0x710   : > { %2691 = vrot.lane.b32.xlu0 %v5433_v25, %s5855_s13  ;;  %v5437_v31 = vpop.f32.mrb[21].mxu1  ;;  %v2685_v26 = vmul.f32 %v5433_v25, %v5479_v23 }
 0x711   : > { %v5439_v8 = vpop.f32.mrb[22].mxu1 }
 0x712   : > { %2693 = vrot.lane.b32.xlu1 %v5439_v8, %s5855_s13  ;;  %v5443_v21 = vpop.f32.mrb[23].mxu1 }
 0x714   : > { %2742 = vrot.lane.b32.xlu0 %v5433_v25, %s5858_s23 }
 0x716   : > { %2744 = vrot.lane.b32.xlu1 %v5439_v8, %s5858_s23 }
 0x718   : > { %2794 = vrot.lane.b32.xlu0 %v5433_v25, %s5861_s15 }
 0x71a   : > { %2796 = vrot.lane.b32.xlu1 %v5439_v8, %s5861_s15 }
 0x71c   : > { %2846 = vrot.lane.b32.xlu0 %v5433_v25, %s5862_s1 }
 0x71e   : > { %2848 = vrot.lane.b32.xlu1 %v5439_v8, %s5862_s1 }
 0x720   : > { %2898 = vrot.lane.b32.xlu0 %v5433_v25, %s5873_s12 }
 0x722   : > { %2900 = vrot.lane.b32.xlu1 %v5439_v8, %s5873_s12 }
 0x724   : > { %2950 = vrot.lane.b32.xlu0 %v5433_v25, %s5852_s26 }
 0x726   : > { %2952 = vrot.lane.b32.xlu1 %v5439_v8, %s5852_s26 }
 0x728   : > { %3002 = vrot.lane.b32.xlu0 %v5433_v25, %s5857_s25 }
 0x72a   : > { %3004 = vrot.lane.b32.xlu1 %v5439_v8, %s5857_s25 }
 0x72c   : > { %2687 = vrot.lane.b32.xlu0 %v5437_v31, %s5855_s13 }
 0x72e   : > { %2689 = vrot.lane.b32.xlu1 %v5443_v21, %s5855_s13  ;;  %s3783_s13 = sshll.u32 %s3872_s21, 4  ;;  %s3784_s13 = int_to_ptr.vmem [resolvable:$false] %s3783_s13 }
 0x72f   : > { %p3786_p2 = scmp.lt.s32.totalorder %s5688_s24, %s3784_s13 }
 0x730   : > { %2738 = vrot.lane.b32.xlu0 %v5437_v31, %s5858_s23 }
 0x732   : > { %2740 = vrot.lane.b32.xlu1 %v5443_v21, %s5858_s23 }
 0x734   : > { %2790 = vrot.lane.b32.xlu0 %v5437_v31, %s5861_s15 }
 0x736   : > { %2792 = vrot.lane.b32.xlu1 %v5443_v21, %s5861_s15 }
 0x738   : > { %2842 = vrot.lane.b32.xlu0 %v5437_v31, %s5862_s1 }
 0x73a   : > { %2844 = vrot.lane.b32.xlu1 %v5443_v21, %s5862_s1 }
 0x73c   : > { %2894 = vrot.lane.b32.xlu0 %v5437_v31, %s5873_s12 }
 0x73e   : > { %2896 = vrot.lane.b32.xlu1 %v5443_v21, %s5873_s12 }
 0x740   : > { %2946 = vrot.lane.b32.xlu0 %v5437_v31, %s5852_s26 }
 0x742   : > { %2948 = vrot.lane.b32.xlu1 %v5443_v21, %s5852_s26  ;;  %s3785_s26 = scalar_lea.vmem %s3784_s13, 1024 }
 0x743   : > { %p3787_p3 = scmp.lt.s32.totalorder %s3785_s26, %s3779_s19 }
 0x744   : > { %2998 = vrot.lane.b32.xlu0 %v5437_v31, %s5857_s25 }
 0x745   : > { %p3788_p5 = por %p3787_p3, %p3786_p2 }
 0x746   : > { %3000 = vrot.lane.b32.xlu1 %v5443_v21, %s5857_s25 }
 0x747   : > { %p3789_p6 = pnand %p3788_p5, %p3782_p1 }
 0x748   : > { %3050 = vrot.lane.b32.xlu0 %v5437_v31, %s5860_s16 }
 0x74a   : > { %3052 = vrot.lane.b32.xlu1 %v5443_v21, %s5860_s16 }
 0x74c   : > { %3054 = vrot.lane.b32.xlu0 %v5433_v25, %s5860_s16 }
 0x74e   : > { %3056 = vrot.lane.b32.xlu1 %v5439_v8, %s5860_s16  ;;  %s3555_s16 = sshll.u32 %s3849_s20, 9  ;;  %s5972_s20 = sand.u32 1, %s3841_s18  }
 0x74f   : > { %s5685_s29 = scalar_lea.hbm %s5752_s11, %s3555_s16  ;;  %s5694_s0 = scalar_lea.sflag [#allocation9], %s5972_s20 }
 0x750   : > { %3114 = vperm.xlu0 %3761, %v3108_v51  }
 0x752   : > { %3119 = vperm.xlu1 %3762, %v3109_v13  }
 0x754   : > { %3124 = vperm.xlu0 %3761, %v3110_v6   ;;  %v3514_v6 = vld [vmem:[%s5750_s9 + $0x2] ss:$0 sm:$0xff] }
 0x756   : > { %3129 = vperm.xlu1 %3762, %v3111_v49  }
 0x782   : > { %v2692_v57 = vpop.permute.xlu0 %2691 }
 0x783   : > { %v2708_v51 = vmul.f32 %v3502_v47, %v2692_v57 }
 0x784   : > { %v2694_v1 = vpop.permute.xlu1 %2693 }
 0x785   : > { %v2709_v13 = vmul.f32 %v3502_v47, %v2694_v1  ;;  %v2732_v61 = vmul.f32 %v5489_v41, %v2708_v51 }
 0x786   : > { %v2743_v59 = vpop.permute.xlu0 %2742 }
 0x787   : > { %v2760_v46 = vmul.f32 %v3508_v15, %v2743_v59  ;;  %v2733_v42 = vmul.f32 %v5493_v53, %v2709_v13  ;;  %v2736_v40 = vadd.f32 %v2732_v61, %v2685_v26 }
 0x788   : > { %v2745_v12 = vpop.permute.xlu1 %2744 }
 0x789   : > { %v2761_v11 = vmul.f32 %v3508_v15, %v2745_v12  ;;  %v2686_v12 = vmul.f32 %v5439_v8, %v5483_v20  ;;  %v2683_v8 = vmul.f32 %v5449_v60, %v5437_v31 }
 0x78a   : > { %v2795_v24 = vpop.permute.xlu0 %2794 }
 0x78b   : > { %v2812_v28 = vmul.f32 %v3514_v6, %v2795_v24  ;;  %v2785_v41 = vmul.f32 %v5513_v48, %v2761_v11 }
 0x78c   : > { %v2797_v0 = vpop.permute.xlu1 %2796 }
 0x78d   : > { %v2813_v56 = vmul.f32 %v3514_v6, %v2797_v0  ;;  %v2836_v53 = vmul.f32 %v5529_v36, %v2812_v28 }
 0x78e   : > { %v2847_v14 = vpop.permute.xlu0 %2846 }
 0x78f   : > { %v2864_v24 = vmul.f32 %v3520_v33, %v2847_v14  ;;  %v2837_v13 = vmul.f32 %v5533_v45, %v2813_v56  ;;  %v2684_v45 = vmul.f32 %v5453_v35, %v5443_v21  ;;  %v3532_v14 = vld [vmem:[%s5750_s9 + $0x6] ss:$0 sm:$0xff] }
 0x790   : > { %v2849_v62 = vpop.permute.xlu1 %2848 }
 0x791   : > { %v2888_v26 = vmul.f32 %v5561_v29, %v2864_v24 }
 0x792   : > { %v5593_v4 = vpop.permute.xlu0 %2898 }
 0x794   : > { %v5595_v52 = vpop.permute.xlu1 %2900 }
 0x796   : > { %v5597_v55 = vpop.permute.xlu0 %2950 }
 0x798   : > { %v5599_v9 = vpop.permute.xlu1 %2952 }
 0x79a   : > { %v5601_v54 = vpop.permute.xlu0 %3002 }
 0x79c   : > { %v5603_v50 = vpop.permute.xlu1 %3004 }
 0x79d   : > { %5959 = vst [vmem:[#allocation22_spill] sm:$0xff] %v5603_v50  ;;  %v2784_v50 = vmul.f32 %v5509_v22, %v2760_v46 }
 0x79e   : > { %v2688_v16 = vpop.permute.xlu0 %2687 }
 0x79f   : > { %v2706_v57 = vmul.f32 %v3502_v47, %v2688_v16  ;;  %v2737_v16 = vadd.f32 %v2733_v42, %v2686_v12  ;;  %v2788_v46 = vadd.f32 %v2784_v50, %v2736_v40 }
 0x7a0   : > { %v2690_v38 = vpop.permute.xlu1 %2689 }
 0x7a1   : > { %v2707_v59 = vmul.f32 %v3502_v47, %v2690_v38  ;;  %v2730_v25 = vmul.f32 %v5459_v19, %v2706_v57  ;;  %v2789_v11 = vadd.f32 %v2785_v41, %v2737_v16  ;;  %v2840_v61 = vadd.f32 %v2836_v53, %v2788_v46  ;;  %v3526_v19 = vld [vmem:[%s5750_s9 + $0x5] ss:$0 sm:$0xff]  ;;  %v5963_v46 = vld [vmem:[#allocation46_spill] sm:$0xff] }
 0x7a2   : > { %v2739_v27 = vpop.permute.xlu0 %2738  ;;  %v2916_v21 = vmul.f32 %v3526_v19, %v5593_v4 }
 0x7a3   : > { %v2758_v51 = vmul.f32 %v3508_v15, %v2739_v27  ;;  %v2731_v20 = vmul.f32 %v5463_v44, %v2707_v59  ;;  %v2841_v44 = vadd.f32 %v2837_v13, %v2789_v11  ;;  %v2734_v40 = vadd.f32 %v2730_v25, %v2683_v8  ;;  %v5961_v13 = vld [vmem:[#allocation52_spill] sm:$0xff] }
 0x7a4   : > { %v2741_v39 = vpop.permute.xlu1 %2740  ;;  %v2892_v27 = vadd.f32 %v2888_v26, %v2840_v61  ;;  %v2940_v41 = vmul.f32 %v5569_v18, %v2916_v21  ;;  %v5962_v25 = vld [vmem:[#allocation22_spill] sm:$0xff] }
 0x7a5   : > { %v2759_v0 = vmul.f32 %v3508_v15, %v2741_v39  ;;  %v2782_v36 = vmul.f32 %v5469_v63, %v2758_v51  ;;  %v2865_v63 = vmul.f32 %v3520_v33, %v2849_v62  ;;  %v2735_v50 = vadd.f32 %v2731_v20, %v2684_v45  ;;  %v5964_v20 = vld [vmem:[#allocation51_spill] sm:$0xff] }
 0x7a6   : > { %v2791_v49 = vpop.permute.xlu0 %2790 }
 0x7a7   : > { %v2810_v23 = vmul.f32 %v3514_v6, %v2791_v49  ;;  %v2783_v31 = vmul.f32 %v5473_v30, %v2759_v0  ;;  %v2786_v35 = vadd.f32 %v2782_v36, %v2734_v40  ;;  %v2944_v36 = vadd.f32 %v2940_v41, %v2892_v27 }
 0x7a8   : > { %v2793_v17 = vpop.permute.xlu1 %2792 }
 0x7a9   : > { %v2811_v48 = vmul.f32 %v3514_v6, %v2793_v17  ;;  %v2834_v56 = vmul.f32 %v5499_v58, %v2810_v23  ;;  %v3538_v58 = vld [vmem:[%s5750_s9 + $0x7] ss:$0 sm:$0xff]  ;;  %v2917_v6 = vmul.f32 %v3526_v19, %v5595_v52 }
 0x7aa   : > { %v2843_v1 = vpop.permute.xlu0 %2842  ;;  %v3020_v24 = vmul.f32 %v3538_v58, %v5601_v54 }
 0x7ab   : > { %v2862_v28 = vmul.f32 %v3520_v33, %v2843_v1  ;;  %v2835_v38 = vmul.f32 %v5503_v2, %v2811_v48  ;;  %v2968_v2 = vmul.f32 %v3532_v14, %v5597_v55  ;;  %v2838_v49 = vadd.f32 %v2834_v56, %v2786_v35  ;;  %v3544_v55 = vld [vmem:[%s5750_s9 + $0x8] ss:$0 sm:$0xff] }
 0x7ac   : > { %v2845_v43 = vpop.permute.xlu1 %2844 }
 0x7ad   : > { %v2863_v60 = vmul.f32 %v3520_v33, %v2845_v43  ;;  %v2886_v30 = vmul.f32 %v5519_v10, %v2862_v28  ;;  %v2787_v33 = vadd.f32 %v2783_v31, %v2735_v50  ;;  %v2889_v10 = vmul.f32 %v5563_v34, %v2865_v63  ;;  %v5967_v31 = vld [vmem:[#allocation19_spill] sm:$0xff] }
 0x7ae   : > { %v2895_v22 = vpop.permute.xlu0 %2894  ;;  %v2992_v18 = vmul.f32 %v5961_v13, %v2968_v2  ;;  %v5971_v2 = vld [vmem:[#allocation17_spill] sm:$0xff] }
 0x7af   : > { %v2914_v29 = vmul.f32 %v3526_v19, %v2895_v22  ;;  %v2887_v62 = vmul.f32 %v5523_v7, %v2863_v60  ;;  %v2839_v1 = vadd.f32 %v2835_v38, %v2787_v33  ;;  %v2969_v7 = vmul.f32 %v3532_v14, %v5599_v9  ;;  %v5970_v33 = vld [vmem:[#allocation34_spill] sm:$0xff] }
 0x7b0   : > { %v2897_v42 = vpop.permute.xlu1 %2896  ;;  %v2890_v51 = vadd.f32 %v2886_v30, %v2838_v49  ;;  %v3021_v9 = vmul.f32 %v3538_v58, %v5962_v25  ;;  %v2893_v26 = vadd.f32 %v2889_v10, %v2841_v44 }
 0x7b1   : > { %v2915_v47 = vmul.f32 %v3526_v19, %v2897_v42  ;;  %v2938_v4 = vmul.f32 %v5546_v3, %v2914_v29  ;;  %v2891_v3 = vadd.f32 %v2887_v62, %v2839_v1  ;;  %v2996_v29 = vadd.f32 %v2992_v18, %v2944_v36  ;;  %v3778_v1 = vld [vmem:[%s5747_s6 + $0x8] sm:$0xff]  }
 0x7b2   : > { %v2947_v17 = vpop.permute.xlu0 %2946 }
 0x7b3   : > { %v2966_v15 = vmul.f32 %v3532_v14, %v2947_v17  ;;  %v2939_v59 = vmul.f32 %v5553_v37, %v2915_v47  ;;  %v5960_v37 = vld [vmem:[#allocation45_spill] sm:$0xff]  ;;  %v2942_v23 = vadd.f32 %v2938_v4, %v2890_v51  ;;  %v5969_v47 = vld [vmem:[#allocation32_spill] sm:$0xff] }
 0x7b4   : > { %v2949_v43 = vpop.permute.xlu1 %2948  ;;  %v2941_v16 = vmul.f32 %v5960_v37, %v2917_v6  ;;  %v5968_v17 = vld [vmem:[#allocation21_spill] sm:$0xff] }
 0x7b5   : > { %v2967_v39 = vmul.f32 %v3532_v14, %v2949_v43  ;;  %v2990_v53 = vmul.f32 %v5565_v32, %v2966_v15  ;;  %v2943_v22 = vadd.f32 %v2939_v59, %v2891_v3  ;;  %v5965_v32 = vld [vmem:[#allocation18_spill] sm:$0xff]  ;;  %v3045_v63 = vmul.f32 %v5968_v17, %v3021_v9 }
 0x7b6   : > { %v2999_v57 = vpop.permute.xlu0 %2998  ;;  %v2993_v28 = vmul.f32 %v5965_v32, %v2969_v7  ;;  %v2945_v56 = vadd.f32 %v2941_v16, %v2893_v26 }
 0x7b7   : > { %v3018_v12 = vmul.f32 %v3538_v58, %v2999_v57  ;;  %v2991_v34 = vmul.f32 %v5567_v5, %v2967_v39  ;;  %v5966_v5 = vld [vmem:[#allocation16_spill] sm:$0xff]  ;;  %v2994_v19 = vadd.f32 %v2990_v53, %v2942_v23 }
 0x7b8   : > { %v3001_v52 = vpop.permute.xlu1 %3000  ;;  %v3044_v42 = vmul.f32 %v5966_v5, %v3020_v24  ;;  %v2997_v21 = vadd.f32 %v2993_v28, %v2945_v56 }
 0x7b9   : > { %v3019_v0 = vmul.f32 %v3538_v58, %v3001_v52  ;;  %v3042_v8 = vmul.f32 %v5963_v46, %v3018_v12  ;;  %v2995_v45 = vadd.f32 %v2991_v34, %v2943_v22 }
 0x7ba   : > { %v3051_v54 = vpop.permute.xlu0 %3050  ;;  %v3048_v35 = vadd.f32 %v3044_v42, %v2996_v29  ;;  %v3049_v39 = vadd.f32 %v3045_v63, %v2997_v21 }
 0x7bb   : > { %v3043_v48 = vmul.f32 %v5964_v20, %v3019_v0  ;;  %v3070_v11 = vmul.f32 %v3544_v55, %v3051_v54  ;;  %v3046_v50 = vadd.f32 %v3042_v8, %v2994_v19 }
 0x7bc   : > { %v3053_v61 = vpop.permute.xlu1 %3052 }
 0x7bd   : > { %v3094_v60 = vmul.f32 %v5967_v31, %v3070_v11  ;;  %v3071_v40 = vmul.f32 %v3544_v55, %v3053_v61  ;;  %v3047_v38 = vadd.f32 %v3043_v48, %v2995_v45 }
 0x7be   : > { %v3055_v14 = vpop.permute.xlu0 %3054 }
 0x7bf   : > { %v3095_v44 = vmul.f32 %v5969_v47, %v3071_v40  ;;  %v3072_v27 = vmul.f32 %v3544_v55, %v3055_v14  ;;  %v3098_v43 = vadd.f32 %v3094_v60, %v3046_v50 }
 0x7c0   : > { %v3057_v30 = vpop.permute.xlu1 %3056 }
 0x7c1   : > { %v3099_v58 = vadd.f32 %v3095_v44, %v3047_v38  ;;  %v3096_v62 = vmul.f32 %v5970_v33, %v3072_v27  ;;  %v3073_v15 = vmul.f32 %v3544_v55, %v3057_v30 }
 0x7c3   : > { %v3100_v6 = vadd.f32 %v3096_v62, %v3048_v35  ;;  %v3097_v49 = vmul.f32 %v5971_v2, %v3073_v15  ;;  %v3106_v4 = vpack.c.bf16 %v3099_v58, %v3098_v43 }
 0x7c5   : > { %v3101_v57 = vadd.f32 %v3097_v49, %v3049_v39  ;;  %3680 = vmatprep.subr.bf16.mxu0 %v3106_v4 }
 0x7c6   : > { %3681 = vmatpush3.bf16.msra.mxu0 %v3106_v4 }
 0x7c7   : > { %v3107_v10 = vpack.c.bf16 %v3101_v57, %v3100_v6 }
 0x7c9   : > { %3682 = vmatprep.subr.bf16.mxu0 %v3107_v10 }
 0x7ca   : > { %3683 = vmatpush3.bf16.msra.mxu0 %v3107_v10 }
 0x7cd   : > { %3685 = vmatmul.mubr.msk.bf16.vlgmr.msra.gmra.mrb[20].mxu0 %vm523_vm0, %v3778_v1 }
 0x7cf   : > { %v3115_v59 = vpop.permute.xlu0 %3114 }
 0x7d1   : > { %v3120_v12 = vpop.permute.xlu1 %3119 }
 0x7d3   : > { %v3125_v41 = vpop.permute.xlu0 %3124 }
 0x7d5   : > { %v3130_v52 = vpop.permute.xlu1 %3129 }
 0x8a0   : > { %v3686_v7 = vpop.f32.mrb[20].mxu0 }
 0x8a1   : > { %v3191_v24 = vadd.f32 %v3686_v7, %v3125_v41  ;;  %v3182_v51 = vpop.f32.mrb[21].mxu0 }
 0x8a2   : > { %v3183_v55 = vadd.f32 %v3182_v51, %v3115_v59  ;;  %v3687_v3 = vpop.f32.mrb[22].mxu0 }
 0x8a3   : > { %3199 = vst [vmem:[%s3999_s28 + $0x10] sm:$0xff] %v3191_v24  ;;  %v3194_v53 = vadd.f32 %v3687_v3, %v3130_v52  ;;  %v3185_v34 = vpop.f32.mrb[23].mxu0 }
 0x8a4   : > { %3197 = vst [vmem:[%s3999_s28] sm:$0xff] %v3183_v55  ;;  %v3186_v0 = vadd.f32 %v3185_v34, %v3120_v12 }
 0x8a5   : > { %3200 = vst [vmem:[%s3999_s28 + $0x18] sm:$0xff] %v3194_v53 }
 0x8a6   : > { %3198 = vst [vmem:[%s3999_s28 + $0x8] sm:$0xff] %v3186_v0 }
 0x8a7   : > { %3792 = shalt.err (!%p3789_p6)
}
 0x8a8   : > { %s3793_s28 = scalar_lea.hbm %s5685_s29, 512  ;;  %s3797_s1 = scalar_lea.hbm %s5752_s11, 1024 }
 0x8a9   : > { %p3794_p7 = scmp.ne.s32.totalorder %s5685_s29, %s3793_s28  ;;  %p3798_p11 = scmp.lt.u32.totalorder %s5685_s29, %s5752_s11 }
 0x8aa   : > { %p3799_p12 = scmp.lt.u32.totalorder %s3797_s1, %s3793_s28  ;;  %p3801_p0 = scmp.lt.u32.totalorder %s3793_s28, %s5685_s29 }
 0x8ab   : > { %p3795_p9 = pnand %p3794_p7, %p3974_p4 }
 0x8ac   : > { %p3800_p13 = por %p3799_p12, %p3798_p11 }
 0x8ad   : > { %p3796_p10 = pneg %p3795_p9 }
 0x8ae   : > { %p3802_p1 = por %p3801_p0, %p3800_p13 }
 0x8b0   : > { %p3803_p2 = pnand %p3802_p1, %p3796_p10 }
 0x8b2   : > { %3806 = shalt.err (!%p3803_p2)
}
 0x8b3   : > { %s3873_s4 = smov 128  }
 0x8b4   : > { %3692 = dma.vmem_to_hbm [thread:$0]  (%p3974_p4), %s5688_s24, 512, %s5685_s29, %s5694_s0, %s3873_s4, %s3873_s4, %s5858_s23  }
 0x8b5 PF: > { %p3698_p3 = scmp.ge.s32.totalorder %s3857_s22, 2  ;;  %s3231_s30 = sand.u32 1, %s3837_s17  }
 0x8b6   : > { %s3232_s16 = scalar_lea.sflag [#allocation9], %s3231_s30 }
 0x8b7   : > { %p3695_p5 = pnand %p3698_p3, %p3981_p8 }
 0x8b9   : > { %3832 = dma.done.wait (!%p3695_p5), %s3232_s16, 512  }
 0x8ba   : > { %3834 = vsyncadd (!%p3695_p5), %s3232_s16, 4294966784  ;;  %s24_s22 = sadd.s32 1, %s3857_s22   ;;  %s5974_s27 = sld [smem:[#allocation11_spill]] }
 0x8bb   : > { %p21_p6 = scmp.ge.s32.totalorder %s24_s22, 4   ;;  %s5975_s19 = sld [smem:[#allocation15_spill]] }
 0x8bc   : > { %s5976_s20 = sld [smem:[#allocation12_spill]]  ;;  %s5977_s21 = sld [smem:[#allocation13_spill]] }
 0x8bd   : > { %s5978_s17 = smov %s3841_s18  ;;  %23 = sbr.rel (!%p21_p6) target bundleno = 11 (0xb), region = 130 }
 0x8c0   : > { %s5979_s18 = smov %s5974_s27 }
 0x8c4   :  { %3237 = vsyncpa [#allocation9], 1 }
 0x8c5   :  { %3239 = vsyncpa [#allocation9 + $0x1], 1 }

</bundles_post_ra>
